<compile_context>
chip_gen: v7x
topology: tpu7x:2x2x1
jax: 0.10.0
libtpu: 0.0.40
codegen_flags: <defaults>
</compile_context>

<pallas_src>
import numpy as np
import jax
import jax.numpy as jnp
from jax import lax
from jax.experimental import pallas as pl
from jax.experimental.pallas import tpu as pltpu


def _round_up(x, m):
    return (x + m - 1) // m * m


def _cdiv(a, b):
    return -(-a // b)


def _auto_vmem_limit():
    """~85% of physical per-core VMEM (~54 MiB on v7x, ~108 MiB on v5e/v6e)."""
    try:
        cap = int(pltpu.get_tpu_info().vmem_capacity_bytes)
    except Exception:
        cap = 64 * 1024 * 1024
    return max(32 * 1024 * 1024, int(cap * 0.85))


def _num_tensorcores():
    try:
        info = pltpu.get_tpu_info()
    except Exception:
        return 1
    for name in ("num_cores", "core_count", "num_tensorcores", "tensorcore_count"):
        v = getattr(info, name, None)
        if isinstance(v, int) and v > 0:
            return v
    return 1


def _pick_row_tile(H, W_al, Wp_al, dmax, c_mid, ncls_pad, ck, bs, vmem_limit):
    """Largest row tile TH whose per-step working set fits `vmem_limit`.

    Prefers a single tile (TH == H: no re-streaming of activations / weights
    over row tiles); only splits rows further when the device actually has
    >= 2 TensorCores and the batch axis alone does not feed them.
    """
    margin = 2 * 1024 * 1024

    def fits(th):
        hp = _cdiv(H, th) * th + 2 * dmax
        fixed = (2 * hp * Wp_al * ck * 2        # double-buffered xp Cin-chunk (bf16)
                 + 2 * 9 * ck * c_mid * 2       # double-buffered 3x3 weight chunk (bf16)
                 + c_mid * ncls_pad * 2         # resident 1x1 weights (bf16)
                 + ncls_pad * 4 + margin)
        per_row = W_al * (9 * ck * 2            # im2col scratch (bf16)
                          + c_mid * 4           # f32 accumulator
                          + 4 * ncls_pad * 4)   # prev-in + out blocks (double-buffered f32)
        return fixed + th * per_row <= vmem_limit

    th = 1
    for n_rows in range(1, H + 1):              # balanced tiles: th = ceil(H / n_rows)
        cand = _cdiv(H, n_rows)
        if fits(cand):
            th = cand
            break
    ncores = _num_tensorcores()
    if ncores >= 2 and H > 1 and bs * _cdiv(H, th) < ncores:
        th = min(th, _cdiv(H, ncores))          # only split for a real second core
    return max(1, th)


def _make_branch_kernel(TH, W_al, d, off, ck, nk, c_mid, ncls_pad):
    """Kernel for one dilation-d branch, one (batch, row-tile, Cin-tile) step."""
    taps = [(kh, kw) for kh in range(3) for kw in range(3)]

    def kernel(xp_ref, w3_ref, w1_ref, b1_ref, prev_ref, out_ref, col_ref, acc_ref):
        # xp_ref : (Hp, Wp_al, ck)       bf16 plane zero-padded to dmax, one Cin chunk
        # w3_ref : (9*ck, c_mid)         bf16, taps stacked along K (matches col_ref)
        # w1_ref : (c_mid, ncls_pad)     bf16 1x1 weights (1/nit folded in)
        # b1_ref : (1, ncls_pad)         f32, b3 folded through w1, 1/nit folded in
        # prev_ref / out_ref: (TH, W_al, ncls_pad) f32, aliased running prediction
        # col_ref: (TH*W_al, 9*ck)       bf16 im2col scratch
        # acc_ref: (TH*W_al, c_mid)      f32 conv3x3 accumulator across Cin chunks
        i = pl.program_id(1)
        k = pl.program_id(2)
        row0 = i * TH
        if TH % 8 == 0:
            row0 = pl.multiple_of(row0, 8)

        # Build the im2col patch: the shifted (possibly sublane-misaligned)
        # copies are paid exactly once per Cin chunk.
        for t, (kh, kw) in enumerate(taps):
            r0 = row0 + (off + kh * d)                     # H slice: outer axis, cheap
            c0 = off + kw * d                              # W slice: static start
            patch = xp_ref[pl.ds(r0, TH), c0:c0 + W_al, :]           # (TH, W_al, ck)
            col_ref[:, t * ck:(t + 1) * ck] = patch.reshape(TH * W_al, ck)

        # Single MXU matmul and ONE accumulator update per Cin chunk
        # (vs. 9 accumulator read-modify-writes in the old per-tap loop).
        prod = jnp.dot(col_ref[...], w3_ref[...],
                       preferred_element_type=jnp.float32)

        @pl.when(k == 0)
        def _():
            acc_ref[...] = prod           # first chunk writes (no zero pass)

        @pl.when(k > 0)
        def _():
            acc_ref[...] += prod

        @pl.when(k == nk - 1)
        def _():
            mid = acc_ref[...].astype(jnp.bfloat16)
            out2 = jnp.dot(mid, w1_ref[...],
                           preferred_element_type=jnp.float32) + b1_ref[...]
            out_ref[...] = prev_ref[...] + out2.reshape(TH, W_al, ncls_pad)

    return kernel


def _branch_forward(xp, w3_s, w1p, b1p, pred_in, *, dilation, padding, dmax,
                    H_pad, W_al, TH, ck, vmem_limit):
    """One ASPP branch: dilated 3x3 conv then 1x1 conv, accumulated onto pred_in."""
    bs, Hp, Wp_al, c_in = xp.shape
    nk, K9, c_mid = w3_s.shape
    ncls_pad = w1p.shape[1]
    d = int(dilation)
    assert padding == dilation, "spatial size must be preserved (as in deeplab)"
    assert K9 == 9 * ck and c_in == nk * ck and ck % 128 == 0
    assert H_pad % TH == 0
    n_rows = H_pad // TH
    off = dmax - d
    assert off >= 0
    assert off + 2 * d + W_al <= Wp_al
    assert (n_rows - 1) * TH + off + 2 * d + TH <= Hp

    kernel = _make_branch_kernel(TH, W_al, d, off, ck, nk, c_mid, ncls_pad)

    flops = 2 * bs * H_pad * W_al * c_mid * (9 * c_in + ncls_pad)
    bytes_accessed = (bs * n_rows * Hp * Wp_al * c_in * 2      # activations
                      + bs * n_rows * 9 * c_in * c_mid * 2     # 3x3 weights
                      + 2 * bs * H_pad * W_al * ncls_pad * 4   # pred read + write
                      + c_mid * ncls_pad * 2)
    cost = pl.CostEstimate(flops=int(flops), transcendentals=0,
                           bytes_accessed=int(bytes_accessed))

    return pl.pallas_call(
        kernel,
        out_shape=jax.ShapeDtypeStruct((bs, H_pad, W_al, ncls_pad), jnp.float32),
        grid_spec=pltpu.PrefetchScalarGridSpec(
            num_scalar_prefetch=0,
            grid=(bs, n_rows, nk),                    # (batch, row-tiles, Cin-tiles)
            in_specs=[
                pl.BlockSpec((None, Hp, Wp_al, ck), lambda b, i, k: (b, 0, 0, k)),
                pl.BlockSpec((None, 9 * ck, c_mid), lambda b, i, k: (k, 0, 0)),
                pl.BlockSpec((c_mid, ncls_pad), lambda b, i, k: (0, 0)),
                pl.BlockSpec((1, ncls_pad), lambda b, i, k: (0, 0)),
                pl.BlockSpec((None, TH, W_al, ncls_pad), lambda b, i, k: (b, i, 0, 0)),
            ],
            out_specs=pl.BlockSpec((None, TH, W_al, ncls_pad),
                                   lambda b, i, k: (b, i, 0, 0)),
            scratch_shapes=[pltpu.VMEM((TH * W_al, 9 * ck), jnp.bfloat16),
                            pltpu.VMEM((TH * W_al, c_mid), jnp.float32)],
        ),
        compiler_params=pltpu.CompilerParams(
            dimension_semantics=("parallel", "parallel", "arbitrary"),
            vmem_limit_bytes=int(vmem_limit)),
        cost_estimate=cost,
        input_output_aliases={4: 0},      # pred_in <-> output: in-kernel branch sum
    )(xp, w3_s, w1p, b1p, pred_in)


class DiffAttentionMS:
    """JAX/Pallas port of diffAttention_MS.

    Master parameters (f32, channels-last, equivalent to the torch shapes):
      w3: (3, 3, c_in, c_mid)   <- torch (c_mid, c_in, 3, 3)
      b3: (1, c_mid)
      w1: (c_mid, num_classes)  <- torch (num_classes, c_mid, 1, 1)
      b1: (1, num_classes)
    Kernel-side copies: 3x3 weights in bf16 stacked by tap (9, c_in, c_mid);
    1x1 weights scaled by 1/len(branches) with b3 folded into an effective
    bias, zero-padded to 128 lanes, weights in bf16.
    """

    def __init__(self, key, n_stride, num_classes, dilation_series,
                 padding_series, c_in=2048, c_mid=1024):
        # The torch forward adds the 1x1-conv output onto a (bs, ncls, w*h)
        # buffer, which only shape-checks when the 1x1 conv has stride 1.
        assert n_stride == 1
        assert c_mid % 128 == 0
        self.ncls = num_classes
        self.ncls_pad = _round_up(num_classes, 128)
        self.c_in = c_in
        self.c_mid = c_mid
        self.dp = list(zip(dilation_series, padding_series))
        nit = len(self.dp)
        self.params = []       # f32 masters (used by the XLA reference)
        self.kparams = []      # kernel-side tensors
        keys = jax.random.split(key, 4 * nit)
        for i in range(nit):
            k0, k1, k2, k3 = keys[4 * i:4 * i + 4]
            w3 = 0.01 * jax.random.normal(k0, (3, 3, c_in, c_mid), jnp.float32)
            b3 = 0.01 * jax.random.normal(k1, (1, c_mid), jnp.float32)
            w1 = 0.01 * jax.random.normal(k2, (c_mid, num_classes), jnp.float32)
            b1 = 0.01 * jax.random.normal(k3, (1, num_classes), jnp.float32)
            self.params.append((w3, b3, w1, b1))
            # Fold the 3x3 bias through the 1x1 conv and the 1/nit branch
            # averaging into the 1x1 weights / bias (both stages are linear).
            w1_eff = w1 * (1.0 / nit)
            b1_eff = (b3 @ w1 + b1) * (1.0 / nit)
            w1p = (jnp.zeros((c_mid, self.ncls_pad), jnp.float32)
                   .at[:, :num_classes].set(w1_eff).astype(jnp.bfloat16))
            b1p = (jnp.zeros((1, self.ncls_pad), jnp.float32)
                   .at[:, :num_classes].set(b1_eff))
            w3_9 = w3.reshape(9, c_in, c_mid).astype(jnp.bfloat16)   # tap-major
            self.kparams.append((w3_9, w1p, b1p))

    def __call__(self, x_nchw, diffW=None, *, ck=256, row_tile=None):
        # TODO(synk): diffW is accepted for API parity but never used -- the
        # reference torch forward ignores it as well.
        bs, c, H, W = x_nchw.shape
        assert c == self.c_in
        ck = min(ck, self.c_in)
        assert self.c_in % ck == 0 and ck % 128 == 0
        nk = self.c_in // ck

        dmax = max(d for d, _ in self.dp)
        W_al = _round_up(W, 8)                       # aligned output / patch width
        Wp_al = _round_up(W_al + 2 * dmax, 8)        # aligned padded plane width
        vmem_limit = _auto_vmem_limit()

        TH = row_tile if row_tile is not None else _pick_row_tile(
            H, W_al, Wp_al, dmax, self.c_mid, self.ncls_pad, ck, bs, vmem_limit)
        n_rows = _cdiv(H, TH)
        H_pad = n_rows * TH                          # ragged H -> zero-padded rows
        Hp = H_pad + 2 * dmax

        x_nhwc = jnp.transpose(x_nchw, (0, 2, 3, 1))
        # Pad ONCE to the largest dilation (+ ragged-H rows), shared by every
        # branch; bf16 for the MXU.
        xp = jnp.pad(x_nhwc, ((0, 0),
                              (dmax, dmax + H_pad - H),
                              (dmax, Wp_al - dmax - W),
                              (0, 0))).astype(jnp.bfloat16)

        # Branch results are accumulated in-kernel onto this buffer via
        # input_output_aliases (1/nit is already folded into the 1x1 stage).
        pred = jnp.zeros((bs, H_pad, W_al, self.ncls_pad), jnp.float32)
        for (dil, pad), (w3_9, w1p, b1p) in zip(self.dp, self.kparams):
            # (9, c_in, c_mid) -> (nk, 9*ck, c_mid): K ordering matches the
            # im2col columns built in the kernel.  Cheap XLA prep (hoisted /
            # constant-folded under jit).
            w3_s = (w3_9.reshape(9, nk, ck, self.c_mid)
                    .transpose(1, 0, 2, 3)
                    .reshape(nk, 9 * ck, self.c_mid))
            pred = _branch_forward(xp, w3_s, w1p, b1p, pred,
                                   dilation=dil, padding=pad, dmax=dmax,
                                   H_pad=H_pad, W_al=W_al, TH=TH, ck=ck,
                                   vmem_limit=vmem_limit)
        pred = pred[:, :H, :W, :self.ncls]           # drop row / width / lane padding
        # equals torch: pred.reshape(bs, -1, w, h)  (NCHW)
        return jnp.transpose(pred, (0, 3, 1, 2))


def _reference(x_nchw, model):
    """Pure-JAX (XLA conv, f32 HIGHEST) reference of the torch forward."""
    nit = len(model.dp)
    pred = jnp.zeros((x_nchw.shape[0], model.ncls,
                      x_nchw.shape[2], x_nchw.shape[3]), jnp.float32)
    for (dil, pad), (w3, b3, w1, b1) in zip(model.dp, model.params):
        out = lax.conv_general_dilated(
            x_nchw, jnp.transpose(w3, (3, 2, 0, 1)),              # OIHW
            window_strides=(1, 1), padding=((pad, pad), (pad, pad)),
            rhs_dilation=(dil, dil),
            dimension_numbers=("NCHW", "OIHW", "NCHW"),
            precision=lax.Precision.HIGHEST)
        out = out + b3.reshape(1, -1, 1, 1)
        out = lax.conv_general_dilated(
            out, jnp.transpose(w1, (1, 0)).reshape(model.ncls, model.c_mid, 1, 1),
            window_strides=(1, 1), padding="VALID",
            dimension_numbers=("NCHW", "OIHW", "NCHW"),
            precision=lax.Precision.HIGHEST)
        out = out + b1.reshape(1, -1, 1, 1)
        pred = pred + out / nit
    return pred


if __name__ == "__main__":
    # Small demo shapes (module defaults are c_in=2048, c_mid=1024; scaled down
    # here -- the kernel / tiling structure is identical).
    bs, c_in, c_mid, H, W = 2, 256, 128, 16, 16
    num_classes = 21
    dilation_series = [2, 4]
    padding_series = [2, 4]

    key = jax.random.PRNGKey(0)
    kx, kp, kd = jax.random.split(key, 3)
    x = jax.random.normal(kx, (bs, c_in, H, W), jnp.float32)
    diffW = jax.random.normal(kd, (bs, H * W, H * W), jnp.float32)  # unused, API parity

    model = DiffAttentionMS(kp, n_stride=1, num_classes=num_classes,
                            dilation_series=dilation_series,
                            padding_series=padding_series,
                            c_in=c_in, c_mid=c_mid)

    def check(xin, **kw):
        out = model(xin, diffW, **kw)
        out = jax.block_until_ready(out)
        assert out.shape == (xin.shape[0], num_classes, xin.shape[2], xin.shape[3])
        ref = _reference(xin, model)
        # bf16 datapath with f32 MXU accumulation vs an f32 HIGHEST reference.
        np.testing.assert_allclose(np.asarray(out), np.asarray(ref),
                                   rtol=2e-2, atol=2e-3)

    # 1) Exercise the Cin-reduction axis (nk=2) and row tiling (n_rows=2).
    check(x, ck=128, row_tile=8)
    # 2) Ragged H (13 -> padded to 16) with a single Cin chunk (ck=c_in).
    check(x[:, :, :13, :], ck=256, row_tile=8)
    # 3) Defaults: VMEM-aware auto row-tile picker (single tile at these shapes).
    check(x)

    print("KERNEL_OK")
</pallas_src>

<mosaic_0001>
module attributes {stable_mosaic.version = 11 : i64} {
  func.func @kernel(%arg0: i32, %arg1: i32, %arg2: i32, %arg3: memref<1x24x24x128xbf16, #tpu.memory_space<vmem>>, %arg4: memref<1x1152x128xbf16, #tpu.memory_space<vmem>>, %arg5: memref<128x128xbf16, #tpu.memory_space<vmem>>, %arg6: memref<1x128xf32, #tpu.memory_space<vmem>>, %arg7: memref<1x8x16x128xf32, #tpu.memory_space<vmem>>, %arg8: memref<1x8x16x128xf32, #tpu.memory_space<vmem>>, %arg9: memref<128x1152xbf16, #tpu.memory_space<vmem>>, %arg10: memref<128x128xf32, #tpu.memory_space<vmem>>) attributes {dimension_semantics = [#tpu.dimension_semantics<parallel>, #tpu.dimension_semantics<parallel>, #tpu.dimension_semantics<arbitrary>], iteration_bounds = array<i64: 2, 2, 2>, scalar_prefetch = 0 : i64, scratch_operands = 2 : i64, tpu.core_type = #tpu.core_type<tc>, window_params = [{transform_indices = @transform_0, window_bounds = array<i64: 1, 24, 24, 128>}, {transform_indices = @transform_1, window_bounds = array<i64: 1, 1152, 128>}, {pipeline_mode = #tpu.pipeline_mode<synchronous>, transform_indices = @transform_2, window_bounds = array<i64: 128, 128>}, {pipeline_mode = #tpu.pipeline_mode<synchronous>, transform_indices = @transform_3, window_bounds = array<i64: 1, 128>}, {transform_indices = @transform_4, window_bounds = array<i64: 1, 8, 16, 128>}, {transform_indices = @transform_5, window_bounds = array<i64: 1, 8, 16, 128>}]} {
    %c8_i32 = arith.constant 8 : i32
    %0 = arith.muli %arg1, %c8_i32 : i32
    %1 = tpu.assume_multiple %0, 8 : i32
    %c2_i32 = arith.constant 2 : i32
    %2 = arith.addi %1, %c2_i32 : i32
    %c0 = arith.constant 0 : index
    %3 = arith.index_cast %2 : i32 to index
    %c2 = arith.constant 2 : index
    %c0_0 = arith.constant 0 : index
    %4 = vector.load %arg3[%c0, %3, %c2, %c0_0] : memref<1x24x24x128xbf16, #tpu.memory_space<vmem>>, vector<1x8x16x128xbf16>
    %5 = vector.shape_cast %4 : vector<1x8x16x128xbf16> to vector<8x16x128xbf16>
    %6 = vector.shape_cast %5 : vector<8x16x128xbf16> to vector<128x128xbf16>
    %c0_1 = arith.constant 0 : index
    %c0_2 = arith.constant 0 : index
    %7 = vector.load %arg9[%c0_1, %c0_2] : memref<128x1152xbf16, #tpu.memory_space<vmem>>, vector<128x128xbf16>
    tpu.vector_store %arg9[%c0_1, %c0_2], %6 {strides = array<i32>} : memref<128x1152xbf16, #tpu.memory_space<vmem>>, vector<128x128xbf16>,
    %c2_i32_3 = arith.constant 2 : i32
    %8 = arith.addi %1, %c2_i32_3 : i32
    %c0_4 = arith.constant 0 : index
    %9 = arith.index_cast %8 : i32 to index
    %c4 = arith.constant 4 : index
    %c0_5 = arith.constant 0 : index
    %10 = vector.load %arg3[%c0_4, %9, %c4, %c0_5] : memref<1x24x24x128xbf16, #tpu.memory_space<vmem>>, vector<1x8x16x128xbf16>
    %11 = vector.shape_cast %10 : vector<1x8x16x128xbf16> to vector<8x16x128xbf16>
    %12 = vector.shape_cast %11 : vector<8x16x128xbf16> to vector<128x128xbf16>
    %c0_6 = arith.constant 0 : index
    %c128 = arith.constant 128 : index
    %13 = vector.load %arg9[%c0_6, %c128] : memref<128x1152xbf16, #tpu.memory_space<vmem>>, vector<128x128xbf16>
    tpu.vector_store %arg9[%c0_6, %c128], %12 {strides = array<i32>} : memref<128x1152xbf16, #tpu.memory_space<vmem>>, vector<128x128xbf16>,
    %c2_i32_7 = arith.constant 2 : i32
    %14 = arith.addi %1, %c2_i32_7 : i32
    %c0_8 = arith.constant 0 : index
    %15 = arith.index_cast %14 : i32 to index
    %c6 = arith.constant 6 : index
    %c0_9 = arith.constant 0 : index
    %16 = vector.load %arg3[%c0_8, %15, %c6, %c0_9] : memref<1x24x24x128xbf16, #tpu.memory_space<vmem>>, vector<1x8x16x128xbf16>
    %17 = vector.shape_cast %16 : vector<1x8x16x128xbf16> to vector<8x16x128xbf16>
    %18 = vector.shape_cast %17 : vector<8x16x128xbf16> to vector<128x128xbf16>
    %c0_10 = arith.constant 0 : index
    %c256 = arith.constant 256 : index
    %19 = vector.load %arg9[%c0_10, %c256] : memref<128x1152xbf16, #tpu.memory_space<vmem>>, vector<128x128xbf16>
    tpu.vector_store %arg9[%c0_10, %c256], %18 {strides = array<i32>} : memref<128x1152xbf16, #tpu.memory_space<vmem>>, vector<128x128xbf16>,
    %c4_i32 = arith.constant 4 : i32
    %20 = arith.addi %1, %c4_i32 : i32
    %c0_11 = arith.constant 0 : index
    %21 = arith.index_cast %20 : i32 to index
    %c2_12 = arith.constant 2 : index
    %c0_13 = arith.constant 0 : index
    %22 = vector.load %arg3[%c0_11, %21, %c2_12, %c0_13] : memref<1x24x24x128xbf16, #tpu.memory_space<vmem>>, vector<1x8x16x128xbf16>
    %23 = vector.shape_cast %22 : vector<1x8x16x128xbf16> to vector<8x16x128xbf16>
    %24 = vector.shape_cast %23 : vector<8x16x128xbf16> to vector<128x128xbf16>
    %c0_14 = arith.constant 0 : index
    %c384 = arith.constant 384 : index
    %25 = vector.load %arg9[%c0_14, %c384] : memref<128x1152xbf16, #tpu.memory_space<vmem>>, vector<128x128xbf16>
    tpu.vector_store %arg9[%c0_14, %c384], %24 {strides = array<i32>} : memref<128x1152xbf16, #tpu.memory_space<vmem>>, vector<128x128xbf16>,
    %c4_i32_15 = arith.constant 4 : i32
    %26 = arith.addi %1, %c4_i32_15 : i32
    %c0_16 = arith.constant 0 : index
    %27 = arith.index_cast %26 : i32 to index
    %c4_17 = arith.constant 4 : index
    %c0_18 = arith.constant 0 : index
    %28 = vector.load %arg3[%c0_16, %27, %c4_17, %c0_18] : memref<1x24x24x128xbf16, #tpu.memory_space<vmem>>, vector<1x8x16x128xbf16>
    %29 = vector.shape_cast %28 : vector<1x8x16x128xbf16> to vector<8x16x128xbf16>
    %30 = vector.shape_cast %29 : vector<8x16x128xbf16> to vector<128x128xbf16>
    %c0_19 = arith.constant 0 : index
    %c512 = arith.constant 512 : index
    %31 = vector.load %arg9[%c0_19, %c512] : memref<128x1152xbf16, #tpu.memory_space<vmem>>, vector<128x128xbf16>
    tpu.vector_store %arg9[%c0_19, %c512], %30 {strides = array<i32>} : memref<128x1152xbf16, #tpu.memory_space<vmem>>, vector<128x128xbf16>,
    %c4_i32_20 = arith.constant 4 : i32
    %32 = arith.addi %1, %c4_i32_20 : i32
    %c0_21 = arith.constant 0 : index
    %33 = arith.index_cast %32 : i32 to index
    %c6_22 = arith.constant 6 : index
    %c0_23 = arith.constant 0 : index
    %34 = vector.load %arg3[%c0_21, %33, %c6_22, %c0_23] : memref<1x24x24x128xbf16, #tpu.memory_space<vmem>>, vector<1x8x16x128xbf16>
    %35 = vector.shape_cast %34 : vector<1x8x16x128xbf16> to vector<8x16x128xbf16>
    %36 = vector.shape_cast %35 : vector<8x16x128xbf16> to vector<128x128xbf16>
    %c0_24 = arith.constant 0 : index
    %c640 = arith.constant 640 : index
    %37 = vector.load %arg9[%c0_24, %c640] : memref<128x1152xbf16, #tpu.memory_space<vmem>>, vector<128x128xbf16>
    tpu.vector_store %arg9[%c0_24, %c640], %36 {strides = array<i32>} : memref<128x1152xbf16, #tpu.memory_space<vmem>>, vector<128x128xbf16>,
    %c6_i32 = arith.constant 6 : i32
    %38 = arith.addi %1, %c6_i32 : i32
    %c0_25 = arith.constant 0 : index
    %39 = arith.index_cast %38 : i32 to index
    %c2_26 = arith.constant 2 : index
    %c0_27 = arith.constant 0 : index
    %40 = vector.load %arg3[%c0_25, %39, %c2_26, %c0_27] : memref<1x24x24x128xbf16, #tpu.memory_space<vmem>>, vector<1x8x16x128xbf16>
    %41 = vector.shape_cast %40 : vector<1x8x16x128xbf16> to vector<8x16x128xbf16>
    %42 = vector.shape_cast %41 : vector<8x16x128xbf16> to vector<128x128xbf16>
    %c0_28 = arith.constant 0 : index
    %c768 = arith.constant 768 : index
    %43 = vector.load %arg9[%c0_28, %c768] : memref<128x1152xbf16, #tpu.memory_space<vmem>>, vector<128x128xbf16>
    tpu.vector_store %arg9[%c0_28, %c768], %42 {strides = array<i32>} : memref<128x1152xbf16, #tpu.memory_space<vmem>>, vector<128x128xbf16>,
    %c6_i32_29 = arith.constant 6 : i32
    %44 = arith.addi %1, %c6_i32_29 : i32
    %c0_30 = arith.constant 0 : index
    %45 = arith.index_cast %44 : i32 to index
    %c4_31 = arith.constant 4 : index
    %c0_32 = arith.constant 0 : index
    %46 = vector.load %arg3[%c0_30, %45, %c4_31, %c0_32] : memref<1x24x24x128xbf16, #tpu.memory_space<vmem>>, vector<1x8x16x128xbf16>
    %47 = vector.shape_cast %46 : vector<1x8x16x128xbf16> to vector<8x16x128xbf16>
    %48 = vector.shape_cast %47 : vector<8x16x128xbf16> to vector<128x128xbf16>
    %c0_33 = arith.constant 0 : index
    %c896 = arith.constant 896 : index
    %49 = vector.load %arg9[%c0_33, %c896] : memref<128x1152xbf16, #tpu.memory_space<vmem>>, vector<128x128xbf16>
    tpu.vector_store %arg9[%c0_33, %c896], %48 {strides = array<i32>} : memref<128x1152xbf16, #tpu.memory_space<vmem>>, vector<128x128xbf16>,
    %c6_i32_34 = arith.constant 6 : i32
    %50 = arith.addi %1, %c6_i32_34 : i32
    %c0_35 = arith.constant 0 : index
    %51 = arith.index_cast %50 : i32 to index
    %c6_36 = arith.constant 6 : index
    %c0_37 = arith.constant 0 : index
    %52 = vector.load %arg3[%c0_35, %51, %c6_36, %c0_37] : memref<1x24x24x128xbf16, #tpu.memory_space<vmem>>, vector<1x8x16x128xbf16>
    %53 = vector.shape_cast %52 : vector<1x8x16x128xbf16> to vector<8x16x128xbf16>
    %54 = vector.shape_cast %53 : vector<8x16x128xbf16> to vector<128x128xbf16>
    %c0_38 = arith.constant 0 : index
    %c1024 = arith.constant 1024 : index
    %55 = vector.load %arg9[%c0_38, %c1024] : memref<128x1152xbf16, #tpu.memory_space<vmem>>, vector<128x128xbf16>
    tpu.vector_store %arg9[%c0_38, %c1024], %54 {strides = array<i32>} : memref<128x1152xbf16, #tpu.memory_space<vmem>>, vector<128x128xbf16>,
    %c0_39 = arith.constant 0 : index
    %c0_40 = arith.constant 0 : index
    %56 = vector.load %arg9[%c0_39, %c0_40] : memref<128x1152xbf16, #tpu.memory_space<vmem>>, vector<128x1152xbf16>
    %c0_41 = arith.constant 0 : index
    %c0_42 = arith.constant 0 : index
    %c0_43 = arith.constant 0 : index
    %57 = vector.load %arg4[%c0_41, %c0_42, %c0_43] : memref<1x1152x128xbf16, #tpu.memory_space<vmem>>, vector<1x1152x128xbf16>
    %58 = vector.shape_cast %57 : vector<1x1152x128xbf16> to vector<1152x128xbf16>
    %cst = arith.constant dense<0.000000e+00> : vector<128x128xf32>
    %59 = tpu.matmul %56, %58, %cst {dimension_numbers = #tpu.dot_dimension_numbers<[1], [0], [0], [1], [0, 0, 1, 1], [], []>} : vector<128x1152xbf16>, vector<1152x128xbf16>, vector<128x128xf32> -> vector<128x128xf32>
    %c0_i32 = arith.constant 0 : i32
    %60 = arith.cmpi eq, %arg2, %c0_i32 : i32
    %61 = arith.extui %60 : i1 to i32
    %c0_i32_44 = arith.constant 0 : i32
    %62 = arith.cmpi ne, %61, %c0_i32_44 : i32
    scf.if %62 {
      %c0_48 = arith.constant 0 : index
      %c0_49 = arith.constant 0 : index
      %69 = vector.load %arg10[%c0_48, %c0_49] : memref<128x128xf32, #tpu.memory_space<vmem>>, vector<128x128xf32>
      tpu.vector_store %arg10[%c0_48, %c0_49], %59 {strides = array<i32>} : memref<128x128xf32, #tpu.memory_space<vmem>>, vector<128x128xf32>,
    } else {
    }
    %c0_i32_45 = arith.constant 0 : i32
    %63 = arith.cmpi sgt, %arg2, %c0_i32_45 : i32
    %64 = arith.extui %63 : i1 to i32
    %c0_i32_46 = arith.constant 0 : i32
    %65 = arith.cmpi ne, %64, %c0_i32_46 : i32
    scf.if %65 {
      %c0_48 = arith.constant 0 : index
      %c0_49 = arith.constant 0 : index
      %69 = vector.load %arg10[%c0_48, %c0_49] : memref<128x128xf32, #tpu.memory_space<vmem>>, vector<128x128xf32>
      %70 = arith.addf %69, %59 : vector<128x128xf32>
      %c0_50 = arith.constant 0 : index
      %c0_51 = arith.constant 0 : index
      %71 = vector.load %arg10[%c0_50, %c0_51] : memref<128x128xf32, #tpu.memory_space<vmem>>, vector<128x128xf32>
      tpu.vector_store %arg10[%c0_50, %c0_51], %70 {strides = array<i32>} : memref<128x128xf32, #tpu.memory_space<vmem>>, vector<128x128xf32>,
    } else {
    }
    %c1_i32 = arith.constant 1 : i32
    %66 = arith.cmpi eq, %arg2, %c1_i32 : i32
    %67 = arith.extui %66 : i1 to i32
    %c0_i32_47 = arith.constant 0 : i32
    %68 = arith.cmpi ne, %67, %c0_i32_47 : i32
    scf.if %68 {
      %c0_48 = arith.constant 0 : index
      %c0_49 = arith.constant 0 : index
      %69 = vector.load %arg10[%c0_48, %c0_49] : memref<128x128xf32, #tpu.memory_space<vmem>>, vector<128x128xf32>
      %70 = arith.truncf %69 : vector<128x128xf32> to vector<128x128xbf16>
      %c0_50 = arith.constant 0 : index
      %c0_51 = arith.constant 0 : index
      %71 = vector.load %arg5[%c0_50, %c0_51] : memref<128x128xbf16, #tpu.memory_space<vmem>>, vector<128x128xbf16>
      %cst_52 = arith.constant dense<0.000000e+00> : vector<128x128xf32>
      %72 = tpu.matmul %70, %71, %cst_52 {dimension_numbers = #tpu.dot_dimension_numbers<[1], [0], [0], [1], [0, 0, 1, 1], [], []>} : vector<128x128xbf16>, vector<128x128xbf16>, vector<128x128xf32> -> vector<128x128xf32>
      %c0_53 = arith.constant 0 : index
      %c0_54 = arith.constant 0 : index
      %73 = vector.load %arg6[%c0_53, %c0_54] : memref<1x128xf32, #tpu.memory_space<vmem>>, vector<1x128xf32>
      %74 = vector.broadcast %73 : vector<1x128xf32> to vector<128x128xf32>
      %75 = arith.addf %72, %74 : vector<128x128xf32>
      %c0_55 = arith.constant 0 : index
      %c0_56 = arith.constant 0 : index
      %c0_57 = arith.constant 0 : index
      %c0_58 = arith.constant 0 : index
      %76 = vector.load %arg7[%c0_55, %c0_56, %c0_57, %c0_58] : memref<1x8x16x128xf32, #tpu.memory_space<vmem>>, vector<1x8x16x128xf32>
      %77 = vector.shape_cast %76 : vector<1x8x16x128xf32> to vector<8x16x128xf32>
      %78 = vector.shape_cast %75 : vector<128x128xf32> to vector<8x16x128xf32>
      %79 = arith.addf %77, %78 : vector<8x16x128xf32>
      %c0_59 = arith.constant 0 : index
      %c0_60 = arith.constant 0 : index
      %c0_61 = arith.constant 0 : index
      %c0_62 = arith.constant 0 : index
      %80 = vector.load %arg8[%c0_59, %c0_60, %c0_61, %c0_62] : memref<1x8x16x128xf32, #tpu.memory_space<vmem>>, vector<1x8x16x128xf32>
      %81 = vector.shape_cast %80 : vector<1x8x16x128xf32> to vector<8x16x128xf32>
      %82 = vector.shape_cast %79 : vector<8x16x128xf32> to vector<1x8x16x128xf32>
      tpu.vector_store %arg8[%c0_59, %c0_60, %c0_61, %c0_62], %82 {strides = array<i32>} : memref<1x8x16x128xf32, #tpu.memory_space<vmem>>, vector<1x8x16x128xf32>,
    } else {
    }
    return
  }
  func.func @transform_0(%arg0: i32, %arg1: i32, %arg2: i32) -> (i32, i32, i32, i32) {
    %c0_i32 = arith.constant 0 : i32
    %c0_i32_0 = arith.constant 0 : i32
    %c0_i32_1 = arith.constant 0 : i32
    return %arg0, %c0_i32, %c0_i32_0, %arg2 : i32, i32, i32, i32
  }
  func.func @transform_1(%arg0: i32, %arg1: i32, %arg2: i32) -> (i32, i32, i32) {
    %c0_i32 = arith.constant 0 : i32
    %c0_i32_0 = arith.constant 0 : i32
    %c0_i32_1 = arith.constant 0 : i32
    return %arg2, %c0_i32, %c0_i32_0 : i32, i32, i32
  }
  func.func @transform_2(%arg0: i32, %arg1: i32, %arg2: i32) -> (i32, i32) {
    %c0_i32 = arith.constant 0 : i32
    %c0_i32_0 = arith.constant 0 : i32
    %c0_i32_1 = arith.constant 0 : i32
    return %c0_i32, %c0_i32_0 : i32, i32
  }
  func.func @transform_3(%arg0: i32, %arg1: i32, %arg2: i32) -> (i32, i32) {
    %c0_i32 = arith.constant 0 : i32
    %c0_i32_0 = arith.constant 0 : i32
    %c0_i32_1 = arith.constant 0 : i32
    return %c0_i32, %c0_i32_0 : i32, i32
  }
  func.func @transform_4(%arg0: i32, %arg1: i32, %arg2: i32) -> (i32, i32, i32, i32) {
    %c0_i32 = arith.constant 0 : i32
    %c0_i32_0 = arith.constant 0 : i32
    %c0_i32_1 = arith.constant 0 : i32
    return %arg0, %arg1, %c0_i32, %c0_i32_0 : i32, i32, i32, i32
  }
  func.func @transform_5(%arg0: i32, %arg1: i32, %arg2: i32) -> (i32, i32, i32, i32) {
    %c0_i32 = arith.constant 0 : i32
    %c0_i32_0 = arith.constant 0 : i32
    %c0_i32_1 = arith.constant 0 : i32
    return %arg0, %arg1, %c0_i32, %c0_i32_0 : i32, i32, i32, i32
  }
}

</mosaic_0001>

<bundles_post_ra>
// kernel: tpu_custom_call.1
= control target key start
LH: loop header
LB: loop body
LE: loop exit
PB: predicated region body
PF: predicated region fallthrough
CT: control target
= control target key end

     0   :  { %s5949_s0 = inlined_call_operand.hbm [shape: bf16[2,24,24,256], index: 0, kind: input, shape index: {}]   ;;  %s5950_s1 = inlined_call_operand.hbm [shape: bf16[2,1152,128], index: 1, kind: input, shape index: {}]   ;;  %s5951_s2 = inlined_call_operand.vmem [shape: bf16[128,128], index: 2, kind: input, shape index: {}]   ;;  %s5952_s3 = inlined_call_operand.vmem [shape: f32[1,128], index: 3, kind: input, shape index: {}]   ;;  %s5953_s4 = inlined_call_operand.hbm [shape: f32[2,16,16,128], index: 4, kind: input, shape index: {}, may-alias: {4,5}]   ;;  %s5954_s5 = inlined_call_operand.hbm [shape: f32[2,16,16,128], index: 5, kind: output, shape index: {}, may-alias: {4,5}]  }
   0x1   :  { %5980 = sst [smem:[#allocation29_spill]] %s5949_s0 }
   0x2   :  { %5981 = sst [smem:[#allocation30_spill]] %s5950_s1 }
   0x3   :  { %5982 = sst [smem:[#allocation31_spill]] %s5951_s2 }
   0x4   :  { %5983 = sst [smem:[#allocation32_spill]] %s5952_s3 }
   0x5   :  { %5984 = sst [smem:[#allocation33_spill]] %s5954_s5 }
   0x6   :  { %10 = vsyncpa [#allocation5], 0 }
   0x7   :  { %12 = vsyncpa [#allocation5 + $0x1], 0 }
   0x8   :  { %13 = vsyncpa [#allocation8], 0 }
   0x9   :  { %15 = vsyncpa [#allocation8 + $0x1], 0 }
   0xa   :  { %16 = vsyncpa [#allocation6], 0 }
   0xb   :  { %18 = vsyncpa [#allocation6 + $0x1], 0  ;;  %s4692_s18 = smov 0   ;;  %s4694_s19 = smov 0  }
   0xc   :  { %s4696_s20 = smov 0   ;;  %s4698_s21 = smov 0  }
   0xd   :  { %s4700_s22 = smov 0   ;;  %s4702_s23 = smov 0  }
   0xe   :  { %s4704_s24 = smov 0   ;;  %s4706_s25 = smov 0  }
   0xf   :  { %s4708_s26 = smov 0   ;;  %s4710_s27 = smov 0  }
  0x10   :  { %s4712_s28 = smov 0   ;;  %s4714_s29 = smov 0  }
  0x11   :  { %s4716_s30 = smov 0   ;;  %s4718_s6 = smov 0  }
  0x12   :  { %s4720_s7 = smov 0   ;;  %s4722_s8 = smov 0  }
  0x13 LB: > { %5985 = sst [smem:[#allocation15_spill]] %s4590_s18  ;;  %s4771_s9 = sadd.s32 4294967295, %s4650_s8   ;;  %s4650_s8 = sphi %s4722_s8, %s24_s8   ;;  %s4646_s7 = sphi %s4720_s7, %s6072_s7   ;;  %s4642_s6 = sphi %s4718_s6, %s6071_s6   ;;  %s4638_s30 = sphi %s4716_s30, %s6070_s30   ;;  %s4634_s29 = sphi %s4714_s29, %s6069_s29   ;;  %s4630_s28 = sphi %s4712_s28, %s6068_s28   ;;  %s4626_s27 = sphi %s4710_s27, %s6067_s27   ;;  %s4622_s26 = sphi %s4708_s26, %s6066_s26   ;;  %s4618_s25 = sphi %s4706_s25, %s6065_s25   ;;  %s4614_s24 = sphi %s4704_s24, %s6064_s24   ;;  %s4610_s23 = sphi %s4702_s23, %s6054_s23   ;;  %s4606_s22 = sphi %s4700_s22, %s6063_s22   ;;  %s4602_s21 = sphi %s4698_s21, %s6062_s21   ;;  %s4598_s20 = sphi %s4696_s20, %s6061_s20   ;;  %s4594_s19 = sphi %s4694_s19, %s6060_s19   ;;  %s4590_s18 = sphi %s4692_s18, %s6059_s18  }
  0x14   : > { %5986 = sst [smem:[#allocation16_spill]] %s4594_s19  ;;  %s36_s10 = sadd.s32 1, %s4638_s30 }
  0x15   : > { %5987 = sst [smem:[#allocation17_spill]] %s4610_s23  ;;  %p4774_p0 = scmp.ge.s32.totalorder %s36_s10, 2 }
  0x16   : > { %5988 = sst [smem:[#allocation18_spill]] %s4626_s27  ;;  %p5961_p1 = scmp.eq.s32.totalorder %s4650_s8, 0 }
  0x17   : > { %5989 = sst [smem:[#allocation19_spill]] %s4630_s28  ;;  %p5960_p2 = scmp.eq.s32.totalorder %s4771_s9, 0 }
  0x18   : > { %5990 = sst [smem:[#allocation20_spill]] %s4634_s29  ;;  %s78_s12 = sadd.s32 1, %s4610_s23 }
  0x19   : > { %5991 = sst [smem:[#allocation21_spill]] %s4638_s30  ;;  %s6074_s10 = smov (%p4774_p0, %s36_s10), 0 }
  0x1a   : > { %5992 = sst [smem:[#allocation22_spill]] %s4642_s6  ;;  %p85_p3 = scmp.ne.s32.totalorder %s4610_s23, %s4606_s22 }
  0x1b   : > { %5994 = sst [smem:[#allocation23_spill]] %s6074_s10  ;;  %p91_p4 = scmp.ne.s32.totalorder %s4606_s22, %s4602_s21 }
  0x1c   : > { %s4790_s13 = ssub.s32 %s4638_s30, %s6074_s10  ;;  %p87_p6 = por %p85_p3, %p5961_p1 }
  0x1d   : > { %p76_p5 = scmp.eq.s32.totalorder %s4790_s13, 0  ;;  %p4797_p7 = por %p91_p4, %p5960_p2 }
  0x1e   : > { %p5959_p8 = scmp.lt.s32.totalorder %s4650_s8, 8  ;;  %s241_s16 = sand.u32 1, %s4650_s8  }
  0x1f   : > { %s5995_s14 = scalar_select %p4797_p7, 1, 0 }
  0x20   : > { %s4803_s15 = scalar_select %p76_p5, %s4610_s23, %s78_s12  }
  0x21   : > { %5996 = sst [smem:[#allocation24_spill]] %s5995_s14  ;;  %s243_s17 = sand.u32 1, %s4610_s23  }
  0x22   : > { %5997 = sst [smem:[#allocation25_spill]] %s4803_s15  ;;  %s4148_s5 = smul.u32 576, %s243_s17 }
  0x23   : > { %s4149_s29 = smul.u32 9216, %s4638_s30  ;;  %p4810_p9 = pnand %p5959_p8, %p87_p6 }
  0x24   : > { %s5999_s1 = sld [smem:[#allocation30_spill]]  ;;  %s245_s12 = scalar_lea.vmem [#allocation7], %s4148_s5 }
  0x25   : > { %s252_s17 = sshll.u32 %s245_s12, 4  ;;  %s4822_s15 = scalar_lea.sflag [#allocation8], %s241_s16  ;;  %s4820_s17 = int_to_ptr.vmem [resolvable:$true] %s252_s17 }
  0x26   : > { %p4392_p12 = pneg %p4810_p9 }
  0x2a   : > { %s4818_s2 = scalar_lea.hbm %s5999_s1, %s4149_s29  ;;  %s4395_s10 = scalar_lea.hbm %s5999_s1, 18432 }
  0x2b   : > { %s4390_s23 = scalar_lea.hbm %s4818_s2, 9216  ;;  %p4396_p4 = scmp.lt.u32.totalorder %s4818_s2, %s5999_s1 }
  0x2c   : > { %p4391_p11 = scmp.ne.s32.totalorder %s4818_s2, %s4390_s23  ;;  %p4397_p5 = scmp.lt.u32.totalorder %s4395_s10, %s4390_s23 }
  0x2d   : > { %p4399_p8 = scmp.lt.u32.totalorder %s4390_s23, %s4818_s2 }
  0x2e   : > { %p4393_p13 = pnand %p4392_p12, %p4391_p11  ;;  %p4398_p6 = por %p4397_p5, %p4396_p4 }
  0x30   : > { %p4394_p3 = pneg %p4393_p13  ;;  %p4400_p2 = por %p4399_p8, %p4398_p6 }
  0x32   : > { %p4401_p1 = pnand %p4400_p2, %p4394_p3 }
  0x34   : > { %4404 = shalt.err (!%p4401_p1)
}
  0x35   : > { %s4405_s5 = scalar_lea.vmem %s4820_s17, 9216  ;;  %s4652_s16 = smov [#allocation7]  }
  0x36   : > { %p4406_p11 = scmp.ne.s32.totalorder %s4820_s17, %s4405_s5  ;;  %s4410_s12 = sshll.u32 %s4652_s16, 4  ;;  %s4411_s12 = int_to_ptr.vmem [resolvable:$false] %s4410_s12 }
  0x37   : > { %s4412_s27 = scalar_lea.vmem %s4411_s12, 18432  ;;  %p4413_p7 = scmp.lt.s32.totalorder %s4820_s17, %s4411_s12 }
  0x38   : > { %p4408_p13 = pnand %p4406_p11, %p4392_p12  ;;  %p4414_p4 = scmp.lt.s32.totalorder %s4412_s27, %s4405_s5 }
  0x3a   : > { %p4409_p10 = pneg %p4408_p13  ;;  %p4415_p5 = por %p4414_p4, %p4413_p7 }
  0x3c   : > { %p4416_p8 = pnand %p4415_p5, %p4409_p10 }
  0x3e   : > { %4419 = shalt.err (!%p4416_p8)
}
  0x3f   : > { %s5963_s23 = smov 64   ;;  %s5964_s28 = smov 4  }
  0x40   : > { %4166 = dma.hbm_to_vmem [thread:$0]  (!%p4810_p9), %s4818_s2, 9216, %s4820_s17, %s4822_s15, %s5963_s23, %s5963_s23, %s5964_s28  }
  0x41   : > { %p284_p1 = scmp.lt.s32.totalorder %s4650_s8, 9  ;;  %p6000_p2 = scmp.ge.s32.totalorder %s4650_s8, 1 }
  0x42   : > { %p59_p10 = scmp.ne.s32.totalorder %s4622_s26, %s4618_s25  ;;  %p65_p12 = scmp.ne.s32.totalorder %s4618_s25, %s4614_s24 }
  0x43   : > { %p4856_p7 = pnand %p6000_p2, %p284_p1  ;;  %s219_s5 = sand.u32 1, %s4622_s26  }
  0x44   : > { %s4147_s16 = smul.u32 144, %s4646_s7  ;;  %p6002_p3 = scmp.eq.s32.totalorder %s4650_s8, 0 }
  0x45   : > { %s6001_s3 = scalar_select %p4856_p7, 1, 0 }
  0x46   : > { %p61_p6 = por %p6002_p3, %p59_p10  ;;  %p6003_p11 = scmp.eq.s32.totalorder %s4771_s9, 0 }
  0x47   : > { %s4146_s2 = smul.u32 288, %s219_s5  ;;  %s228_s17 = sadd.s32 %s4638_s30, %s4147_s16 }
  0x48   : > { %p4872_p13 = por %p6003_p11, %p65_p12  ;;  %p6005_p9 = scmp.lt.s32.totalorder %s4650_s8, 8 }
  0x49   : > { %s3293_s27 = sshll.u32 %s228_s17, 6  ;;  %s6007_s0 = sld [smem:[#allocation29_spill]] }
  0x4a   : > { %s6004_s21 = scalar_select %p4872_p13, 1, 0 }
  0x4b   : > { %p4879_p4 = pnand %p6005_p9, %p61_p6  ;;  %s223_s23 = scalar_lea.vmem [#allocation4], %s4146_s2 }
  0x4c   : > { %s231_s28 = sshll.u32 %s223_s23, 4  ;;  %s4890_s16 = scalar_lea.sflag [#allocation5], %s219_s5  ;;  %s4888_s28 = int_to_ptr.vmem [resolvable:$true] %s231_s28 }
  0x4d   : > { %p4422_p8 = pneg %p4879_p4 }
  0x4f   : > { %s4886_s29 = scalar_lea.hbm %s6007_s0, %s3293_s27  ;;  %s4425_s27 = scalar_lea.hbm %s6007_s0, 18432 }
  0x50   : > { %s4420_s1 = scalar_lea.hbm %s4886_s29, 4608  ;;  %p4426_p10 = scmp.lt.u32.totalorder %s4886_s29, %s6007_s0 }
  0x51   : > { %p4421_p5 = scmp.ne.s32.totalorder %s4886_s29, %s4420_s1  ;;  %p4427_p12 = scmp.lt.u32.totalorder %s4425_s27, %s4420_s1 }
  0x52   : > { %p4429_p6 = scmp.lt.u32.totalorder %s4420_s1, %s4886_s29 }
  0x53   : > { %p4423_p1 = pnand %p4422_p8, %p4421_p5  ;;  %p4428_p3 = por %p4427_p12, %p4426_p10 }
  0x55   : > { %p4424_p2 = pneg %p4423_p1  ;;  %p4430_p11 = por %p4429_p6, %p4428_p3 }
  0x57   : > { %p4431_p9 = pnand %p4430_p11, %p4424_p2 }
  0x59   : > { %4434 = shalt.err (!%p4431_p9)
}
  0x5a   : > { %s4435_s23 = scalar_lea.vmem %s4888_s28, 4608  ;;  %s4655_s5 = smov [#allocation4]  }
  0x5b   : > { %p4436_p5 = scmp.ne.s32.totalorder %s4888_s28, %s4435_s23  ;;  %s4440_s2 = sshll.u32 %s4655_s5, 4  ;;  %s4441_s2 = int_to_ptr.vmem [resolvable:$false] %s4440_s2 }
  0x5c   : > { %s4442_s30 = scalar_lea.vmem %s4441_s2, 9216  ;;  %p4443_p7 = scmp.lt.s32.totalorder %s4888_s28, %s4441_s2 }
  0x5d   : > { %p4438_p1 = pnand %p4436_p5, %p4422_p8  ;;  %p4444_p10 = scmp.lt.s32.totalorder %s4442_s30, %s4435_s23 }
  0x5f   : > { %p4439_p13 = pneg %p4438_p1  ;;  %p4445_p12 = por %p4444_p10, %p4443_p7 }
  0x61   : > { %p4446_p3 = pnand %p4445_p12, %p4439_p13 }
  0x63   : > { %4449 = shalt.err (!%p4446_p3)
}
  0x64   : > { %s5967_s1 = smov 128   ;;  %s6008_s10 = smov 4  }
  0x65   : > { %s6009_s17 = smov 64   ;;  %s3290_s12 = sadd.s32 4294967294, %s4650_s8  }
  0x66   : > { %4163 = dma.hbm_to_vmem [thread:$0]  (!%p4879_p4), %s4886_s29, 4608, %s4888_s28, %s4890_s16, %s5967_s1, %s6009_s17, %s6008_s10  }
  0x67   : > { %s39_s27 = sadd.s32 1, %s4642_s6  ;;  %s148_s24 = sadd.s32 1, %s4598_s20 }
  0x68   : > { %s6076_s27 = smov (!%p4774_p0, %s39_s27), %s4642_s6  ;;  %p155_p7 = scmp.ne.s32.totalorder %s4598_s20, %s4594_s19 }
  0x69   : > { %p161_p13 = scmp.ne.s32.totalorder %s4594_s19, %s4590_s18  ;;  %p41_p8 = scmp.ge.s32.totalorder %s6076_s27, 2 }
  0x6a   : > { %p187_p2 = scmp.eq.s32.totalorder %s4771_s9, 7  ;;  %p6010_p6 = scmp.eq.s32.totalorder %s4650_s8, 0 }
  0x6b   : > { %p6012_p4 = scmp.eq.s32.totalorder %s4771_s9, 0  ;;  %s6078_s27 = smov (%p41_p8, %s6076_s27), 0 }
  0x6c   : > { %p4934_p11 = por %p155_p7, %p6010_p6  ;;  %6015 = sst [smem:[#allocation27_spill]] %s6078_s27 }
  0x6d   : > { %p4943_p9 = por %p161_p13, %p6012_p4  ;;  %s6016_s11 = sadd.s32 1, %s4646_s7 }
  0x6e   : > { %s6080_s11 = smov (!%p41_p8, %s6016_s11), %s4646_s7  ;;  %s144_s29 = ssub.s32 %s4642_s6, %s6078_s27 }
  0x6f   : > { %s6013_s28 = scalar_select %p4943_p9, 1, 0 }
  0x70   : > { %p4954_p0 = por %p187_p2, %p155_p7  ;;  %p45_p5 = scmp.ge.s32.totalorder %s6080_s11, 2 }
  0x71   : > { %6014 = sst [smem:[#allocation26_spill]] %s6013_s28  ;;  %p193_p1 = scmp.eq.s32.totalorder %s3290_s12, 7 }
  0x72   : > { %s6017_s16 = scalar_select %p4954_p0, 1, 0 }
  0x73   : > { %s264_s5 = sand.u32 1, %s4598_s20   ;;  %s3760_s2 = sshll.u32 %s4642_s6, 4 }
  0x74   : > { %6018 = sst [smem:[#allocation28_spill]] %s6017_s16  ;;  %s6082_s11 = smov (%p45_p5, %s6080_s11), 0 }
  0x75   : > { %p4965_p10 = por %p193_p1, %p161_p13  ;;  %s3295_s10 = sshll.u32 %s264_s5, 7 }
  0x76   : > { %s47_s17 = ssub.s32 %s4646_s7, %s6082_s11  ;;  %s3298_s27 = sshll.u32 %s4646_s7, 5 }
  0x77   : > { %s6019_s30 = scalar_select %p4965_p10, 1, 0 }
  0x78   : > { %s49_s1 = sor.u32 %s4790_s13, %s47_s17  ;;  %s145_s0 = sor.u32 %s144_s29, %s47_s17 }
  0x79   : > { %p50_p12 = scmp.eq.s32.totalorder %s49_s1, 0  ;;  %p146_p3 = scmp.eq.s32.totalorder %s145_s0, 0 }
  0x7a   : > { %s266_s12 = scalar_lea.vmem [#allocation9], %s3295_s10  ;;  %s6020_s6 = sadd.s32 1, %s4622_s26 }
  0x7b   : > { %s276_s16 = sshll.u32 %s266_s12, 4  ;;  %s273_s19 = sadd.s32 %s3760_s2, %s3298_s27  ;;  %s4981_s16 = int_to_ptr.vmem [resolvable:$true] %s276_s16 }
  0x7c   : > { %s4976_s28 = scalar_select %p50_p12, %s4622_s26, %s6020_s6  }
  0x7d   : > { %s4979_s18 = scalar_select %p146_p3, %s4598_s20, %s148_s24  }
  0x7e   : > { %s3299_s14 = sshll.u32 %s273_s19, 7  ;;  %p6021_p7 = scmp.lt.s32.totalorder %s4650_s8, 8 }
  0x7f   : > { %s4994_s1 = scalar_lea.hbm %s5953_s4, %s3299_s14  ;;  %s4455_s24 = scalar_lea.hbm %s5953_s4, 8192 }
  0x80   : > { %p4987_p13 = pnand %p6021_p7, %p4934_p11  ;;  %s4450_s6 = scalar_lea.hbm %s4994_s1, 2048 }
  0x81   : > { %p4451_p8 = scmp.ne.s32.totalorder %s4994_s1, %s4450_s6  ;;  %p4456_p4 = scmp.lt.u32.totalorder %s4994_s1, %s5953_s4 }
  0x82   : > { %p4452_p2 = pneg %p4987_p13  ;;  %p4457_p5 = scmp.lt.u32.totalorder %s4455_s24, %s4450_s6 }
  0x83   : > { %p4459_p12 = scmp.lt.u32.totalorder %s4450_s6, %s4994_s1 }
  0x84   : > { %p4453_p6 = pnand %p4452_p2, %p4451_p8  ;;  %p4458_p1 = por %p4457_p5, %p4456_p4 }
  0x86   : > { %p4454_p11 = pneg %p4453_p6  ;;  %p4460_p3 = por %p4459_p12, %p4458_p1 }
  0x88   : > { %p4461_p7 = pnand %p4460_p3, %p4454_p11 }
  0x8a   : > { %4464 = shalt.err (!%p4461_p7)
}
  0x8b   : > { %s4465_s14 = scalar_lea.vmem %s4981_s16, 2048  ;;  %s4657_s2 = smov [#allocation9]  }
  0x8c   : > { %p4466_p8 = scmp.ne.s32.totalorder %s4981_s16, %s4465_s14  ;;  %s4470_s10 = sshll.u32 %s4657_s2, 4  ;;  %s4471_s10 = int_to_ptr.vmem [resolvable:$false] %s4470_s10 }
  0x8d   : > { %s4472_s17 = scalar_lea.vmem %s4471_s10, 4096  ;;  %p4473_p0 = scmp.lt.s32.totalorder %s4981_s16, %s4471_s10 }
  0x8e   : > { %p4468_p6 = pnand %p4466_p8, %p4452_p2  ;;  %p4474_p4 = scmp.lt.s32.totalorder %s4472_s17, %s4465_s14 }
  0x90   : > { %p4469_p10 = pneg %p4468_p6  ;;  %p4475_p5 = por %p4474_p4, %p4473_p0 }
  0x92   : > { %p4476_p1 = pnand %p4475_p5, %p4469_p10 }
  0x94   : > { %4479 = shalt.err (!%p4476_p1)
}
  0x95   : > { %s4658_s12 = smov 8   ;;  %s6023_s13 = smov 128  }
  0x96   : > { %4169 = dma.hbm_to_vmem [thread:$0]  (!%p4987_p13), %s4994_s1, 2048, %s4981_s16, %s4822_s15, %s6023_s13, %s6023_s13, %s4658_s12  }
  0x97   : > { %p6024_p2 = scmp.ne.s32.totalorder %s6001_s3, 0 }
  0x98   : > { %s290_s0 = sand.u32 (!%p6024_p2), 1, %s4618_s25   ;;  %p6025_p0 = scmp.ne.s32.totalorder (!%p6024_p2), %s6004_s21, 0 }
  0x99   : > { %288 = sbr.rel (%p6024_p2) target bundleno = 890 (0x37a), region = 40  ;;  %s291_s19 = scalar_lea.sflag (!%p6024_p2), [#allocation5], %s290_s0 }
  0x9a   : > { %s5027_s6 = smul.u32 (!%p6024_p2), 288, %s290_s0 }
  0x9c   : > { %s294_s27 = scalar_lea.vmem (!%p6024_p2), [#allocation4], %s5027_s6 }
  0xa0   : > { %4573 = dma.done.wait (%p6025_p0), %s291_s19, 4608  }
  0xa1   : > { %4575 = vsyncadd (%p6025_p0), %s291_s19, 4294962688  ;;  %s6026_s5 = sld [smem:[#allocation24_spill]]  ;;  %s299_s15 = sand.u32 1, %s4771_s9  }
  0xa2   : > { %s301_s16 = sand.u32 1, %s4606_s22   ;;  %s300_s1 = scalar_lea.sflag [#allocation8], %s299_s15 }
  0xa3   : > { %s4151_s3 = smul.u32 576, %s301_s16 }
  0xa5   : > { %s5036_s24 = scalar_lea.vmem [#allocation7], %s4151_s3 }
  0xa7   : > { %p6027_p10 = scmp.ne.s32.totalorder %s6026_s5, 0 }
  0xa9   : > { %4577 = dma.done.wait (%p6027_p10), %s300_s1, 9216  }
  0xaa   : > { %4579 = vsyncadd (%p6027_p10), %s300_s1, 4294958080  ;;  %s6028_s23 = sld [smem:[#allocation16_spill]] }
  0xb0   : > { %s310_s14 = sand.u32 1, %s6028_s23  }
  0xb1   : > { %s5045_s21 = sshll.u32 %s310_s14, 7 }
  0xb2   : > { %s5048_s2 = scalar_lea.vmem [#allocation9], %s5045_s21 }
  0xb3   : > { %4581 = dma.done.wait (%p4943_p9), %s300_s1, 2048  }
  0xb4   : > { %4583 = vsyncadd (%p4943_p9), %s300_s1, 4294965248  ;;  %v4310_v0 = vld [vmem:[%s5036_s24 + $0x40] sm:$0xff]   ;;  %v4314_v4 = vld [vmem:[%s5036_s24 + $0x48] sm:$0xff]   ;;  %s6030_s9 = sld [smem:[#allocation19_spill]]  ;;  %vm552_vm0 = vcmask 1041408   ;;  %vm553_vm1 = vcmask 1045508  }
  0xb5   : > { %v4311_v1 = vld [vmem:[%s5036_s24 + $0xc0] sm:$0xff]   ;;  %3762 = vmatprep.subr.bf16.mxu0 %v4310_v0  ;;  %v4315_v5 = vld [vmem:[%s5036_s24 + $0xc8] sm:$0xff]   ;;  %v4318_v8 = vld [vmem:[%s5036_s24 + $0x50] sm:$0xff]   ;;  %vm405_vm3 = vcmask 1042432   ;;  %vm406_vm4 = vcmask 1046532   ;;  %vm699_vm5 = vcmask 1040384  }
  0xb6   : > { %v4312_v2 = vld [vmem:[%s5036_s24] sm:$0xff]   ;;  %3826 = vmatprep.subr.bf16.mxu1 %v4311_v1  ;;  %v4316_v6 = vld [vmem:[%s5036_s24 + $0x8] sm:$0xff]   ;;  %v4319_v9 = vld [vmem:[%s5036_s24 + $0xd0] sm:$0xff]   ;;  %vm700_vm6 = vcmask 1044484   ;;  %s5759_s12 = scalar_lea.vmem [#allocation10], %s5045_s21  ;;  %s6037_s13 = sld [smem:[#allocation18_spill]] }
  0xb7   : > { %v4313_v3 = vld [vmem:[%s5036_s24 + $0x80] sm:$0xff]   ;;  %3763 = vmatpush3.bf16.msra.mxu0 %v4312_v2  ;;  %v4317_v7 = vld [vmem:[%s5036_s24 + $0x88] sm:$0xff]   ;;  %v4320_v10 = vld [vmem:[%s5036_s24 + $0x10] sm:$0xff]  }
  0xb8   : > { %3827 = vmatpush3.bf16.msra.mxu1 %v4313_v3  ;;  %3764 = vmatprep.subr.bf16.mxu0 %v4314_v4  ;;  %v4321_v11 = vld [vmem:[%s5036_s24 + $0x90] sm:$0xff]   ;;  %v4322_v12 = vld [vmem:[%s5036_s24 + $0x58] sm:$0xff]   ;;  %v4326_v16 = vld [vmem:[%s5036_s24 + $0x60] sm:$0xff]  }
  0xb9   : > { %3828 = vmatprep.subr.bf16.mxu1 %v4315_v5  ;;  %v4323_v13 = vld [vmem:[%s5036_s24 + $0xd8] sm:$0xff]   ;;  %v4327_v17 = vld [vmem:[%s5036_s24 + $0xe0] sm:$0xff]   ;;  %v4330_v20 = vld [vmem:[%s5036_s24 + $0x68] sm:$0xff]  }
  0xba   : > { %v4324_v14 = vld [vmem:[%s5036_s24 + $0x18] sm:$0xff]   ;;  %v4328_v18 = vld [vmem:[%s5036_s24 + $0x20] sm:$0xff]   ;;  %v4331_v21 = vld [vmem:[%s5036_s24 + $0xe8] sm:$0xff]   ;;  %s3304_s10 = smul.u32 96, %s6030_s9 }
  0xbb   : > { %3765 = vmatpush3.bf16.msra.mxu0 %v4316_v6  ;;  %v4325_v15 = vld [vmem:[%s5036_s24 + $0x98] sm:$0xff]   ;;  %v4329_v19 = vld [vmem:[%s5036_s24 + $0xa0] sm:$0xff]   ;;  %v4332_v22 = vld [vmem:[%s5036_s24 + $0x28] sm:$0xff]  }
  0xbc   : > { %3829 = vmatpush3.bf16.msra.mxu1 %v4317_v7  ;;  %3766 = vmatprep.subr.bf16.mxu0 %v4318_v8  ;;  %v4333_v23 = vld [vmem:[%s5036_s24 + $0xa8] sm:$0xff]   ;;  %v4334_v24 = vld [vmem:[%s5036_s24 + $0x70] sm:$0xff]   ;;  %vm5079_vm2 = vmor %vm552_vm0, %vm553_vm1  ;;  %s5091_s17 = scalar_lea.vmem %s294_s27, %s3304_s10 [#allocation4]  ;;  %p3741_p9 = scmp.ne.s32.totalorder %s6037_s13, 0 }
  0xbd   : > { %3830 = vmatprep.subr.bf16.mxu1 %v4319_v9  ;;  %v4335_v26 = vld [vmem:[%s5036_s24 + $0xf0] sm:$0xff]   ;;  %v4338_v29 = vld [vmem:[%s5036_s24 + $0x78] sm:$0xff]   ;;  %v3347_v35 = vld [vmem:[%s5091_s17 + $0x20] sm:$0x3] }
  0xbe   : > { %v4336_v27 = vld [vmem:[%s5036_s24 + $0x30] sm:$0xff]   ;;  %v4339_v30 = vld [vmem:[%s5036_s24 + $0xf8] sm:$0xff]   ;;  %v560_v38 = vrot.slane %v3347_v35, 6  ;;  %vm5100_vm7 = vmor %vm405_vm3, %vm406_vm4 }
  0xbf   : > { %3767 = vmatpush3.bf16.msra.mxu0 %v4320_v10  ;;  %v4337_v28 = vld [vmem:[%s5036_s24 + $0xb0] sm:$0xff]   ;;  %v4340_v31 = vld [vmem:[%s5036_s24 + $0x38] sm:$0xff]   ;;  %v4342_v41 = vld [vmem:[%s5036_s24 + $0x140] sm:$0xff]  }
  0xc0   : > { %3831 = vmatpush3.bf16.msra.mxu1 %v4321_v11  ;;  %3768 = vmatprep.subr.bf16.mxu0 %v4322_v12  ;;  %v4341_v32 = vld [vmem:[%s5036_s24 + $0xb8] sm:$0xff]   ;;  %v3427_v40 = vld [vmem:[%s5091_s17 + $0x30] sm:$0xe]  ;;  %v3428_v42 = vld [vmem:[%s5091_s17 + $0x34] sm:$0xf] }
  0xc1   : > { %3832 = vmatprep.subr.bf16.mxu1 %v4323_v13  ;;  %v3345_v33 = vld [vmem:[%s5091_s17 + $0x18] sm:$0xc]  ;;  %v3346_v34 = vld [vmem:[%s5091_s17 + $0x1c] sm:$0xf]  ;;  %v3429_v43 = vld [vmem:[%s5091_s17 + $0x38] sm:$0x1] }
  0xc2   : > { %v3369_v36 = vrot.slane %v3345_v33, 10  ;;  %v557_v37 = vrot.slane %v3346_v34, 6  ;;  %v3451_v44 = vrot.slane %v3427_v40, 9  ;;  %v4343_v45 = vld [vmem:[%s5036_s24 + $0x1c0] sm:$0xff]   ;;  %v852_v48 = vrot.slane %v3428_v42, 5  ;;  %vm5122_vm8 = vmor %vm699_vm5, %vm700_vm6  ;;  %v4346_v11 = vld [vmem:[%s5036_s24 + $0x148] sm:$0xff]  }
  0xc3   : > { %3769 = vmatpush3.bf16.msra.mxu0 %v4324_v14  ;;  %v855_v49 = vrot.slane %v3429_v43, 5  ;;  %v3305_v50 = vld [vmem:[%s5091_s17 + $0x18] sm:$0xe]  ;;  %v3306_v51 = vld [vmem:[%s5091_s17 + $0x1c] sm:$0xf]  ;;  %v4344_v6 = vld [vmem:[%s5036_s24 + $0x100] sm:$0xff]  }
  0xc4   : > { %3833 = vmatpush3.bf16.msra.mxu1 %v4325_v15  ;;  %3770 = vmatprep.subr.bf16.mxu0 %v4326_v16  ;;  %v558_v46 = vsel %vm5079_vm2, %v3369_v36, %v557_v37  ;;  %v559_v47 = vrot.slane %v557_v37, 4  ;;  %v3307_v52 = vld [vmem:[%s5091_s17 + $0x20] sm:$0x1]  ;;  %v3329_v53 = vrot.slane %v3305_v50, 9  ;;  %v853_v55 = vsel %vm5100_vm7, %v3451_v44, %v852_v48  ;;  %v3385_v58 = vld [vmem:[%s5091_s17 + $0x18] sm:$0x8] }
  0xc5   : > { %3834 = vmatprep.subr.bf16.mxu1 %v4327_v17  ;;  %v854_v56 = vrot.slane %v852_v48, 4  ;;  %v410_v57 = vrot.slane %v3306_v51, 5  ;;  %v3386_v59 = vld [vmem:[%s5091_s17 + $0x1c] sm:$0xf]  ;;  %v413_v62 = vrot.slane %v3307_v52, 5  ;;  %v3409_v0 = vrot.slane %v3385_v58, 11 }
  0xc6   : > { %v561_v54 = vsel %vm5079_vm2, %v559_v47, %v560_v38  ;;  %v3387_v63 = vld [vmem:[%s5091_s17 + $0x20] sm:$0x7]  ;;  %v704_v1 = vrot.slane %v3386_v59, 7  ;;  %v4347_v13 = vld [vmem:[%s5036_s24 + $0x1c8] sm:$0xff]   ;;  %v3348_v16 = vld [vmem:[%s5091_s17 + $0x24] sm:$0xc] }
  0xc7   : > { %3771 = vmatpush3.bf16.msra.mxu0 %v4328_v18  ;;  %v3377_v61 = vcombine.low %v558_v46, %v561_v54  ;;  %v856_v2 = vsel %vm5100_vm7, %v854_v56, %v855_v49  ;;  %v411_v3 = vsel %vm5100_vm7, %v3329_v53, %v410_v57  ;;  %v412_v4 = vrot.slane %v410_v57, 4  ;;  %v4345_v10 = vld [vmem:[%s5036_s24 + $0x180] sm:$0xff]   ;;  %v3349_v17 = vld [vmem:[%s5091_s17 + $0x28] sm:$0xf]  ;;  %v3310_v35 = vld [vmem:[%s5091_s17 + $0x2c] sm:$0x1] }
  0xc8   : > { %3835 = vmatpush3.bf16.msra.mxu1 %v4329_v19  ;;  %3772 = vmatprep.subr.bf16.mxu0 %v4330_v20  ;;  %v707_v5 = vrot.slane %v3387_v63, 7  ;;  %v3459_v7 = vcombine.low %v853_v55, %v856_v2  ;;  %v705_v8 = vsel %vm5122_vm8, %v3409_v0, %v704_v1  ;;  %v706_v9 = vrot.slane %v704_v1, 4  ;;  %v3350_v19 = vld [vmem:[%s5091_s17 + $0x2c] sm:$0x3]  ;;  %v3309_v34 = vld [vmem:[%s5091_s17 + $0x28] sm:$0xf] }
  0xc9   : > { %3836 = vmatprep.subr.bf16.mxu1 %v4331_v21  ;;  %2350 = vmatprep.mubr.bf16.mxu0 %v3377_v61  ;;  %v414_v12 = vsel %vm5100_vm7, %v412_v4, %v413_v62  ;;  %v3370_v20 = vrot.slane %v3348_v16, 10  ;;  %v564_v21 = vrot.slane %v3349_v17, 6  ;;  %v4348_v33 = vld [vmem:[%s5036_s24 + $0x108] sm:$0xff]   ;;  %v417_v42 = vrot.slane %v3309_v34, 5  ;;  %v3388_v43 = vld [vmem:[%s5091_s17 + $0x24] sm:$0x8] }
  0xca   : > { %2447 = vmatprep.mubr.bf16.mxu1 %v3459_v7  ;;  %v3337_v14 = vcombine.low %v411_v3, %v414_v12  ;;  %v708_v15 = vsel %vm5122_vm8, %v706_v9, %v707_v5  ;;  %v4349_v37 = vld [vmem:[%s5036_s24 + $0x188] sm:$0xff]   ;;  %v420_v46 = vrot.slane %v3310_v35, 5  ;;  %v3410_v48 = vrot.slane %v3388_v43, 11  ;;  %v4350_v50 = vld [vmem:[%s5036_s24 + $0x150] sm:$0xff]   ;;  %v3353_v2 = vld [vmem:[%s5091_s17 + $0x38] sm:$0x3] }
  0xcb   : > { %3773 = vmatpush3.bf16.msra.mxu0 %v4332_v22  ;;  %v3417_v18 = vcombine.low %v705_v8, %v708_v15  ;;  %v3430_v22 = vld [vmem:[%s5091_s17 + $0x3c] sm:$0xe]  ;;  %v3389_v44 = vld [vmem:[%s5091_s17 + $0x28] sm:$0xf]  ;;  %v3390_v47 = vld [vmem:[%s5091_s17 + $0x2c] sm:$0x7] }
  0xcc   : > { %3837 = vmatpush3.bf16.msra.mxu1 %v4333_v23  ;;  %3774 = vmatprep.subr.bf16.mxu0 %v4334_v24  ;;  %v567_v23 = vrot.slane %v3350_v19, 6  ;;  %v3431_v24 = vld [vmem:[%s5091_s17 + $0x40] sm:$0xf]  ;;  %v711_v49 = vrot.slane %v3389_v44, 7  ;;  %v419_v53 = vrot.slane %v417_v42, 4  ;;  %v714_v54 = vrot.slane %v3390_v47, 7 }
  0xcd   : > { %3838 = vmatprep.subr.bf16.mxu1 %v4335_v26  ;;  %v3432_v26 = vld [vmem:[%s5091_s17 + $0x44] sm:$0x1]  ;;  %v4351_v58 = vld [vmem:[%s5036_s24 + $0x1d0] sm:$0xff]   ;;  %v3433_v5 = vld [vmem:[%s5091_s17 + $0x48] sm:$0xe] }
  0xce   : > { %v712_v56 = vsel %vm5122_vm8, %v3410_v48, %v711_v49  ;;  %v713_v57 = vrot.slane %v711_v49, 4  ;;  %v421_v59 = vsel %vm5100_vm7, %v419_v53, %v420_v46  ;;  %v3351_v63 = vld [vmem:[%s5091_s17 + $0x30] sm:$0xc]  ;;  %v3352_v0 = vld [vmem:[%s5091_s17 + $0x34] sm:$0xf]  ;;  %v3453_v9 = vrot.slane %v3433_v5, 9 }
  0xcf   : > { %3775 = vmatpush3.bf16.msra.mxu0 %v4336_v27  ;;  %v3452_v27 = vrot.slane %v3430_v22, 9  ;;  %v3371_v3 = vrot.slane %v3351_v63, 10  ;;  %v571_v4 = vrot.slane %v3352_v0, 6  ;;  %v3434_v7 = vld [vmem:[%s5091_s17 + $0x4c] sm:$0xf]  ;;  %v4352_v15 = vld [vmem:[%s5036_s24 + $0x110] sm:$0xff]  }
  0xd0   : > { %3839 = vmatpush3.bf16.msra.mxu1 %v4337_v28  ;;  %3776 = vmatprep.subr.bf16.mxu0 %v4338_v29  ;;  %v565_v28 = vsel %vm5079_vm2, %v3370_v20, %v564_v21  ;;  %v566_v29 = vrot.slane %v564_v21, 4  ;;  %v715_v62 = vsel %vm5122_vm8, %v713_v57, %v714_v54  ;;  %v3435_v8 = vld [vmem:[%s5091_s17 + $0x50] sm:$0x1]  ;;  %v866_v12 = vrot.slane %v3434_v7, 5  ;;  %v3312_v16 = vld [vmem:[%s5091_s17 + $0x34] sm:$0xf] }
  0xd1   : > { %3840 = vmatprep.subr.bf16.mxu1 %v4339_v30  ;;  %v859_v30 = vrot.slane %v3431_v24, 5  ;;  %v3418_v1 = vcombine.low %v712_v56, %v715_v62  ;;  %v3313_v17 = vld [vmem:[%s5091_s17 + $0x38] sm:$0x1]  ;;  %v4353_v19 = vld [vmem:[%s5036_s24 + $0x190] sm:$0xff]   ;;  %v3355_v46 = vld [vmem:[%s5091_s17 + $0x40] sm:$0xf] }
  0xd2   : > { %v568_v38 = vsel %vm5079_vm2, %v566_v29, %v567_v23  ;;  %v867_v21 = vsel %vm5100_vm7, %v3453_v9, %v866_v12  ;;  %v868_v22 = vrot.slane %v866_v12, 4  ;;  %v424_v23 = vrot.slane %v3312_v16, 5  ;;  %v3391_v24 = vld [vmem:[%s5091_s17 + $0x30] sm:$0x8]  ;;  %v3393_v29 = vld [vmem:[%s5091_s17 + $0x38] sm:$0x7] }
  0xd3   : > { %3777 = vmatpush3.bf16.msra.mxu0 %v4340_v31  ;;  %v862_v31 = vrot.slane %v3432_v26, 5  ;;  %v860_v40 = vsel %vm5100_vm7, %v3452_v27, %v859_v30  ;;  %v3392_v26 = vld [vmem:[%s5091_s17 + $0x34] sm:$0xf]  ;;  %v3356_v48 = vld [vmem:[%s5091_s17 + $0x44] sm:$0x3]  ;;  %v4356_v62 = vld [vmem:[%s5036_s24 + $0x118] sm:$0xff]  }
  0xd4   : > { %3841 = vmatpush3.bf16.msra.mxu1 %v4341_v32  ;;  %3890 = vmatprep.subr.bf16.mxu0 %v4342_v41  ;;  %v3308_v32 = vld [vmem:[%s5091_s17 + $0x24] sm:$0xe]  ;;  %v861_v41 = vrot.slane %v859_v30, 4  ;;  %v3411_v30 = vrot.slane %v3391_v24, 11  ;;  %v426_v35 = vrot.slane %v424_v23, 4 }
  0xd5   : > { %3954 = vmatprep.subr.bf16.mxu1 %v4343_v45  ;;  %v3330_v36 = vrot.slane %v3308_v32, 9  ;;  %v3378_v45 = vcombine.low %v565_v28, %v568_v38  ;;  %v427_v28 = vrot.slane %v3313_v17, 5  ;;  %v4354_v32 = vld [vmem:[%s5036_s24 + $0x158] sm:$0xff]   ;;  %v3315_v63 = vld [vmem:[%s5091_s17 + $0x40] sm:$0xf] }
  0xd6   : > { %2351 = vmatmul.mubr.bf16.vlgmr.msra.gmra.mrb[0].mxu0 %v3337_v14  ;;  %v863_v51 = vsel %vm5100_vm7, %v861_v41, %v862_v31  ;;  %v3311_v14 = vld [vmem:[%s5091_s17 + $0x30] sm:$0xe]  ;;  %v718_v31 = vrot.slane %v3392_v26, 7  ;;  %v4355_v41 = vld [vmem:[%s5036_s24 + $0x1d8] sm:$0xff]   ;;  %v3316_v0 = vld [vmem:[%s5091_s17 + $0x44] sm:$0x1] }
  0xd7   : > { %2448 = vmatmul.mubr.bf16.vlgmr.msra.gmra.mrb[0].mxu1 %v3417_v18  ;;  %3891 = vmatpush3.bf16.msra.mxu0 %v4344_v6  ;;  %v418_v52 = vsel %vm5100_vm7, %v3330_v36, %v417_v42  ;;  %v3460_v55 = vcombine.low %v860_v40, %v863_v51  ;;  %v574_v6 = vrot.slane %v3353_v2, 6  ;;  %v3331_v18 = vrot.slane %v3311_v14, 9  ;;  %v3436_v51 = vld [vmem:[%s5091_s17 + $0x54] sm:$0xe]  ;;  %v3437_v53 = vld [vmem:[%s5091_s17 + $0x58] sm:$0xf] }
  0xd8   : > { %3955 = vmatpush3.bf16.msra.mxu1 %v4345_v10  ;;  %3892 = vmatprep.subr.bf16.mxu0 %v4346_v11  ;;  %v3338_v61 = vcombine.low %v418_v52, %v421_v59  ;;  %v572_v10 = vsel %vm5079_vm2, %v3371_v3, %v571_v4  ;;  %v573_v11 = vrot.slane %v571_v4, 4  ;;  %v721_v36 = vrot.slane %v3393_v29, 7  ;;  %v3438_v54 = vld [vmem:[%s5091_s17 + $0x5c] sm:$0x1]  ;;  %v3394_v7 = vld [vmem:[%s5091_s17 + $0x3c] sm:$0x8] }
  0xd9   : > { %3956 = vmatprep.subr.bf16.mxu1 %v4347_v13  ;;  %2358 = vmatprep.mubr.bf16.mxu0 %v3378_v45  ;;  %v869_v13 = vrot.slane %v3435_v8, 5  ;;  %v425_v34 = vsel %vm5100_vm7, %v3331_v18, %v424_v23  ;;  %v719_v38 = vsel %vm5122_vm8, %v3411_v30, %v718_v31  ;;  %v720_v40 = vrot.slane %v718_v31, 4  ;;  %v3354_v45 = vld [vmem:[%s5091_s17 + $0x3c] sm:$0xc]  ;;  %v3395_v8 = vld [vmem:[%s5091_s17 + $0x40] sm:$0xf] }
  0xda   : > { %2455 = vmatprep.mubr.bf16.mxu1 %v3460_v55  ;;  %v575_v20 = vsel %vm5079_vm2, %v573_v11, %v574_v6  ;;  %v428_v42 = vsel %vm5100_vm7, %v426_v35, %v427_v28  ;;  %v3372_v49 = vrot.slane %v3354_v45, 10  ;;  %v581_v52 = vrot.slane %v3356_v48, 6  ;;  %v4357_v2 = vld [vmem:[%s5036_s24 + $0x198] sm:$0xff]   ;;  %v3396_v11 = vld [vmem:[%s5091_s17 + $0x44] sm:$0x7] }
  0xdb   : > { %3893 = vmatpush3.bf16.msra.mxu0 %v4348_v33  ;;  %v3379_v27 = vcombine.low %v572_v10, %v575_v20  ;;  %v870_v33 = vsel %vm5100_vm7, %v868_v22, %v869_v13  ;;  %v3339_v43 = vcombine.low %v425_v34, %v428_v42  ;;  %v722_v44 = vsel %vm5122_vm8, %v720_v40, %v721_v36  ;;  %v4358_v14 = vld [vmem:[%s5036_s24 + $0x160] sm:$0xff]   ;;  %v3358_v28 = vld [vmem:[%s5091_s17 + $0x4c] sm:$0xf]  ;;  %v3359_v30 = vld [vmem:[%s5091_s17 + $0x50] sm:$0x3] }
  0xdc   : > { %3957 = vmatpush3.bf16.msra.mxu1 %v4349_v37  ;;  %3894 = vmatprep.subr.bf16.mxu0 %v4350_v50  ;;  %v3461_v37 = vcombine.low %v867_v21, %v870_v33  ;;  %v3419_v47 = vcombine.low %v719_v38, %v722_v44  ;;  %v578_v50 = vrot.slane %v3355_v46, 6  ;;  %v3454_v55 = vrot.slane %v3436_v51, 9  ;;  %v4359_v22 = vld [vmem:[%s5036_s24 + $0x1e0] sm:$0xff]   ;;  %v3441_v36 = vld [vmem:[%s5091_s17 + $0x68] sm:$0x1] }
  0xdd   : > { %3958 = vmatprep.subr.bf16.mxu1 %v4351_v58  ;;  %v873_v58 = vrot.slane %v3437_v53, 5  ;;  %v876_v59 = vrot.slane %v3438_v54, 5  ;;  %v431_v6 = vrot.slane %v3315_v63, 5  ;;  %v434_v10 = vrot.slane %v3316_v0, 5  ;;  %v3439_v33 = vld [vmem:[%s5091_s17 + $0x60] sm:$0xe] }
  0xde   : > { %2359 = vmatmul.mubr.bf16.gmra.mrb[4].mxu0 %v3338_v61  ;;  %v579_v56 = vsel %vm5079_vm2, %v3372_v49, %v578_v50  ;;  %v580_v57 = vrot.slane %v578_v50, 4  ;;  %v3314_v61 = vld [vmem:[%s5091_s17 + $0x3c] sm:$0xe]  ;;  %v3412_v12 = vrot.slane %v3394_v7, 11  ;;  %v725_v13 = vrot.slane %v3395_v8, 7  ;;  %v4360_v44 = vld [vmem:[%s5036_s24 + $0x120] sm:$0xff]  }
  0xdf   : > { %2456 = vmatmul.mubr.bf16.gmra.mrb[4].mxu1 %v3418_v1  ;;  %3895 = vmatpush3.bf16.msra.mxu0 %v4352_v15  ;;  %v3332_v1 = vrot.slane %v3314_v61, 9  ;;  %v874_v4 = vsel %vm5100_vm7, %v3454_v55, %v873_v58  ;;  %v875_v5 = vrot.slane %v873_v58, 4  ;;  %v433_v17 = vrot.slane %v431_v6, 4  ;;  %v3440_v35 = vld [vmem:[%s5091_s17 + $0x64] sm:$0xf]  ;;  %v4362_v61 = vld [vmem:[%s5036_s24 + $0x168] sm:$0xff]  }
  0xe0   : > { %3959 = vmatpush3.bf16.msra.mxu1 %v4353_v19  ;;  %2366 = vmatprep.mubr.bf16.mxu0 %v3379_v27  ;;  %v582_v3 = vsel %vm5079_vm2, %v580_v57, %v581_v52  ;;  %v728_v18 = vrot.slane %v3396_v11, 7  ;;  %v726_v20 = vsel %vm5122_vm8, %v3412_v12, %v725_v13  ;;  %v727_v21 = vrot.slane %v725_v13, 4  ;;  %v3357_v27 = vld [vmem:[%s5091_s17 + $0x48] sm:$0xc]  ;;  %v3318_v45 = vld [vmem:[%s5091_s17 + $0x4c] sm:$0xf] }
  0xe1   : > { %3896 = vmatprep.subr.bf16.mxu0 %v4354_v32  ;;  %2463 = vmatprep.mubr.bf16.mxu1 %v3461_v37  ;;  %v3380_v9 = vcombine.low %v579_v56, %v582_v3  ;;  %v877_v15 = vsel %vm5100_vm7, %v875_v5, %v876_v59  ;;  %v432_v16 = vsel %vm5100_vm7, %v3332_v1, %v431_v6  ;;  %v3373_v31 = vrot.slane %v3357_v27, 10  ;;  %v3319_v46 = vld [vmem:[%s5091_s17 + $0x50] sm:$0x1]  ;;  %v4361_v48 = vld [vmem:[%s5036_s24 + $0x1a0] sm:$0xff]   ;;  %v3397_v53 = vld [vmem:[%s5091_s17 + $0x48] sm:$0x8] }
  0xe2   : > { %3960 = vmatprep.subr.bf16.mxu1 %v4355_v41  ;;  %v3462_v19 = vcombine.low %v874_v4, %v877_v15  ;;  %v435_v23 = vsel %vm5100_vm7, %v433_v17, %v434_v10  ;;  %v729_v26 = vsel %vm5122_vm8, %v727_v21, %v728_v18  ;;  %v585_v32 = vrot.slane %v3358_v28, 6  ;;  %v3398_v54 = vld [vmem:[%s5091_s17 + $0x4c] sm:$0xf]  ;;  %v3399_v57 = vld [vmem:[%s5091_s17 + $0x50] sm:$0x7] }
  0xe3   : > { %3897 = vmatpush3.bf16.msra.mxu0 %v4356_v62  ;;  %v3340_v24 = vcombine.low %v432_v16, %v435_v23  ;;  %v3420_v29 = vcombine.low %v726_v20, %v729_v26  ;;  %v588_v34 = vrot.slane %v3359_v30, 6  ;;  %v3455_v37 = vrot.slane %v3439_v33, 9  ;;  %v4363_v5 = vld [vmem:[%s5036_s24 + $0x1e8] sm:$0xff]   ;;  %v3361_v10 = vld [vmem:[%s5091_s17 + $0x58] sm:$0xf] }
  0xe4   : > { %3961 = vmatpush3.bf16.msra.mxu1 %v4357_v2  ;;  %3898 = vmatprep.subr.bf16.mxu0 %v4358_v14  ;;  %v586_v38 = vsel %vm5079_vm2, %v3373_v31, %v585_v32  ;;  %v587_v40 = vrot.slane %v585_v32, 4  ;;  %v880_v41 = vrot.slane %v3440_v35, 5  ;;  %v883_v42 = vrot.slane %v3441_v36, 5  ;;  %v3362_v12 = vld [vmem:[%s5091_s17 + $0x5c] sm:$0x3]  ;;  %v4364_v26 = vld [vmem:[%s5036_s24 + $0x128] sm:$0xff]  }
  0xe5   : > { %3962 = vmatprep.subr.bf16.mxu1 %v4359_v22  ;;  %v438_v52 = vrot.slane %v3318_v45, 5  ;;  %v441_v56 = vrot.slane %v3319_v46, 5  ;;  %v3413_v58 = vrot.slane %v3397_v53, 11  ;;  %v732_v59 = vrot.slane %v3398_v54, 7  ;;  %v3442_v15 = vld [vmem:[%s5091_s17 + $0x6c] sm:$0xe] }
  0xe6   : > { %2367 = vmatmul.mubr.bf16.gmra.mrb[8].mxu0 %v3339_v43  ;;  %v3317_v43 = vld [vmem:[%s5091_s17 + $0x48] sm:$0xe]  ;;  %v589_v49 = vsel %vm5079_vm2, %v587_v40, %v588_v34  ;;  %v881_v50 = vsel %vm5100_vm7, %v3455_v37, %v880_v41  ;;  %v882_v51 = vrot.slane %v880_v41, 4  ;;  %v735_v1 = vrot.slane %v3399_v57, 7  ;;  %v3443_v17 = vld [vmem:[%s5091_s17 + $0x70] sm:$0xf] }
  0xe7   : > { %2464 = vmatmul.mubr.bf16.gmra.mrb[8].mxu1 %v3419_v47  ;;  %2374 = vmatprep.mubr.bf16.mxu0 %v3380_v9  ;;  %v3333_v47 = vrot.slane %v3317_v43, 9  ;;  %v3381_v55 = vcombine.low %v586_v38, %v589_v49  ;;  %v440_v0 = vrot.slane %v438_v52, 4  ;;  %v733_v3 = vsel %vm5122_vm8, %v3413_v58, %v732_v59  ;;  %v3360_v9 = vld [vmem:[%s5091_s17 + $0x54] sm:$0xc]  ;;  %v3444_v18 = vld [vmem:[%s5091_s17 + $0x74] sm:$0x1] }
  0xe8   : > { %2471 = vmatprep.mubr.bf16.mxu1 %v3462_v19  ;;  %3899 = vmatpush3.bf16.msra.mxu0 %v4360_v44  ;;  %v884_v62 = vsel %vm5100_vm7, %v882_v51, %v883_v42  ;;  %v734_v4 = vrot.slane %v732_v59, 4  ;;  %v3374_v13 = vrot.slane %v3360_v9, 10  ;;  %v592_v14 = vrot.slane %v3361_v10, 6  ;;  %v3321_v27 = vld [vmem:[%s5091_s17 + $0x58] sm:$0xf]  ;;  %v4365_v30 = vld [vmem:[%s5036_s24 + $0x1a8] sm:$0xff]  }
  0xe9   : > { %3963 = vmatpush3.bf16.msra.mxu1 %v4361_v48  ;;  %v439_v63 = vsel %vm5100_vm7, %v3333_v47, %v438_v52  ;;  %v3463_v2 = vcombine.low %v881_v50, %v884_v62  ;;  %3900 = vmatprep.subr.bf16.mxu0 %v4362_v61  ;;  %v442_v6 = vsel %vm5100_vm7, %v440_v0, %v441_v56  ;;  %v595_v16 = vrot.slane %v3362_v12, 6  ;;  %v3322_v28 = vld [vmem:[%s5091_s17 + $0x5c] sm:$0x1]  ;;  %v3400_v35 = vld [vmem:[%s5091_s17 + $0x54] sm:$0x8] }
  0xea   : > { %v3341_v7 = vcombine.low %v439_v63, %v442_v6  ;;  %v736_v8 = vsel %vm5122_vm8, %v734_v4, %v735_v1  ;;  %3964 = vmatprep.subr.bf16.mxu1 %v4363_v5  ;;  %v3456_v19 = vrot.slane %v3442_v15, 9  ;;  %v593_v20 = vsel %vm5079_vm2, %v3374_v13, %v592_v14  ;;  %v3401_v36 = vld [vmem:[%s5091_s17 + $0x58] sm:$0xf]  ;;  %v3402_v40 = vld [vmem:[%s5091_s17 + $0x5c] sm:$0x7]  ;;  %v4366_v43 = vld [vmem:[%s5036_s24 + $0x170] sm:$0xff]  }
  0xeb   : > { %v3421_v11 = vcombine.low %v733_v3, %v736_v8  ;;  %v594_v21 = vrot.slane %v592_v14, 4  ;;  %v887_v22 = vrot.slane %v3443_v17, 5  ;;  %v890_v23 = vrot.slane %v3444_v18, 5  ;;  %v4367_v51 = vld [vmem:[%s5036_s24 + $0x1f0] sm:$0xff]   ;;  %v3364_v56 = vld [vmem:[%s5091_s17 + $0x64] sm:$0xf] }
  0xec   : > { %v445_v34 = vrot.slane %v3321_v27, 5  ;;  %3901 = vmatpush3.bf16.msra.mxu0 %v4364_v26  ;;  %v448_v38 = vrot.slane %v3322_v28, 5  ;;  %v3414_v41 = vrot.slane %v3400_v35, 11  ;;  %v739_v42 = vrot.slane %v3401_v36, 7  ;;  %v3365_v58 = vld [vmem:[%s5091_s17 + $0x68] sm:$0x3] }
  0xed   : > { %v596_v31 = vsel %vm5079_vm2, %v594_v21, %v595_v16  ;;  %v888_v32 = vsel %vm5100_vm7, %v3456_v19, %v887_v22  ;;  %v889_v33 = vrot.slane %v887_v22, 4  ;;  %3965 = vmatpush3.bf16.msra.mxu1 %v4365_v30  ;;  %v742_v47 = vrot.slane %v3402_v40, 7  ;;  %3902 = vmatprep.subr.bf16.mxu0 %v4366_v43  ;;  %v3445_v62 = vld [vmem:[%s5091_s17 + $0x78] sm:$0xe]  ;;  %v3446_v0 = vld [vmem:[%s5091_s17 + $0x7c] sm:$0xf] }
  0xee   : > { %2375 = vmatmul.mubr.bf16.gmra.mrb[12].mxu0 %v3340_v24  ;;  %v3320_v24 = vld [vmem:[%s5091_s17 + $0x54] sm:$0xe]  ;;  %v3382_v37 = vcombine.low %v593_v20, %v596_v31  ;;  %v447_v46 = vrot.slane %v445_v34, 4  ;;  %v740_v49 = vsel %vm5122_vm8, %v3414_v41, %v739_v42  ;;  %v741_v50 = vrot.slane %v739_v42, 4  ;;  %3966 = vmatprep.subr.bf16.mxu1 %v4367_v51  ;;  %v3447_v1 = vld [vmem:[%s5091_s17 + $0x80] sm:$0x1] }
  0xef   : > { %2472 = vmatmul.mubr.bf16.gmra.mrb[12].mxu1 %v3420_v29  ;;  %2382 = vmatprep.mubr.bf16.mxu0 %v3381_v55  ;;  %v3334_v29 = vrot.slane %v3320_v24, 9  ;;  %v891_v44 = vsel %vm5100_vm7, %v889_v33, %v890_v23  ;;  %v3363_v55 = vld [vmem:[%s5091_s17 + $0x60] sm:$0xc]  ;;  %v599_v61 = vrot.slane %v3364_v56, 6  ;;  %v602_v63 = vrot.slane %v3365_v58, 6  ;;  %v4368_v8 = vld [vmem:[%s5036_s24 + $0x130] sm:$0xff]  }
  0xf0   : > { %2479 = vmatprep.mubr.bf16.mxu1 %v3463_v2  ;;  %v3464_v48 = vcombine.low %v888_v32, %v891_v44  ;;  %v449_v52 = vsel %vm5100_vm7, %v447_v46, %v448_v38  ;;  %v743_v54 = vsel %vm5122_vm8, %v741_v50, %v742_v47  ;;  %v3375_v59 = vrot.slane %v3363_v55, 10  ;;  %v3324_v9 = vld [vmem:[%s5091_s17 + $0x64] sm:$0xf]  ;;  %v3325_v10 = vld [vmem:[%s5091_s17 + $0x68] sm:$0x1]  ;;  %v4369_v12 = vld [vmem:[%s5036_s24 + $0x1b0] sm:$0xff]   ;;  %3903 = vmatpush3.bf16.msra.mxu0 %v4368_v8 }
  0xf1   : > { %v446_v45 = vsel %vm5100_vm7, %v3334_v29, %v445_v34  ;;  %v3422_v57 = vcombine.low %v740_v49, %v743_v54  ;;  %v3457_v2 = vrot.slane %v3445_v62, 9  ;;  %v601_v4 = vrot.slane %v599_v61, 4  ;;  %v3403_v17 = vld [vmem:[%s5091_s17 + $0x60] sm:$0x8]  ;;  %v3404_v18 = vld [vmem:[%s5091_s17 + $0x64] sm:$0xf]  ;;  %3967 = vmatpush3.bf16.msra.mxu1 %v4369_v12 }
  0xf2   : > { %v3342_v53 = vcombine.low %v446_v45, %v449_v52  ;;  %v600_v3 = vsel %vm5079_vm2, %v3375_v59, %v599_v61  ;;  %v894_v5 = vrot.slane %v3446_v0, 5  ;;  %v897_v6 = vrot.slane %v3447_v1, 5  ;;  %v3405_v21 = vld [vmem:[%s5091_s17 + $0x68] sm:$0x7]  ;;  %v4370_v24 = vld [vmem:[%s5036_s24 + $0x178] sm:$0xff]  }
  0xf3   : > { %v603_v13 = vsel %vm5079_vm2, %v601_v4, %v602_v63  ;;  %v452_v16 = vrot.slane %v3324_v9, 5  ;;  %v455_v20 = vrot.slane %v3325_v10, 5  ;;  %v3415_v22 = vrot.slane %v3403_v17, 11  ;;  %3904 = vmatprep.subr.bf16.mxu0 %v4370_v24  ;;  %v4371_v33 = vld [vmem:[%s5036_s24 + $0x1f8] sm:$0xff]   ;;  %v3367_v38 = vld [vmem:[%s5091_s17 + $0x70] sm:$0xf] }
  0xf4   : > { %v895_v14 = vsel %vm5100_vm7, %v3457_v2, %v894_v5  ;;  %v896_v15 = vrot.slane %v894_v5, 4  ;;  %v3383_v19 = vcombine.low %v600_v3, %v603_v13  ;;  %v746_v23 = vrot.slane %v3404_v18, 7  ;;  %3968 = vmatprep.subr.bf16.mxu1 %v4371_v33  ;;  %v3368_v41 = vld [vmem:[%s5091_s17 + $0x74] sm:$0x3]  ;;  %v3448_v44 = vld [vmem:[%s5091_s17 + $0x84] sm:$0xe] }
  0xf5   : > { %v454_v28 = vrot.slane %v452_v16, 4  ;;  %v749_v29 = vrot.slane %v3405_v21, 7  ;;  %v606_v43 = vrot.slane %v3367_v38, 6  ;;  %v609_v45 = vrot.slane %v3368_v41, 6  ;;  %v3449_v46 = vld [vmem:[%s5091_s17 + $0x88] sm:$0xf] }
  0xf6   : > { %2383 = vmatmul.mubr.bf16.gmra.mrb[16].mxu0 %v3341_v7  ;;  %v3323_v7 = vld [vmem:[%s5091_s17 + $0x60] sm:$0xe]  ;;  %v898_v26 = vsel %vm5100_vm7, %v896_v15, %v897_v6  ;;  %v747_v31 = vsel %vm5122_vm8, %v3415_v22, %v746_v23  ;;  %v748_v32 = vrot.slane %v746_v23, 4  ;;  %v3450_v47 = vld [vmem:[%s5091_s17 + $0x8c] sm:$0x1]  ;;  %v901_v51 = vrot.slane %v3449_v46, 5 }
  0xf7   : > { %2480 = vmatmul.mubr.bf16.gmra.mrb[16].mxu1 %v3421_v11  ;;  %2390 = vmatprep.mubr.bf16.mxu0 %v3382_v37  ;;  %v3335_v11 = vrot.slane %v3323_v7, 9  ;;  %v3465_v30 = vcombine.low %v895_v14, %v898_v26  ;;  %v456_v34 = vsel %vm5100_vm7, %v454_v28, %v455_v20  ;;  %v3366_v37 = vld [vmem:[%s5091_s17 + $0x6c] sm:$0xc]  ;;  %v608_v50 = vrot.slane %v606_v43, 4  ;;  %v4372_v54 = vld [vmem:[%s5036_s24 + $0x138] sm:$0xff]   ;;  %v5354_v7 = vld [vmem:[%s5036_s24 + $0x200] sm:$0xff]  }
  0xf8   : > { %2487 = vmatprep.mubr.bf16.mxu1 %v3464_v48  ;;  %v750_v36 = vsel %vm5122_vm8, %v748_v32, %v749_v29  ;;  %v3376_v42 = vrot.slane %v3366_v37, 10  ;;  %v3458_v48 = vrot.slane %v3448_v44, 9  ;;  %v904_v52 = vrot.slane %v3450_v47, 5  ;;  %v3327_v55 = vld [vmem:[%s5091_s17 + $0x70] sm:$0xf]  ;;  %v4373_v58 = vld [vmem:[%s5036_s24 + $0x1b8] sm:$0xff]   ;;  %3905 = vmatpush3.bf16.msra.mxu0 %v4372_v54 }
  0xf9   : > { %v453_v27 = vsel %vm5100_vm7, %v3335_v11, %v452_v16  ;;  %v3423_v40 = vcombine.low %v747_v31, %v750_v36  ;;  %v3328_v56 = vld [vmem:[%s5091_s17 + $0x74] sm:$0x1]  ;;  %v610_v59 = vsel %vm5079_vm2, %v608_v50, %v609_v45  ;;  %v903_v62 = vrot.slane %v901_v51, 4  ;;  %v3406_v0 = vld [vmem:[%s5091_s17 + $0x6c] sm:$0x8]  ;;  %3969 = vmatpush3.bf16.msra.mxu1 %v4373_v58  ;;  %4050 = vmatprep.subr.bf16.mxu0 %v5354_v7 }
  0xfa   : > { %v3343_v35 = vcombine.low %v453_v27, %v456_v34  ;;  %v607_v49 = vsel %vm5079_vm2, %v3376_v42, %v606_v43  ;;  %v902_v61 = vsel %vm5100_vm7, %v3458_v48, %v901_v51  ;;  %v459_v63 = vrot.slane %v3327_v55, 5  ;;  %v3407_v1 = vld [vmem:[%s5091_s17 + $0x70] sm:$0xf]  ;;  %v3408_v4 = vld [vmem:[%s5091_s17 + $0x74] sm:$0x7]  ;;  %4114 = vmatprep.subr.bf16.mxu1 %v5354_v7 }
  0xfb   : > { %v3384_v2 = vcombine.low %v607_v49, %v610_v59  ;;  %v462_v3 = vrot.slane %v3328_v56, 5  ;;  %v3416_v5 = vrot.slane %v3406_v0, 11  ;;  %v753_v6 = vrot.slane %v3407_v1, 7  ;;  %v3507_v18 = vld [vmem:[%s5091_s17 + $0x30] sm:$0x8]  ;;  %v4375_v59 = vld [vmem:[%s5036_s24 + $0x208] sm:$0xff]  }
  0xfc   : > { %v905_v8 = vsel %vm5100_vm7, %v903_v62, %v904_v52  ;;  %v461_v10 = vrot.slane %v459_v63, 4  ;;  %v756_v11 = vrot.slane %v3408_v4, 7  ;;  %v3509_v21 = vld [vmem:[%s5091_s17 + $0x38] sm:$0x7]  ;;  %v3531_v22 = vrot.slane %v3507_v18, 11 }
  0xfd   : > { %v3466_v12 = vcombine.low %v902_v61, %v905_v8  ;;  %v754_v13 = vsel %vm5122_vm8, %v3416_v5, %v753_v6  ;;  %v755_v14 = vrot.slane %v753_v6, 4  ;;  %v3589_v24 = vld [vmem:[%s5091_s17 + $0x48] sm:$0xc]  ;;  %v1143_v26 = vrot.slane %v3509_v21, 7  ;;  %v3590_v27 = vld [vmem:[%s5091_s17 + $0x4c] sm:$0xf] }
  0xfe   : > { %2391 = vmatmul.mubr.bf16.gmra.mrb[20].mxu0 %v3342_v53  ;;  %v3326_v53 = vld [vmem:[%s5091_s17 + $0x6c] sm:$0xe]  ;;  %v463_v15 = vsel %vm5100_vm7, %v461_v10, %v462_v3  ;;  %v3591_v28 = vld [vmem:[%s5091_s17 + $0x50] sm:$0x3]  ;;  %v3613_v29 = vrot.slane %v3589_v24, 10  ;;  %v1432_v32 = vrot.slane %v3590_v27, 6 }
  0xff   : > { %2488 = vmatmul.mubr.bf16.gmra.mrb[20].mxu1 %v3422_v57  ;;  %2398 = vmatprep.mubr.bf16.mxu0 %v3383_v19  ;;  %v3336_v57 = vrot.slane %v3326_v53, 9  ;;  %v757_v17 = vsel %vm5122_vm8, %v755_v14, %v756_v11  ;;  %v3508_v19 = vld [vmem:[%s5091_s17 + $0x34] sm:$0xf]  ;;  %v1435_v33 = vrot.slane %v3591_v28, 6  ;;  %v3467_v34 = vld [vmem:[%s5091_s17 + $0x30] sm:$0xc] }
 0x100   : > { %2495 = vmatprep.mubr.bf16.mxu1 %v3465_v30  ;;  %v3424_v20 = vcombine.low %v754_v13, %v757_v17  ;;  %v1140_v23 = vrot.slane %v3508_v19, 7  ;;  %v3469_v36 = vld [vmem:[%s5091_s17 + $0x38] sm:$0x3]  ;;  %v3491_v37 = vrot.slane %v3467_v34, 10  ;;  %v1434_v41 = vrot.slane %v1432_v32, 4 }
 0x101   : > { %v460_v9 = vsel %vm5100_vm7, %v3336_v57, %v459_v63  ;;  %v3549_v43 = vld [vmem:[%s5091_s17 + $0x48] sm:$0xe]  ;;  %v3550_v44 = vld [vmem:[%s5091_s17 + $0x4c] sm:$0xf]  ;;  %v999_v46 = vrot.slane %v3469_v36, 6 }
 0x102   : > { %v3344_v16 = vcombine.low %v460_v9, %v463_v15  ;;  %v1141_v30 = vsel %vm5122_vm8, %v3531_v22, %v1140_v23  ;;  %v1142_v31 = vrot.slane %v1140_v23, 4  ;;  %v3551_v47 = vld [vmem:[%s5091_s17 + $0x50] sm:$0x1]  ;;  %v3573_v48 = vrot.slane %v3549_v43, 9  ;;  %v3510_v57 = vld [vmem:[%s5091_s17 + $0x3c] sm:$0x8] }
 0x103   : > { %v1288_v49 = vrot.slane %v3550_v44, 5  ;;  %v1436_v50 = vsel %vm5079_vm2, %v1434_v41, %v1435_v33  ;;  %v1291_v53 = vrot.slane %v3551_v47, 5  ;;  %v3511_v58 = vld [vmem:[%s5091_s17 + $0x40] sm:$0xf]  ;;  %v3512_v62 = vld [vmem:[%s5091_s17 + $0x44] sm:$0x7] }
 0x104   : > { %v1144_v38 = vsel %vm5122_vm8, %v1142_v31, %v1143_v26  ;;  %v3532_v63 = vrot.slane %v3510_v57, 11  ;;  %v1147_v0 = vrot.slane %v3511_v58, 7  ;;  %v3592_v1 = vld [vmem:[%s5091_s17 + $0x54] sm:$0xc]  ;;  %v1150_v4 = vrot.slane %v3512_v62, 7 }
 0x105   : > { %v3539_v45 = vcombine.low %v1141_v30, %v1144_v38  ;;  %v1289_v55 = vsel %vm5100_vm7, %v3573_v48, %v1288_v49  ;;  %v1290_v56 = vrot.slane %v1288_v49, 4  ;;  %v3593_v5 = vld [vmem:[%s5091_s17 + $0x58] sm:$0xf]  ;;  %v3594_v6 = vld [vmem:[%s5091_s17 + $0x5c] sm:$0x3]  ;;  %v3614_v8 = vrot.slane %v3592_v1, 10 }
 0x106   : > { %2399 = vmatmul.mubr.bf16.gmra.mrb[24].mxu0 %v3343_v35  ;;  %v3468_v35 = vld [vmem:[%s5091_s17 + $0x34] sm:$0xf]  ;;  %v1148_v10 = vsel %vm5122_vm8, %v3532_v63, %v1147_v0  ;;  %v1149_v11 = vrot.slane %v1147_v0, 4  ;;  %v3470_v13 = vld [vmem:[%s5091_s17 + $0x3c] sm:$0xc]  ;;  %v1442_v15 = vrot.slane %v3594_v6, 6 }
 0x107   : > { %2496 = vmatmul.mubr.bf16.gmra.mrb[24].mxu1 %v3423_v40  ;;  %2406 = vmatprep.mubr.bf16.mxu0 %v3384_v2  ;;  %v1433_v40 = vsel %vm5079_vm2, %v3613_v29, %v1432_v32  ;;  %v996_v42 = vrot.slane %v3468_v35, 6  ;;  %v1292_v3 = vsel %vm5100_vm7, %v1290_v56, %v1291_v53  ;;  %v3471_v14 = vld [vmem:[%s5091_s17 + $0x40] sm:$0xf]  ;;  %v3492_v17 = vrot.slane %v3470_v13, 10  ;;  %v3552_v23 = vld [vmem:[%s5091_s17 + $0x54] sm:$0xe] }
 0x108   : > { %2503 = vmatprep.mubr.bf16.mxu1 %v3466_v12  ;;  %v3621_v54 = vcombine.low %v1433_v40, %v1436_v50  ;;  %v3581_v9 = vcombine.low %v1289_v55, %v1292_v3  ;;  %v1439_v12 = vrot.slane %v3593_v5, 6  ;;  %v1003_v18 = vrot.slane %v3471_v14, 6  ;;  %v3553_v24 = vld [vmem:[%s5091_s17 + $0x58] sm:$0xf]  ;;  %v5416_v26 = vld [vmem:[%s5036_s24 + $0x210] sm:$0xff]   ;;  %v5448_v1 = vld [vmem:[%s5036_s24 + $0x220] sm:$0xff]  }
 0x109   : > { %v997_v51 = vsel %vm5079_vm2, %v3491_v37, %v996_v42  ;;  %v998_v52 = vrot.slane %v996_v42, 4  ;;  %v1151_v19 = vsel %vm5122_vm8, %v1149_v11, %v1150_v4  ;;  %v3554_v30 = vld [vmem:[%s5091_s17 + $0x5c] sm:$0x1]  ;;  %v3574_v31 = vrot.slane %v3552_v23, 9  ;;  %v3513_v35 = vld [vmem:[%s5091_s17 + $0x48] sm:$0x8] }
 0x10a   : > { %v1441_v21 = vrot.slane %v1439_v12, 4  ;;  %v3540_v27 = vcombine.low %v1148_v10, %v1151_v19  ;;  %v1004_v28 = vsel %vm5079_vm2, %v3492_v17, %v1003_v18  ;;  %v1005_v29 = vrot.slane %v1003_v18, 4  ;;  %v3514_v37 = vld [vmem:[%s5091_s17 + $0x4c] sm:$0xf]  ;;  %v3515_v38 = vld [vmem:[%s5091_s17 + $0x50] sm:$0x7] }
 0x10b   : > { %v1000_v61 = vsel %vm5079_vm2, %v998_v52, %v999_v46  ;;  %v1295_v33 = vrot.slane %v3553_v24, 5  ;;  %v1298_v34 = vrot.slane %v3554_v30, 5  ;;  %v3533_v40 = vrot.slane %v3513_v35, 11  ;;  %v3596_v46 = vld [vmem:[%s5091_s17 + $0x64] sm:$0xf] }
 0x10c   : > { %v3499_v2 = vcombine.low %v997_v51, %v1000_v61  ;;  %v1443_v32 = vsel %vm5079_vm2, %v1441_v21, %v1442_v15  ;;  %v1154_v44 = vrot.slane %v3514_v37, 7  ;;  %v1157_v47 = vrot.slane %v3515_v38, 7  ;;  %v3597_v48 = vld [vmem:[%s5091_s17 + $0x68] sm:$0x3]  ;;  %v4377_v51 = vld [vmem:[%s5036_s24 + $0x218] sm:$0xff]  }
 0x10d   : > { %v1296_v42 = vsel %vm5100_vm7, %v3574_v31, %v1295_v33  ;;  %v1297_v43 = vrot.slane %v1295_v33, 4  ;;  %v1446_v50 = vrot.slane %v3596_v46, 6  ;;  %v1449_v55 = vrot.slane %v3597_v48, 6  ;;  %v3473_v56 = vld [vmem:[%s5091_s17 + $0x48] sm:$0xc] }
 0x10e   : > { %2407 = vmatmul.mubr.bf16.gmra.mrb[28].mxu0 %v3344_v16  ;;  %v3472_v16 = vld [vmem:[%s5091_s17 + $0x44] sm:$0x3]  ;;  %v1155_v53 = vsel %vm5122_vm8, %v3533_v40, %v1154_v44  ;;  %v3474_v57 = vld [vmem:[%s5091_s17 + $0x4c] sm:$0xf]  ;;  %v3475_v62 = vld [vmem:[%s5091_s17 + $0x50] sm:$0x3] }
 0x10f   : > { %2504 = vmatmul.mubr.bf16.gmra.mrb[28].mxu1 %v3424_v20  ;;  %2544 = vmatprep.mubr.bf16.mxu0 %v3539_v45  ;;  %v1440_v20 = vsel %vm5079_vm2, %v3614_v8, %v1439_v12  ;;  %v1006_v22 = vrot.slane %v3472_v16, 6  ;;  %v3595_v45 = vld [vmem:[%s5091_s17 + $0x60] sm:$0xc]  ;;  %v1299_v52 = vsel %vm5100_vm7, %v1297_v43, %v1298_v34  ;;  %v1448_v61 = vrot.slane %v1446_v50, 4  ;;  %v3556_v5 = vld [vmem:[%s5091_s17 + $0x64] sm:$0xf] }
 0x110   : > { %2641 = vmatprep.mubr.bf16.mxu1 %v3621_v54  ;;  %v3615_v49 = vrot.slane %v3595_v45, 10  ;;  %v1156_v54 = vrot.slane %v1154_v44, 4  ;;  %v3582_v58 = vcombine.low %v1296_v42, %v1299_v52  ;;  %v3493_v63 = vrot.slane %v3473_v56, 10  ;;  %v3555_v0 = vld [vmem:[%s5091_s17 + $0x60] sm:$0xe]  ;;  %v4379_v34 = vld [vmem:[%s5036_s24 + $0x228] sm:$0xff]  }
 0x111   : > { %v1007_v36 = vsel %vm5079_vm2, %v1005_v29, %v1006_v22  ;;  %v1010_v3 = vrot.slane %v3474_v57, 6  ;;  %v1013_v4 = vrot.slane %v3475_v62, 6  ;;  %v3557_v6 = vld [vmem:[%s5091_s17 + $0x68] sm:$0x1]  ;;  %v3575_v10 = vrot.slane %v3555_v0, 9 }
 0x112   : > { %v3500_v41 = vcombine.low %v1004_v28, %v1007_v36  ;;  %v1302_v11 = vrot.slane %v3556_v5, 5  ;;  %v1305_v15 = vrot.slane %v3557_v6, 5  ;;  %v3516_v16 = vld [vmem:[%s5091_s17 + $0x54] sm:$0x8]  ;;  %v3517_v17 = vld [vmem:[%s5091_s17 + $0x58] sm:$0xf] }
 0x113   : > { %v1011_v13 = vsel %vm5079_vm2, %v3493_v63, %v1010_v3  ;;  %v1012_v14 = vrot.slane %v1010_v3, 4  ;;  %v3534_v21 = vrot.slane %v3516_v16, 11  ;;  %v1161_v22 = vrot.slane %v3517_v17, 7  ;;  %v3476_v33 = vld [vmem:[%s5091_s17 + $0x54] sm:$0xc] }
 0x114   : > { %v1303_v18 = vsel %vm5100_vm7, %v3575_v10, %v1302_v11  ;;  %v1304_v19 = vrot.slane %v1302_v11, 4  ;;  %v3477_v38 = vld [vmem:[%s5091_s17 + $0x58] sm:$0xf]  ;;  %v3494_v42 = vrot.slane %v3476_v33, 10  ;;  %v3558_v44 = vld [vmem:[%s5091_s17 + $0x6c] sm:$0xe] }
 0x115   : > { %v1014_v23 = vsel %vm5079_vm2, %v1012_v14, %v1013_v4  ;;  %v1162_v30 = vsel %vm5122_vm8, %v3534_v21, %v1161_v22  ;;  %v1163_v31 = vrot.slane %v1161_v22, 4  ;;  %v1017_v43 = vrot.slane %v3477_v38, 6  ;;  %v3520_v0 = vld [vmem:[%s5091_s17 + $0x64] sm:$0xf]  ;;  %v3601_v6 = vld [vmem:[%s5091_s17 + $0x78] sm:$0xc] }
 0x116   : > { %2545 = vmatmul.mubr.bf16.vlgmr.msra.gmra.mrb[32].mxu0 %v3499_v2  ;;  %v1158_v2 = vsel %vm5122_vm8, %v1156_v54, %v1157_v47  ;;  %v3501_v28 = vcombine.low %v1011_v13, %v1014_v23  ;;  %v1306_v29 = vsel %vm5100_vm7, %v1304_v19, %v1305_v15  ;;  %v1168_v5 = vrot.slane %v3520_v0, 7  ;;  %v3603_v10 = vld [vmem:[%s5091_s17 + $0x80] sm:$0x3]  ;;  %v3479_v17 = vld [vmem:[%s5091_s17 + $0x60] sm:$0xc] }
 0x117   : > { %2642 = vmatmul.mubr.bf16.vlgmr.msra.gmra.mrb[32].mxu1 %v3581_v9  ;;  %4051 = vmatpush3.bf16.msra.mxu0 %v5354_v7  ;;  %v3541_v8 = vcombine.low %v1155_v53, %v1158_v2  ;;  %v1450_v9 = vsel %vm5079_vm2, %v1448_v61, %v1449_v55  ;;  %v3583_v35 = vcombine.low %v1303_v18, %v1306_v29  ;;  %v1019_v52 = vrot.slane %v1017_v43, 4  ;;  %v4380_v55 = vld [vmem:[%s5036_s24 + $0x230] sm:$0xff]   ;;  %v3521_v2 = vld [vmem:[%s5091_s17 + $0x68] sm:$0x7]  ;;  %v3480_v18 = vld [vmem:[%s5091_s17 + $0x64] sm:$0xf] }
 0x118   : > { %4122 = vmatpush3.bf16.msra.mxu1 %v5354_v7  ;;  %4052 = vmatprep.subr.bf16.mxu0 %v4375_v59  ;;  %v3622_v7 = vcombine.low %v1440_v20, %v1443_v32  ;;  %v3518_v20 = vld [vmem:[%s5091_s17 + $0x5c] sm:$0x7]  ;;  %v3600_v32 = vld [vmem:[%s5091_s17 + $0x74] sm:$0x3]  ;;  %v3576_v53 = vrot.slane %v3558_v44, 9  ;;  %v3617_v11 = vrot.slane %v3601_v6, 10 }
 0x119   : > { %4115 = vmatprep.subr.bf16.mxu1 %v4375_v59  ;;  %2552 = vmatprep.mubr.bf16.mxu0 %v3540_v27  ;;  %v1164_v24 = vrot.slane %v3518_v20, 7  ;;  %v3599_v27 = vld [vmem:[%s5091_s17 + $0x70] sm:$0xf]  ;;  %v1456_v37 = vrot.slane %v3600_v32, 6  ;;  %v1170_v15 = vrot.slane %v1168_v5, 4  ;;  %v1463_v19 = vrot.slane %v3603_v10, 6 }
 0x11a   : > { %2649 = vmatprep.mubr.bf16.mxu1 %v3622_v7  ;;  %v1453_v36 = vrot.slane %v3599_v27, 6  ;;  %v3481_v20 = vld [vmem:[%s5091_s17 + $0x68] sm:$0x3]  ;;  %v3495_v21 = vrot.slane %v3479_v17, 10  ;;  %v1024_v22 = vrot.slane %v3480_v18, 6 }
 0x11b   : > { %4053 = vmatpush3.bf16.msra.mxu0 %v4375_v59  ;;  %v1165_v40 = vsel %vm5122_vm8, %v1163_v31, %v1164_v24  ;;  %v1027_v27 = vrot.slane %v3481_v20, 6  ;;  %v3562_v29 = vld [vmem:[%s5091_s17 + $0x7c] sm:$0xf]  ;;  %v3563_v33 = vld [vmem:[%s5091_s17 + $0x80] sm:$0x1] }
 0x11c   : > { %4123 = vmatpush3.bf16.msra.mxu1 %v4375_v59  ;;  %4054 = vmatprep.subr.bf16.mxu0 %v5416_v26  ;;  %v1447_v59 = vsel %vm5079_vm2, %v3615_v49, %v1446_v50  ;;  %v3542_v45 = vcombine.low %v1162_v30, %v1165_v40  ;;  %v1455_v47 = vrot.slane %v1453_v36, 4  ;;  %v3559_v49 = vld [vmem:[%s5091_s17 + $0x70] sm:$0xf]  ;;  %v3560_v50 = vld [vmem:[%s5091_s17 + $0x74] sm:$0x1]  ;;  %v1025_v31 = vsel %vm5079_vm2, %v3495_v21, %v1024_v22 }
 0x11d   : > { %4116 = vmatprep.subr.bf16.mxu1 %v5416_v26  ;;  %v3623_v12 = vcombine.low %v1447_v59, %v1450_v9  ;;  %v1309_v54 = vrot.slane %v3559_v49, 5  ;;  %v1312_v57 = vrot.slane %v3560_v50, 5  ;;  %v3602_v9 = vld [vmem:[%s5091_s17 + $0x7c] sm:$0xf]  ;;  %v1026_v32 = vrot.slane %v1024_v22, 4 }
 0x11e   : > { %2553 = vmatmul.mubr.bf16.gmra.mrb[36].mxu0 %v3500_v41  ;;  %v3478_v41 = vld [vmem:[%s5091_s17 + $0x5c] sm:$0x3]  ;;  %v1457_v56 = vsel %vm5079_vm2, %v1455_v47, %v1456_v37  ;;  %v1460_v16 = vrot.slane %v3602_v9, 6  ;;  %v3522_v37 = vld [vmem:[%s5091_s17 + $0x6c] sm:$0x8] }
 0x11f   : > { %4055 = vmatpush3.bf16.msra.mxu0 %v5416_v26  ;;  %2650 = vmatmul.mubr.bf16.gmra.mrb[36].mxu1 %v3582_v58  ;;  %v1020_v48 = vrot.slane %v3478_v41, 6  ;;  %v3519_v58 = vld [vmem:[%s5091_s17 + $0x60] sm:$0x8]  ;;  %v1310_v62 = vsel %vm5100_vm7, %v3576_v53, %v1309_v54  ;;  %v1311_v63 = vrot.slane %v1309_v54, 4  ;;  %v1028_v40 = vsel %vm5079_vm2, %v1026_v32, %v1027_v27  ;;  %v3523_v41 = vld [vmem:[%s5091_s17 + $0x70] sm:$0xf] }
 0x120   : > { %4056 = vmatprep.subr.bf16.mxu0 %v4377_v51  ;;  %4124 = vmatpush3.bf16.msra.mxu1 %v5416_v26  ;;  %v3598_v26 = vld [vmem:[%s5091_s17 + $0x6c] sm:$0xc]  ;;  %v3535_v4 = vrot.slane %v3519_v58, 11  ;;  %v1461_v24 = vsel %vm5079_vm2, %v3617_v11, %v1460_v16  ;;  %v3503_v44 = vcombine.low %v1025_v31, %v1028_v40  ;;  %v1175_v47 = vrot.slane %v3523_v41, 7  ;;  %v3605_v49 = vld [vmem:[%s5091_s17 + $0x88] sm:$0xf] }
 0x121   : > { %2560 = vmatprep.mubr.bf16.mxu0 %v3541_v8  ;;  %4117 = vmatprep.subr.bf16.mxu1 %v4377_v51  ;;  %v3616_v7 = vrot.slane %v3598_v26, 10  ;;  %v1021_v61 = vsel %vm5079_vm2, %v1019_v52, %v1020_v48  ;;  %v1313_v8 = vsel %vm5100_vm7, %v1311_v63, %v1312_v57  ;;  %v1462_v26 = vrot.slane %v1460_v16, 4  ;;  %v3604_v48 = vld [vmem:[%s5091_s17 + $0x84] sm:$0xc]  ;;  %v3482_v58 = vld [vmem:[%s5091_s17 + $0x6c] sm:$0xc] }
 0x122   : > { %2657 = vmatprep.mubr.bf16.mxu1 %v3623_v12  ;;  %v4381_v12 = vld [vmem:[%s5036_s24 + $0x238] sm:$0xff]   ;;  %v3584_v13 = vcombine.low %v1310_v62, %v1313_v8  ;;  %v1169_v14 = vsel %vm5122_vm8, %v3535_v4, %v1168_v5  ;;  %v3618_v52 = vrot.slane %v3604_v48, 10  ;;  %v1467_v53 = vrot.slane %v3605_v49, 6  ;;  %v3484_v0 = vld [vmem:[%s5091_s17 + $0x74] sm:$0x3] }
 0x123   : > { %4057 = vmatpush3.bf16.msra.mxu0 %v4377_v51  ;;  %v1454_v46 = vsel %vm5079_vm2, %v3616_v7, %v1453_v36  ;;  %v1316_v7 = vrot.slane %v3562_v29, 5  ;;  %v1319_v36 = vrot.slane %v3563_v33, 5  ;;  %v3565_v6 = vld [vmem:[%s5091_s17 + $0x88] sm:$0xf]  ;;  %v3566_v8 = vld [vmem:[%s5091_s17 + $0x8c] sm:$0x1] }
 0x124   : > { %4058 = vmatprep.subr.bf16.mxu0 %v5448_v1  ;;  %4125 = vmatpush3.bf16.msra.mxu1 %v4377_v51  ;;  %v1018_v51 = vsel %vm5079_vm2, %v3494_v42, %v1017_v43  ;;  %v3624_v59 = vcombine.low %v1454_v46, %v1457_v56  ;;  %v3524_v42 = vld [vmem:[%s5091_s17 + $0x74] sm:$0x7]  ;;  %v3536_v43 = vrot.slane %v3522_v37, 11  ;;  %v1177_v56 = vrot.slane %v1175_v47, 4  ;;  %v3525_v17 = vld [vmem:[%s5091_s17 + $0x78] sm:$0x8] }
 0x125   : > { %4118 = vmatprep.subr.bf16.mxu1 %v5448_v1  ;;  %v3502_v3 = vcombine.low %v1018_v51, %v1021_v61  ;;  %v1318_v46 = vrot.slane %v1316_v7, 4  ;;  %v1178_v50 = vrot.slane %v3524_v42, 7  ;;  %v3606_v51 = vld [vmem:[%s5091_s17 + $0x8c] sm:$0x3]  ;;  %v1468_v62 = vsel %vm5079_vm2, %v3618_v52, %v1467_v53  ;;  %v3526_v18 = vld [vmem:[%s5091_s17 + $0x7c] sm:$0xf] }
 0x126   : > { %2561 = vmatmul.mubr.bf16.gmra.mrb[40].mxu0 %v3501_v28  ;;  %v3561_v28 = vld [vmem:[%s5091_s17 + $0x78] sm:$0xe]  ;;  %v1470_v57 = vrot.slane %v3606_v51, 6  ;;  %v1469_v63 = vrot.slane %v1467_v53, 4  ;;  %v1326_v16 = vrot.slane %v3566_v8, 5  ;;  %v3537_v22 = vrot.slane %v3525_v17, 11 }
 0x127   : > { %4059 = vmatpush3.bf16.msra.mxu0 %v5448_v1  ;;  %2658 = vmatmul.mubr.bf16.gmra.mrb[40].mxu1 %v3583_v35  ;;  %v1464_v35 = vsel %vm5079_vm2, %v1462_v26, %v1463_v19  ;;  %v1320_v54 = vsel %vm5100_vm7, %v1318_v46, %v1319_v36  ;;  %v1179_v4 = vsel %vm5122_vm8, %v1177_v56, %v1178_v50  ;;  %v3527_v21 = vld [vmem:[%s5091_s17 + $0x80] sm:$0x7]  ;;  %v3607_v27 = vld [vmem:[%s5091_s17 + $0x90] sm:$0xc]  ;;  %v3609_v33 = vld [vmem:[%s5091_s17 + $0x98] sm:$0x3] }
 0x128   : > { %4060 = vmatprep.subr.bf16.mxu0 %v4379_v34  ;;  %2568 = vmatprep.mubr.bf16.mxu0 %v3542_v45  ;;  %v3625_v38 = vcombine.low %v1461_v24, %v1464_v35  ;;  %v1471_v10 = vsel %vm5079_vm2, %v1469_v63, %v1470_v57  ;;  %v1185_v26 = vrot.slane %v3527_v21, 7  ;;  %v1477_v37 = vrot.slane %v3609_v33, 6  ;;  %v3487_v41 = vld [vmem:[%s5091_s17 + $0x80] sm:$0x3]  ;;  %v3568_v49 = vld [vmem:[%s5091_s17 + $0x94] sm:$0xf] }
 0x129   : > { %4126 = vmatpush3.bf16.msra.mxu1 %v5448_v1  ;;  %v1171_v1 = vrot.slane %v3521_v2, 7  ;;  %2665 = vmatprep.mubr.bf16.mxu1 %v3624_v59  ;;  %v3483_v59 = vld [vmem:[%s5091_s17 + $0x70] sm:$0xf]  ;;  %v3496_v2 = vrot.slane %v3482_v58, 10  ;;  %v1041_v48 = vrot.slane %v3487_v41, 6 }
 0x12a   : > { %4119 = vmatprep.subr.bf16.mxu1 %v4379_v34  ;;  %v1031_v5 = vrot.slane %v3483_v59, 6  ;;  %v3569_v50 = vld [vmem:[%s5091_s17 + $0x98] sm:$0x1]  ;;  %v3528_v57 = vld [vmem:[%s5091_s17 + $0x84] sm:$0x8] }
 0x12b   : > { %4061 = vmatpush3.bf16.msra.mxu0 %v4379_v34  ;;  %v1172_v23 = vsel %vm5122_vm8, %v1170_v15, %v1171_v1  ;;  %v1034_v1 = vrot.slane %v3484_v0, 6  ;;  %v1333_v56 = vrot.slane %v3569_v50, 5  ;;  %v3529_v63 = vld [vmem:[%s5091_s17 + $0x88] sm:$0xf]  ;;  %v3530_v0 = vld [vmem:[%s5091_s17 + $0x8c] sm:$0x7] }
 0x12c   : > { %4062 = vmatprep.subr.bf16.mxu0 %v4380_v55  ;;  %v3543_v30 = vcombine.low %v1169_v14, %v1172_v23  ;;  %v1032_v14 = vsel %vm5079_vm2, %v3496_v2, %v1031_v5  ;;  %v1033_v15 = vrot.slane %v1031_v5, 4  ;;  %v1182_v23 = vrot.slane %v3526_v18, 7  ;;  %v3611_v8 = vld [vmem:[%s5091_s17 + $0xa0] sm:$0xf]  ;;  %v3490_v18 = vld [vmem:[%s5091_s17 + $0x8c] sm:$0x3] }
 0x12d   : > { %4127 = vmatpush3.bf16.msra.mxu1 %v4379_v34  ;;  %v3577_v34 = vrot.slane %v3561_v28, 9  ;;  %v3608_v28 = vld [vmem:[%s5091_s17 + $0x94] sm:$0xf]  ;;  %v1192_v5 = vrot.slane %v3530_v0, 7 }
 0x12e   : > { %2569 = vmatmul.mubr.bf16.gmra.mrb[44].mxu0 %v3502_v3  ;;  %4120 = vmatprep.subr.bf16.mxu1 %v4380_v55  ;;  %v3564_v3 = vld [vmem:[%s5091_s17 + $0x84] sm:$0xe]  ;;  %v1035_v24 = vsel %vm5079_vm2, %v1033_v15, %v1034_v1  ;;  %v1183_v31 = vsel %vm5122_vm8, %v3537_v22, %v1182_v23  ;;  %v1184_v32 = vrot.slane %v1182_v23, 4  ;;  %v1474_v36 = vrot.slane %v3608_v28, 6  ;;  %v3610_v1 = vld [vmem:[%s5091_s17 + $0x9c] sm:$0xc] }
 0x12f   : > { %4063 = vmatpush3.bf16.msra.mxu0 %v4380_v55  ;;  %2666 = vmatmul.mubr.bf16.gmra.mrb[44].mxu1 %v3584_v13  ;;  %v1317_v45 = vsel %vm5100_vm7, %v3577_v34, %v1316_v7  ;;  %v3578_v11 = vrot.slane %v3564_v3, 9  ;;  %v3626_v13 = vcombine.low %v1468_v62, %v1471_v10  ;;  %v3504_v29 = vcombine.low %v1032_v14, %v1035_v24  ;;  %v3485_v34 = vld [vmem:[%s5091_s17 + $0x78] sm:$0xc]  ;;  %v3488_v15 = vld [vmem:[%s5091_s17 + $0x84] sm:$0xc] }
 0x130   : > { %4064 = vmatprep.subr.bf16.mxu0 %v4381_v12  ;;  %2576 = vmatprep.mubr.bf16.mxu0 %v3543_v30  ;;  %v3585_v61 = vcombine.low %v1317_v45, %v1320_v54  ;;  %v3619_v7 = vrot.slane %v3607_v27, 10  ;;  %v1186_v40 = vsel %vm5122_vm8, %v1184_v32, %v1185_v26  ;;  %v3497_v42 = vrot.slane %v3485_v34, 10  ;;  %v3570_v26 = vld [vmem:[%s5091_s17 + $0x9c] sm:$0xe]  ;;  %v3571_v27 = vld [vmem:[%s5091_s17 + $0xa0] sm:$0xf] }
 0x131   : > { %4128 = vmatpush3.bf16.msra.mxu1 %v4380_v55  ;;  %2673 = vmatprep.mubr.bf16.mxu1 %v3625_v38  ;;  %v1176_v55 = vsel %vm5122_vm8, %v3536_v43, %v1175_v47  ;;  %v3486_v38 = vld [vmem:[%s5091_s17 + $0x7c] sm:$0xf]  ;;  %v3545_v45 = vcombine.low %v1183_v31, %v1186_v40  ;;  %v1476_v47 = vrot.slane %v1474_v36, 4  ;;  %v1330_v54 = vrot.slane %v3568_v49, 5  ;;  %v3572_v31 = vld [vmem:[%s5091_s17 + $0xa4] sm:$0x1] }
 0x132   : > { %4121 = vmatprep.subr.bf16.mxu1 %v4381_v12  ;;  %v3544_v9 = vcombine.low %v1176_v55, %v1179_v4  ;;  %v1038_v43 = vrot.slane %v3486_v38, 6  ;;  %v1475_v46 = vsel %vm5079_vm2, %v3619_v7, %v1474_v36  ;;  %v3538_v3 = vrot.slane %v3528_v57, 11  ;;  %v3629_v7 = vld [vmem:[%s5091_s17 + $0x48] sm:$0x8]  ;;  %v3630_v38 = vld [vmem:[%s5091_s17 + $0x4c] sm:$0xf] }
 0x133   : > { %4065 = vmatpush3.bf16.msra.mxu0 %v4381_v12  ;;  %v1478_v55 = vsel %vm5079_vm2, %v1476_v47, %v1477_v37  ;;  %v1332_v62 = vrot.slane %v1330_v54, 4  ;;  %v1189_v4 = vrot.slane %v3529_v63, 7  ;;  %v3620_v10 = vrot.slane %v3610_v1, 10  ;;  %v3631_v40 = vld [vmem:[%s5091_s17 + $0x50] sm:$0x7] }
 0x134   : > { %v1039_v51 = vsel %vm5079_vm2, %v3497_v42, %v1038_v43  ;;  %v1040_v52 = vrot.slane %v1038_v43, 4  ;;  %v3627_v58 = vcombine.low %v1475_v46, %v1478_v55  ;;  %v1481_v14 = vrot.slane %v3611_v8, 6  ;;  %v3641_v46 = vld [vmem:[%s5091_s17 + $0x78] sm:$0x8]  ;;  %v3642_v47 = vld [vmem:[%s5091_s17 + $0x7c] sm:$0xf] }
 0x135   : > { %4129 = vmatpush3.bf16.msra.mxu1 %v4381_v12  ;;  %v1323_v12 = vrot.slane %v3565_v6, 5  ;;  %v1334_v6 = vsel %vm5100_vm7, %v1332_v62, %v1333_v56  ;;  %v1048_v24 = vrot.slane %v3490_v18, 6  ;;  %v3580_v32 = vrot.slane %v3570_v26, 9  ;;  %v3643_v49 = vld [vmem:[%s5091_s17 + $0x80] sm:$0x7] }
 0x136   : > { %2577 = vmatmul.mubr.bf16.gmra.mrb[48].mxu0 %v3503_v44  ;;  %v3567_v44 = vld [vmem:[%s5091_s17 + $0x90] sm:$0xe]  ;;  %v1042_v59 = vsel %vm5079_vm2, %v1040_v52, %v1041_v48  ;;  %v1482_v22 = vsel %vm5079_vm2, %v3620_v10, %v1481_v14  ;;  %v1483_v23 = vrot.slane %v1481_v14, 4  ;;  %v1337_v34 = vrot.slane %v3571_v27, 5  ;;  %v3632_v55 = vld [vmem:[%s5091_s17 + $0x54] sm:$0x8] }
 0x137   : > { %2674 = vmatmul.mubr.bf16.gmra.mrb[48].mxu1 %v3585_v61  ;;  %2584 = vmatprep.mubr.bf16.mxu0 %v3544_v9  ;;  %v1324_v19 = vsel %vm5100_vm7, %v3578_v11, %v1323_v12  ;;  %v1325_v20 = vrot.slane %v1323_v12, 4  ;;  %v3579_v53 = vrot.slane %v3567_v44, 9  ;;  %v3505_v2 = vcombine.low %v1039_v51, %v1042_v59  ;;  %v3612_v9 = vld [vmem:[%s5091_s17 + $0xa4] sm:$0x3]  ;;  %v3633_v56 = vld [vmem:[%s5091_s17 + $0x58] sm:$0xf] }
 0x138   : > { %2681 = vmatprep.mubr.bf16.mxu1 %v3626_v13  ;;  %v1190_v12 = vsel %vm5122_vm8, %v3538_v3, %v1189_v4  ;;  %v1191_v13 = vrot.slane %v1189_v4, 4  ;;  %v1484_v17 = vrot.slane %v3612_v9, 6  ;;  %v3653_v41 = vrot.slane %v3629_v7, 11  ;;  %v3644_v62 = vld [vmem:[%s5091_s17 + $0x84] sm:$0x8] }
 0x139   : > { %v1327_v30 = vsel %vm5100_vm7, %v1325_v20, %v1326_v16  ;;  %v1331_v61 = vsel %vm5100_vm7, %v3579_v53, %v1330_v54  ;;  %v3489_v16 = vld [vmem:[%s5091_s17 + $0x88] sm:$0xf]  ;;  %v1338_v43 = vsel %vm5100_vm7, %v3580_v32, %v1337_v34  ;;  %v1339_v44 = vrot.slane %v1337_v34, 4  ;;  %v3646_v4 = vld [vmem:[%s5091_s17 + $0x8c] sm:$0x7] }
 0x13a   : > { %v3586_v35 = vcombine.low %v1324_v19, %v1327_v30  ;;  %v3587_v11 = vcombine.low %v1331_v61, %v1334_v6  ;;  %v3498_v19 = vrot.slane %v3488_v15, 10  ;;  %v1045_v20 = vrot.slane %v3489_v16, 6  ;;  %v3634_v61 = vld [vmem:[%s5091_s17 + $0x5c] sm:$0x7]  ;;  %v3645_v3 = vld [vmem:[%s5091_s17 + $0x88] sm:$0xf] }
 0x13b   : > { %v1193_v21 = vsel %vm5122_vm8, %v1191_v13, %v1192_v5  ;;  %v1485_v33 = vsel %vm5079_vm2, %v1483_v23, %v1484_v17  ;;  %v1579_v48 = vrot.slane %v3631_v40, 7  ;;  %v3657_v25 = vrot.slane %v3641_v46, 11  ;;  %v3635_v9 = vld [vmem:[%s5091_s17 + $0x60] sm:$0x8]  ;;  %v3636_v10 = vld [vmem:[%s5091_s17 + $0x64] sm:$0xf] }
 0x13c   : > { %v3546_v28 = vcombine.low %v1190_v12, %v1193_v21  ;;  %v1047_v30 = vrot.slane %v1045_v20, 4  ;;  %v3628_v36 = vcombine.low %v1482_v22, %v1485_v33  ;;  %v1604_v50 = vrot.slane %v3642_v47, 7  ;;  %v3637_v15 = vld [vmem:[%s5091_s17 + $0x68] sm:$0x7]  ;;  %v3647_v16 = vld [vmem:[%s5091_s17 + $0x90] sm:$0x8] }
 0x13d   : > { %v1607_v54 = vrot.slane %v3643_v49, 7  ;;  %v3654_v39 = vrot.slane %v3632_v55, 11  ;;  %v1583_v0 = vrot.slane %v3633_v56, 7  ;;  %v3658_v6 = vrot.slane %v3644_v62, 11  ;;  %v3648_v21 = vld [vmem:[%s5091_s17 + $0x94] sm:$0xf] }
 0x13e   : > { %2585 = vmatmul.mubr.bf16.gmra.mrb[52].mxu0 %v3504_v29  ;;  %v1046_v29 = vsel %vm5079_vm2, %v3498_v19, %v1045_v20  ;;  %v1049_v37 = vsel %vm5079_vm2, %v1047_v30, %v1048_v24  ;;  %v1606_v59 = vrot.slane %v1604_v50, 4  ;;  %v1611_v8 = vrot.slane %v3645_v3, 7  ;;  %v3649_v24 = vld [vmem:[%s5091_s17 + $0x98] sm:$0x7]  ;;  %v3638_v32 = vld [vmem:[%s5091_s17 + $0x6c] sm:$0x8] }
 0x13f   : > { %2682 = vmatmul.mubr.bf16.gmra.mrb[52].mxu1 %v3586_v35  ;;  %2592 = vmatprep.mubr.bf16.mxu0 %v3545_v45  ;;  %v1340_v35 = vrot.slane %v3572_v31, 5  ;;  %v3506_v42 = vcombine.low %v1046_v29, %v1049_v37  ;;  %v1576_v45 = vrot.slane %v3630_v38, 7  ;;  %v1584_v12 = vsel %vm5122_vm8, %v3654_v39, %v1583_v0  ;;  %v3639_v33 = vld [vmem:[%s5091_s17 + $0x70] sm:$0xf]  ;;  %v3640_v37 = vld [vmem:[%s5091_s17 + $0x74] sm:$0x7] }
 0x140   : > { %2689 = vmatprep.mubr.bf16.mxu1 %v3627_v58  ;;  %v1605_v58 = vsel %vm5122_vm8, %v3657_v25, %v1604_v50  ;;  %v1608_v1 = vsel %vm5122_vm8, %v1606_v59, %v1607_v54  ;;  %v1585_v13 = vrot.slane %v1583_v0, 4  ;;  %v1614_v14 = vrot.slane %v3646_v4, 7  ;;  %v3650_v38 = vld [vmem:[%s5091_s17 + $0x9c] sm:$0x8]  ;;  %v3652_v47 = vld [vmem:[%s5091_s17 + $0xa4] sm:$0x7] }
 0x141   : > { %v1341_v51 = vsel %vm5100_vm7, %v1339_v44, %v1340_v35  ;;  %v1577_v52 = vsel %vm5122_vm8, %v3653_v41, %v1576_v45  ;;  %v1578_v53 = vrot.slane %v1576_v45, 4  ;;  %v1612_v17 = vsel %vm5122_vm8, %v3658_v6, %v1611_v8  ;;  %v3651_v44 = vld [vmem:[%s5091_s17 + $0xa0] sm:$0xf] }
 0x142   : > { %v3588_v57 = vcombine.low %v1338_v43, %v1341_v51  ;;  %v1613_v18 = vrot.slane %v1611_v8, 4  ;;  %v3655_v19 = vrot.slane %v3635_v9, 11  ;;  %v1590_v20 = vrot.slane %v3636_v10, 7 }
 0x143   : > { %v1580_v63 = vsel %vm5122_vm8, %v1578_v53, %v1579_v48  ;;  %v1593_v23 = vrot.slane %v3637_v15, 7  ;;  %v3659_v26 = vrot.slane %v3647_v16, 11  ;;  %v1618_v27 = vrot.slane %v3648_v21, 7 }
 0x144   : > { %v3661_v5 = vcombine.low %v1577_v52, %v1580_v63  ;;  %v1615_v29 = vsel %vm5122_vm8, %v1613_v18, %v1614_v14  ;;  %v1591_v30 = vsel %vm5122_vm8, %v3655_v19, %v1590_v20  ;;  %v1592_v31 = vrot.slane %v1590_v20, 4 }
 0x145   : > { %v3666_v34 = vcombine.low %v1612_v17, %v1615_v29  ;;  %v1619_v35 = vsel %vm5122_vm8, %v3659_v26, %v1618_v27  ;;  %v1620_v7 = vrot.slane %v1618_v27, 4  ;;  %v3656_v41 = vrot.slane %v3638_v32, 11 }
 0x146   : > { %2593 = vmatmul.mubr.bf16.gmra.mrb[56].mxu0 %v3505_v2  ;;  %v1586_v2 = vrot.slane %v3634_v61, 7  ;;  %v1594_v40 = vsel %vm5122_vm8, %v1592_v31, %v1593_v23  ;;  %v1600_v43 = vrot.slane %v3640_v37, 7  ;;  %v3660_v48 = vrot.slane %v3650_v38, 11 }
 0x147   : > { %2690 = vmatmul.mubr.bf16.gmra.mrb[56].mxu1 %v3587_v11  ;;  %2600 = vmatprep.mubr.bf16.mxu0 %v3546_v28  ;;  %v3665_v11 = vcombine.low %v1605_v58, %v1608_v1  ;;  %v3663_v45 = vcombine.low %v1591_v30, %v1594_v40  ;;  %v1625_v49 = vrot.slane %v3651_v44, 7  ;;  %v1628_v52 = vrot.slane %v3652_v47, 7 }
 0x148   : > { %2697 = vmatprep.mubr.bf16.mxu1 %v3628_v36  ;;  %v1587_v22 = vsel %vm5122_vm8, %v1585_v13, %v1586_v2  ;;  %v1621_v36 = vrot.slane %v3649_v24, 7 }
 0x149   : > { %v3662_v28 = vcombine.low %v1584_v12, %v1587_v22  ;;  %v1626_v53 = vsel %vm5122_vm8, %v3660_v48, %v1625_v49  ;;  %v1627_v54 = vrot.slane %v1625_v49, 4 }
 0x14a   : > { %v1622_v46 = vsel %vm5122_vm8, %v1620_v7, %v1621_v36 }
 0x14b   : > { %v3667_v25 = vcombine.low %v1619_v35, %v1622_v46 }
 0x14e   : > { %2601 = vmatmul.mubr.bf16.gmra.mrb[60].mxu0 %v3506_v42  ;;  %v1597_v42 = vrot.slane %v3639_v33, 7 }
 0x14f   : > { %2698 = vmatmul.mubr.bf16.gmra.mrb[60].mxu1 %v3588_v57  ;;  %4066 = vmatprep.mubr.bf16.mxu0 %v3661_v5  ;;  %v1629_v57 = vsel %vm5122_vm8, %v1627_v54, %v1628_v52 }
 0x150   : > { %4074 = vmatprep.mubr.bf16.mxu1 %v3665_v11  ;;  %v1598_v50 = vsel %vm5122_vm8, %v3656_v41, %v1597_v42  ;;  %v1599_v51 = vrot.slane %v1597_v42, 4  ;;  %v3668_v58 = vcombine.low %v1626_v53, %v1629_v57 }
 0x152   : > { %v1601_v55 = vsel %vm5122_vm8, %v1599_v51, %v1600_v43 }
 0x153   : > { %v3664_v56 = vcombine.low %v1598_v50, %v1601_v55 }
 0x156   : > { %4067 = vmatmul.mubr.bf16.vlgmr.msra.gmra.mrb[64].mxu0 %v3662_v28 }
 0x157   : > { %4075 = vmatmul.mubr.bf16.vlgmr.msra.gmra.mrb[64].mxu1 %v3666_v34  ;;  %4070 = vmatprep.mubr.bf16.mxu0 %v3663_v45 }
 0x158   : > { %4078 = vmatprep.mubr.bf16.mxu1 %v3667_v25 }
 0x15e   : > { %4071 = vmatmul.mubr.bf16.gmra.mrb[68].mxu0 %v3664_v56 }
 0x15f   : > { %4079 = vmatmul.mubr.bf16.gmra.mrb[68].mxu1 %v3668_v58 }
 0x1a9   : > { %v3778_v59 = vpop.f32.mrb[0].mxu0 }
 0x1aa   : > { %v3842_v61 = vpop.f32.mrb[0].mxu1  ;;  %v3779_v39 = vpop.f32.mrb[1].mxu0 }
 0x1ab   : > { %v3780_v62 = vadd.f32 %v3779_v39, %v3778_v59  ;;  %v3843_v63 = vpop.f32.mrb[1].mxu1  ;;  %v3781_v0 = vpop.f32.mrb[2].mxu0 }
 0x1ac   : > { %v3844_v2 = vadd.f32 %v3843_v63, %v3842_v61  ;;  %v3845_v3 = vpop.f32.mrb[2].mxu1  ;;  %v3782_v4 = vpop.f32.mrb[3].mxu0 }
 0x1ad   : > { %v3783_v5 = vadd.f32 %v3782_v4, %v3781_v0  ;;  %v3846_v1 = vpop.f32.mrb[3].mxu1 }
 0x1ae   : > { %v5669_v6 = vadd.f32 %v3844_v2, %v3780_v62  ;;  %v3847_v8 = vadd.f32 %v3846_v1, %v3845_v3 }
 0x1b0   : > { %v5671_v9 = vadd.f32 %v3847_v8, %v3783_v5 }
 0x1b1   : > { %v3784_v60 = vpop.f32.mrb[4].mxu0 }
 0x1b2   : > { %v3848_v10 = vpop.f32.mrb[4].mxu1  ;;  %v3785_v11 = vpop.f32.mrb[5].mxu0 }
 0x1b3   : > { %v3786_v12 = vadd.f32 %v3785_v11, %v3784_v60  ;;  %v3849_v13 = vpop.f32.mrb[5].mxu1  ;;  %v3787_v14 = vpop.f32.mrb[6].mxu0 }
 0x1b4   : > { %v3850_v15 = vadd.f32 %v3849_v13, %v3848_v10  ;;  %v3851_v16 = vpop.f32.mrb[6].mxu1  ;;  %v3788_v17 = vpop.f32.mrb[7].mxu0 }
 0x1b5   : > { %v3789_v18 = vadd.f32 %v3788_v17, %v3787_v14  ;;  %v3852_v19 = vpop.f32.mrb[7].mxu1 }
 0x1b6   : > { %v5673_v20 = vadd.f32 %v3850_v15, %v3786_v12  ;;  %v3853_v21 = vadd.f32 %v3852_v19, %v3851_v16 }
 0x1b8   : > { %v5675_v22 = vadd.f32 %v3853_v21, %v3789_v18 }
 0x1b9   : > { %v3790_v23 = vpop.f32.mrb[8].mxu0 }
 0x1ba   : > { %v3854_v24 = vpop.f32.mrb[8].mxu1  ;;  %v3791_v26 = vpop.f32.mrb[9].mxu0 }
 0x1bb   : > { %v3792_v27 = vadd.f32 %v3791_v26, %v3790_v23  ;;  %v3855_v28 = vpop.f32.mrb[9].mxu1  ;;  %v3793_v29 = vpop.f32.mrb[10].mxu0 }
 0x1bc   : > { %v3856_v30 = vadd.f32 %v3855_v28, %v3854_v24  ;;  %v3857_v31 = vpop.f32.mrb[10].mxu1  ;;  %v3794_v32 = vpop.f32.mrb[11].mxu0 }
 0x1bd   : > { %v3795_v33 = vadd.f32 %v3794_v32, %v3793_v29  ;;  %v3858_v34 = vpop.f32.mrb[11].mxu1 }
 0x1be   : > { %v5677_v35 = vadd.f32 %v3856_v30, %v3792_v27  ;;  %v3859_v7 = vadd.f32 %v3858_v34, %v3857_v31 }
 0x1c0   : > { %v5679_v36 = vadd.f32 %v3859_v7, %v3795_v33 }
 0x1c1   : > { %v3796_v37 = vpop.f32.mrb[12].mxu0 }
 0x1c2   : > { %v3860_v38 = vpop.f32.mrb[12].mxu1  ;;  %v3797_v40 = vpop.f32.mrb[13].mxu0 }
 0x1c3   : > { %v3798_v41 = vadd.f32 %v3797_v40, %v3796_v37  ;;  %v3861_v42 = vpop.f32.mrb[13].mxu1  ;;  %v3799_v43 = vpop.f32.mrb[14].mxu0 }
 0x1c4   : > { %v3862_v44 = vadd.f32 %v3861_v42, %v3860_v38  ;;  %v3863_v45 = vpop.f32.mrb[14].mxu1  ;;  %v3800_v46 = vpop.f32.mrb[15].mxu0 }
 0x1c5   : > { %v3801_v47 = vadd.f32 %v3800_v46, %v3799_v43  ;;  %v3864_v48 = vpop.f32.mrb[15].mxu1 }
 0x1c6   : > { %v5681_v49 = vadd.f32 %v3862_v44, %v3798_v41  ;;  %v3865_v25 = vadd.f32 %v3864_v48, %v3863_v45 }
 0x1c8   : > { %v5683_v50 = vadd.f32 %v3865_v25, %v3801_v47 }
 0x1c9   : > { %v3802_v51 = vpop.f32.mrb[16].mxu0 }
 0x1ca   : > { %v3866_v52 = vpop.f32.mrb[16].mxu1  ;;  %v3803_v53 = vpop.f32.mrb[17].mxu0 }
 0x1cb   : > { %v3804_v54 = vadd.f32 %v3803_v53, %v3802_v51  ;;  %v3867_v55 = vpop.f32.mrb[17].mxu1  ;;  %v3805_v56 = vpop.f32.mrb[18].mxu0 }
 0x1cc   : > { %v3868_v57 = vadd.f32 %v3867_v55, %v3866_v52  ;;  %v3869_v58 = vpop.f32.mrb[18].mxu1  ;;  %v3806_v59 = vpop.f32.mrb[19].mxu0 }
 0x1cd   : > { %v3807_v61 = vadd.f32 %v3806_v59, %v3805_v56  ;;  %v3870_v39 = vpop.f32.mrb[19].mxu1 }
 0x1ce   : > { %v5685_v62 = vadd.f32 %v3868_v57, %v3804_v54  ;;  %v3871_v63 = vadd.f32 %v3870_v39, %v3869_v58 }
 0x1d0   : > { %v5687_v0 = vadd.f32 %v3871_v63, %v3807_v61 }
 0x1d1   : > { %v3808_v2 = vpop.f32.mrb[20].mxu0 }
 0x1d2   : > { %v3872_v3 = vpop.f32.mrb[20].mxu1  ;;  %v3809_v4 = vpop.f32.mrb[21].mxu0 }
 0x1d3   : > { %v3810_v5 = vadd.f32 %v3809_v4, %v3808_v2  ;;  %v3873_v1 = vpop.f32.mrb[21].mxu1  ;;  %v3811_v8 = vpop.f32.mrb[22].mxu0 }
 0x1d4   : > { %v3874_v60 = vadd.f32 %v3873_v1, %v3872_v3  ;;  %v3875_v10 = vpop.f32.mrb[22].mxu1  ;;  %v3812_v11 = vpop.f32.mrb[23].mxu0 }
 0x1d5   : > { %v3813_v12 = vadd.f32 %v3812_v11, %v3811_v8  ;;  %v3876_v13 = vpop.f32.mrb[23].mxu1 }
 0x1d6   : > { %v5689_v14 = vadd.f32 %v3874_v60, %v3810_v5  ;;  %v3877_v15 = vadd.f32 %v3876_v13, %v3875_v10 }
 0x1d8   : > { %v5691_v16 = vadd.f32 %v3877_v15, %v3813_v12 }
 0x1d9   : > { %v3814_v17 = vpop.f32.mrb[24].mxu0 }
 0x1da   : > { %v3878_v18 = vpop.f32.mrb[24].mxu1  ;;  %v3815_v19 = vpop.f32.mrb[25].mxu0 }
 0x1db   : > { %v3816_v21 = vadd.f32 %v3815_v19, %v3814_v17  ;;  %v3879_v23 = vpop.f32.mrb[25].mxu1  ;;  %v3817_v24 = vpop.f32.mrb[26].mxu0 }
 0x1dc   : > { %v3880_v26 = vadd.f32 %v3879_v23, %v3878_v18  ;;  %v3881_v27 = vpop.f32.mrb[26].mxu1  ;;  %v3818_v28 = vpop.f32.mrb[27].mxu0 }
 0x1dd   : > { %v3819_v29 = vadd.f32 %v3818_v28, %v3817_v24  ;;  %v3882_v30 = vpop.f32.mrb[27].mxu1 }
 0x1de   : > { %v5693_v31 = vadd.f32 %v3880_v26, %v3816_v21  ;;  %v3883_v32 = vadd.f32 %v3882_v30, %v3881_v27 }
 0x1e0   : > { %v5695_v33 = vadd.f32 %v3883_v32, %v3819_v29 }
 0x1e1   : > { %v3820_v34 = vpop.f32.mrb[28].mxu0 }
 0x1e2   : > { %v3884_v7 = vpop.f32.mrb[28].mxu1  ;;  %v3821_v37 = vpop.f32.mrb[29].mxu0 }
 0x1e3   : > { %v3822_v38 = vadd.f32 %v3821_v37, %v3820_v34  ;;  %v3885_v40 = vpop.f32.mrb[29].mxu1  ;;  %v3823_v41 = vpop.f32.mrb[30].mxu0 }
 0x1e4   : > { %v3886_v42 = vadd.f32 %v3885_v40, %v3884_v7  ;;  %v3887_v43 = vpop.f32.mrb[30].mxu1  ;;  %v3824_v44 = vpop.f32.mrb[31].mxu0 }
 0x1e5   : > { %v3825_v45 = vadd.f32 %v3824_v44, %v3823_v41  ;;  %v3888_v46 = vpop.f32.mrb[31].mxu1 }
 0x1e6   : > { %v5697_v47 = vadd.f32 %v3886_v42, %v3822_v38  ;;  %v3889_v48 = vadd.f32 %v3888_v46, %v3887_v43 }
 0x1e8   : > { %v5699_v25 = vadd.f32 %v3889_v48, %v3825_v45 }
 0x1e9   : > { %v3906_v51 = vpop.f32.mrb[32].mxu0 }
 0x1ea   : > { %v3970_v52 = vpop.f32.mrb[32].mxu1  ;;  %v3907_v53 = vpop.f32.mrb[33].mxu0 }
 0x1eb   : > { %v3908_v54 = vadd.f32 %v3907_v53, %v3906_v51  ;;  %v3971_v55 = vpop.f32.mrb[33].mxu1  ;;  %v3909_v56 = vpop.f32.mrb[34].mxu0 }
 0x1ec   : > { %v3972_v57 = vadd.f32 %v3971_v55, %v3970_v52  ;;  %v3973_v58 = vpop.f32.mrb[34].mxu1  ;;  %v3910_v59 = vpop.f32.mrb[35].mxu0 }
 0x1ed   : > { %v2547_v61 = vadd.f32 %v3908_v54, %v5669_v6  ;;  %v3911_v39 = vadd.f32 %v3910_v59, %v3909_v56  ;;  %v3974_v63 = vpop.f32.mrb[35].mxu1 }
 0x1ee   : > { %v3975_v2 = vadd.f32 %v3974_v63, %v3973_v58 }
 0x1ef   : > { %v2550_v3 = vadd.f32 %v3911_v39, %v5671_v9  ;;  %v5703_v4 = vadd.f32 %v3972_v57, %v2547_v61 }
 0x1f1   : > { %v3912_v5 = vpop.f32.mrb[36].mxu0  ;;  %v5705_v1 = vadd.f32 %v3975_v2, %v2550_v3 }
 0x1f2   : > { %v3913_v8 = vpop.f32.mrb[37].mxu0  ;;  %v3976_v60 = vpop.f32.mrb[36].mxu1 }
 0x1f3   : > { %v3914_v10 = vadd.f32 %v3913_v8, %v3912_v5  ;;  %v3915_v11 = vpop.f32.mrb[38].mxu0  ;;  %v3977_v12 = vpop.f32.mrb[37].mxu1 }
 0x1f4   : > { %v3916_v13 = vpop.f32.mrb[39].mxu0  ;;  %v3978_v17 = vadd.f32 %v3977_v12, %v3976_v60  ;;  %v3979_v6 = vpop.f32.mrb[38].mxu1 }
 0x1f5   : > { %v2555_v15 = vadd.f32 %v3914_v10, %v5673_v20  ;;  %v3917_v18 = vadd.f32 %v3916_v13, %v3915_v11  ;;  %v3980_v19 = vpop.f32.mrb[39].mxu1 }
 0x1f6   : > { %v3981_v9 = vadd.f32 %v3980_v19, %v3979_v6 }
 0x1f7   : > { %v2558_v21 = vadd.f32 %v3917_v18, %v5675_v22  ;;  %v5709_v23 = vadd.f32 %v3978_v17, %v2555_v15 }
 0x1f9   : > { %v3918_v24 = vpop.f32.mrb[40].mxu0  ;;  %v5711_v26 = vadd.f32 %v3981_v9, %v2558_v21 }
 0x1fa   : > { %v3919_v27 = vpop.f32.mrb[41].mxu0  ;;  %v3982_v28 = vpop.f32.mrb[40].mxu1 }
 0x1fb   : > { %v3920_v29 = vadd.f32 %v3919_v27, %v3918_v24  ;;  %v3921_v30 = vpop.f32.mrb[42].mxu0  ;;  %v3983_v32 = vpop.f32.mrb[41].mxu1 }
 0x1fc   : > { %v3922_v34 = vpop.f32.mrb[43].mxu0  ;;  %v3984_v7 = vadd.f32 %v3983_v32, %v3982_v28  ;;  %v3985_v37 = vpop.f32.mrb[42].mxu1 }
 0x1fd   : > { %v2563_v20 = vadd.f32 %v3920_v29, %v5677_v35  ;;  %v3923_v38 = vadd.f32 %v3922_v34, %v3921_v30  ;;  %v3986_v40 = vpop.f32.mrb[43].mxu1 }
 0x1fe   : > { %v3987_v41 = vadd.f32 %v3986_v40, %v3985_v37 }
 0x1ff   : > { %v2566_v22 = vadd.f32 %v3923_v38, %v5679_v36  ;;  %v5715_v42 = vadd.f32 %v3984_v7, %v2563_v20 }
 0x201   : > { %v3924_v43 = vpop.f32.mrb[44].mxu0  ;;  %v5717_v44 = vadd.f32 %v3987_v41, %v2566_v22 }
 0x202   : > { %v3925_v45 = vpop.f32.mrb[45].mxu0  ;;  %v3988_v46 = vpop.f32.mrb[44].mxu1 }
 0x203   : > { %v3926_v48 = vadd.f32 %v3925_v45, %v3924_v43  ;;  %v3927_v51 = vpop.f32.mrb[46].mxu0  ;;  %v3989_v52 = vpop.f32.mrb[45].mxu1 }
 0x204   : > { %v3928_v53 = vpop.f32.mrb[47].mxu0  ;;  %v3990_v54 = vadd.f32 %v3989_v52, %v3988_v46  ;;  %v3991_v55 = vpop.f32.mrb[46].mxu1 }
 0x205   : > { %v2571_v35 = vadd.f32 %v3926_v48, %v5681_v49  ;;  %v3929_v56 = vadd.f32 %v3928_v53, %v3927_v51  ;;  %v3992_v57 = vpop.f32.mrb[47].mxu1 }
 0x206   : > { %v3993_v58 = vadd.f32 %v3992_v57, %v3991_v55 }
 0x207   : > { %v2574_v36 = vadd.f32 %v3929_v56, %v5683_v50  ;;  %v5721_v59 = vadd.f32 %v3990_v54, %v2571_v35 }
 0x209   : > { %v3930_v61 = vpop.f32.mrb[48].mxu0  ;;  %v5723_v39 = vadd.f32 %v3993_v58, %v2574_v36 }
 0x20a   : > { %v3931_v63 = vpop.f32.mrb[49].mxu0  ;;  %v3994_v2 = vpop.f32.mrb[48].mxu1 }
 0x20b   : > { %v3932_v3 = vadd.f32 %v3931_v63, %v3930_v61  ;;  %v3933_v5 = vpop.f32.mrb[50].mxu0  ;;  %v3995_v8 = vpop.f32.mrb[49].mxu1 }
 0x20c   : > { %v3934_v60 = vpop.f32.mrb[51].mxu0  ;;  %v3996_v10 = vadd.f32 %v3995_v8, %v3994_v2  ;;  %v3997_v11 = vpop.f32.mrb[50].mxu1 }
 0x20d   : > { %v2579_v49 = vadd.f32 %v3932_v3, %v5685_v62  ;;  %v3935_v12 = vadd.f32 %v3934_v60, %v3933_v5  ;;  %v3998_v13 = vpop.f32.mrb[51].mxu1 }
 0x20e   : > { %v3999_v15 = vadd.f32 %v3998_v13, %v3997_v11 }
 0x20f   : > { %v2582_v50 = vadd.f32 %v3935_v12, %v5687_v0  ;;  %v2676_v17 = vadd.f32 %v3996_v10, %v2579_v49 }
 0x211   : > { %v3936_v6 = vpop.f32.mrb[52].mxu0  ;;  %v5727_v18 = vadd.f32 %v3999_v15, %v2582_v50 }
 0x212   : > { %v3937_v19 = vpop.f32.mrb[53].mxu0  ;;  %v4000_v21 = vpop.f32.mrb[52].mxu1 }
 0x213   : > { %v3938_v9 = vadd.f32 %v3937_v19, %v3936_v6  ;;  %v3939_v24 = vpop.f32.mrb[54].mxu0  ;;  %v4001_v27 = vpop.f32.mrb[53].mxu1 }
 0x214   : > { %v3940_v28 = vpop.f32.mrb[55].mxu0  ;;  %v4002_v62 = vadd.f32 %v4001_v27, %v4000_v21  ;;  %v4003_v30 = vpop.f32.mrb[54].mxu1 }
 0x215   : > { %v2587_v29 = vadd.f32 %v3938_v9, %v5689_v14  ;;  %v3941_v32 = vadd.f32 %v3940_v28, %v3939_v24  ;;  %v4004_v34 = vpop.f32.mrb[55].mxu1 }
 0x216   : > { %v4005_v0 = vadd.f32 %v4004_v34, %v4003_v30 }
 0x217   : > { %v2590_v20 = vadd.f32 %v3941_v32, %v5691_v16  ;;  %v2684_v7 = vadd.f32 %v4002_v62, %v2587_v29 }
 0x219   : > { %v3942_v37 = vpop.f32.mrb[56].mxu0  ;;  %v2687_v38 = vadd.f32 %v4005_v0, %v2590_v20 }
 0x21a   : > { %v3943_v40 = vpop.f32.mrb[57].mxu0  ;;  %v4006_v22 = vpop.f32.mrb[56].mxu1 }
 0x21b   : > { %v3944_v41 = vadd.f32 %v3943_v40, %v3942_v37  ;;  %v3945_v43 = vpop.f32.mrb[58].mxu0  ;;  %v4007_v45 = vpop.f32.mrb[57].mxu1 }
 0x21c   : > { %v3946_v46 = vpop.f32.mrb[59].mxu0  ;;  %v4008_v51 = vadd.f32 %v4007_v45, %v4006_v22  ;;  %v4009_v14 = vpop.f32.mrb[58].mxu1 }
 0x21d   : > { %v2595_v48 = vadd.f32 %v3944_v41, %v5693_v31  ;;  %v3947_v52 = vadd.f32 %v3946_v46, %v3945_v43  ;;  %v4010_v53 = vpop.f32.mrb[59].mxu1 }
 0x21e   : > { %v4011_v54 = vadd.f32 %v4010_v53, %v4009_v14 }
 0x21f   : > { %v2598_v35 = vadd.f32 %v3947_v52, %v5695_v33  ;;  %v2692_v16 = vadd.f32 %v4008_v51, %v2595_v48 }
 0x221   : > { %v3948_v55 = vpop.f32.mrb[60].mxu0  ;;  %v2695_v56 = vadd.f32 %v4011_v54, %v2598_v35 }
 0x222   : > { %v3949_v57 = vpop.f32.mrb[61].mxu0  ;;  %v4012_v36 = vpop.f32.mrb[60].mxu1 }
 0x223   : > { %v3950_v58 = vadd.f32 %v3949_v57, %v3948_v55  ;;  %v3951_v61 = vpop.f32.mrb[62].mxu0  ;;  %v4013_v63 = vpop.f32.mrb[61].mxu1 }
 0x224   : > { %v3952_v2 = vpop.f32.mrb[63].mxu0  ;;  %v4014_v5 = vadd.f32 %v4013_v63, %v4012_v36  ;;  %v4015_v31 = vpop.f32.mrb[62].mxu1 }
 0x225   : > { %v2603_v3 = vadd.f32 %v3950_v58, %v5697_v47  ;;  %v3953_v8 = vadd.f32 %v3952_v2, %v3951_v61  ;;  %v4016_v60 = vpop.f32.mrb[63].mxu1 }
 0x226   : > { %v4017_v10 = vadd.f32 %v4016_v60, %v4015_v31 }
 0x227   : > { %v2606_v49 = vadd.f32 %v3953_v8, %v5699_v25  ;;  %v2700_v33 = vadd.f32 %v4014_v5, %v2603_v3 }
 0x229   : > { %v4068_v11 = vpop.f32.mrb[64].mxu0  ;;  %v2703_v12 = vadd.f32 %v4017_v10, %v2606_v49 }
 0x22a   : > { %v2749_v13 = vadd.f32 %v4068_v11, %v5709_v23  ;;  %v2740_v50 = vpop.f32.mrb[65].mxu0  ;;  %v4076_v15 = vpop.f32.mrb[64].mxu1 }
 0x22b   : > { %v2741_v6 = vadd.f32 %v2740_v50, %v5703_v4  ;;  %v4069_v19 = vpop.f32.mrb[66].mxu0  ;;  %v5737_v21 = vadd.f32 %v4076_v15, %v2684_v7  ;;  %v2772_v47 = vpop.f32.mrb[65].mxu1 }
 0x22c   : > { %v2752_v9 = vadd.f32 %v4069_v19, %v5711_v26  ;;  %v2743_v24 = vpop.f32.mrb[67].mxu0  ;;  %v5740_v27 = vadd.f32 %v2772_v47, %v2676_v17  ;;  %v4077_v25 = vpop.f32.mrb[66].mxu1  ;;  %2809 = vst [vmem:[#allocation3 + $0x10] sm:$0xff] (!%p3741_p9), %v2749_v13 }
 0x22d   : > { %v2744_v28 = vadd.f32 %v2743_v24, %v5705_v1  ;;  %v5743_v29 = vadd.f32 %v4077_v25, %v2687_v38  ;;  %v2775_v62 = vpop.f32.mrb[67].mxu1  ;;  %2807 = vst [vmem:[#allocation3] sm:$0xff] (!%p3741_p9), %v2741_v6  ;;  %2817 = vst [vmem:[#allocation3 + $0x50] sm:$0xff] (!%p3741_p9), %v5737_v21 }
 0x22e   : > { %v5746_v23 = vadd.f32 %v2775_v62, %v5727_v18  ;;  %2810 = vst [vmem:[#allocation3 + $0x18] sm:$0xff] (!%p3741_p9), %v2752_v9  ;;  %2815 = vst [vmem:[#allocation3 + $0x40] sm:$0xff] (!%p3741_p9), %v5740_v27 }
 0x22f   : > { %2808 = vst [vmem:[#allocation3 + $0x8] sm:$0xff] (!%p3741_p9), %v2744_v28  ;;  %2818 = vst [vmem:[#allocation3 + $0x58] sm:$0xff] (!%p3741_p9), %v5743_v29 }
 0x230   : > { %2806 = sbr.rel (%p3741_p9) target bundleno = 569 (0x239), region = 56  ;;  %2816 = vst [vmem:[#allocation3 + $0x48] sm:$0xff] (!%p3741_p9), %v5746_v23 }
 0x231   : > { %v4072_v30 = vpop.f32.mrb[68].mxu0 }
 0x232   : > { %v2765_v4 = vadd.f32 %v4072_v30, %v5721_v59  ;;  %v2756_v32 = vpop.f32.mrb[69].mxu0  ;;  %v4080_v34 = vpop.f32.mrb[68].mxu1 }
 0x233   : > { %v2757_v26 = vadd.f32 %v2756_v32, %v5715_v42  ;;  %v4073_v20 = vpop.f32.mrb[70].mxu0  ;;  %v5750_v17 = vadd.f32 %v4080_v34, %v2700_v33  ;;  %v2788_v0 = vpop.f32.mrb[69].mxu1 }
 0x234   : > { %v2768_v1 = vadd.f32 %v4073_v20, %v5723_v39  ;;  %v2759_v7 = vpop.f32.mrb[71].mxu0  ;;  %v5753_v37 = vadd.f32 %v2788_v0, %v2692_v16  ;;  %v4081_v38 = vpop.f32.mrb[70].mxu1  ;;  %2813 = vst [vmem:[#allocation3 + $0x30] sm:$0xff] (!%p3741_p9), %v2765_v4 }
 0x235   : > { %v2760_v18 = vadd.f32 %v2759_v7, %v5717_v44  ;;  %v5756_v40 = vadd.f32 %v4081_v38, %v2703_v12  ;;  %v2791_v22 = vpop.f32.mrb[71].mxu1  ;;  %2811 = vst [vmem:[#allocation3 + $0x20] sm:$0xff] (!%p3741_p9), %v2757_v26  ;;  %2821 = vst [vmem:[#allocation3 + $0x70] sm:$0xff] (!%p3741_p9), %v5750_v17 }
 0x236   : > { %v2792_v59 = vadd.f32 %v2791_v22, %v2695_v56  ;;  %2814 = vst [vmem:[#allocation3 + $0x38] sm:$0xff] (!%p3741_p9), %v2768_v1  ;;  %2819 = vst [vmem:[#allocation3 + $0x60] sm:$0xff] (!%p3741_p9), %v5753_v37 }
 0x237   : > { %2812 = vst [vmem:[#allocation3 + $0x28] sm:$0xff] %v2760_v18  ;;  %2822 = vst [vmem:[#allocation3 + $0x78] sm:$0xff] %v5756_v40 }
 0x238   : > { %2820 = vst [vmem:[#allocation3 + $0x68] sm:$0xff] %v2792_v59 }
 0x239 PF: > { %s6038_s0 = sld [smem:[#allocation18_spill]] }
 0x23f   : > { %p3742_p13 = scmp.le.s32.totalorder %s6038_s0, 0 }
 0x240   : > { %v2827_v42 = vld [vmem:[#allocation3] sm:$0xff] (!%p3742_p13)  ;;  %v2828_v44 = vld [vmem:[#allocation3 + $0x8] sm:$0xff] (!%p3742_p13)  ;;  %v2829_v39 = vld [vmem:[#allocation3 + $0x10] sm:$0xff] (!%p3742_p13) }
 0x241   : > { %2826 = sbr.rel (%p3742_p13) target bundleno = 587 (0x24b), region = 60  ;;  %v2843_v41 = vadd.f32 (!%p3742_p13), %v2827_v42, %v2741_v6  ;;  %v2844_v43 = vadd.f32 (!%p3742_p13), %v2828_v44, %v2744_v28  ;;  %v2845_v45 = vadd.f32 (!%p3742_p13), %v2829_v39, %v2749_v13  ;;  %v2830_v46 = vld [vmem:[#allocation3 + $0x18] sm:$0xff] (!%p3742_p13)  ;;  %v2831_v48 = vld [vmem:[#allocation3 + $0x20] sm:$0xff] (!%p3742_p13)  ;;  %v2832_v51 = vld [vmem:[#allocation3 + $0x28] sm:$0xff] (!%p3742_p13) }
 0x242   : > { %v2846_v14 = vadd.f32 (!%p3742_p13), %v2830_v46, %v2752_v9  ;;  %v2847_v52 = vadd.f32 (!%p3742_p13), %v2831_v48, %v2757_v26  ;;  %v2848_v53 = vadd.f32 (!%p3742_p13), %v2832_v51, %v2760_v18  ;;  %v2833_v35 = vld [vmem:[#allocation3 + $0x30] sm:$0xff] (!%p3742_p13)  ;;  %v2834_v54 = vld [vmem:[#allocation3 + $0x38] sm:$0xff] (!%p3742_p13)  ;;  %v2835_v16 = vld [vmem:[#allocation3 + $0x40] sm:$0xff] (!%p3742_p13) }
 0x243   : > { %2859 = vst [vmem:[#allocation3] sm:$0xff] (!%p3742_p13), %v2843_v41  ;;  %2860 = vst [vmem:[#allocation3 + $0x8] sm:$0xff] (!%p3742_p13), %v2844_v43  ;;  %v2849_v55 = vadd.f32 (!%p3742_p13), %v2833_v35, %v2765_v4  ;;  %v2850_v56 = vadd.f32 (!%p3742_p13), %v2834_v54, %v2768_v1  ;;  %v2851_v57 = vadd.f32 (!%p3742_p13), %v2835_v16, %v5740_v27  ;;  %v2836_v36 = vld [vmem:[#allocation3 + $0x48] sm:$0xff] (!%p3742_p13)  ;;  %v2837_v58 = vld [vmem:[#allocation3 + $0x50] sm:$0xff] (!%p3742_p13) }
 0x244   : > { %2861 = vst [vmem:[#allocation3 + $0x10] sm:$0xff] (!%p3742_p13), %v2845_v45  ;;  %v2838_v61 = vld [vmem:[#allocation3 + $0x58] sm:$0xff] (!%p3742_p13)  ;;  %2862 = vst [vmem:[#allocation3 + $0x18] sm:$0xff] (!%p3742_p13), %v2846_v14  ;;  %v2852_v63 = vadd.f32 (!%p3742_p13), %v2836_v36, %v5746_v23  ;;  %v2853_v2 = vadd.f32 (!%p3742_p13), %v2837_v58, %v5737_v21  ;;  %v2839_v5 = vld [vmem:[#allocation3 + $0x60] sm:$0xff] (!%p3742_p13) }
 0x245   : > { %2863 = vst [vmem:[#allocation3 + $0x20] sm:$0xff] (!%p3742_p13), %v2847_v52  ;;  %2864 = vst [vmem:[#allocation3 + $0x28] sm:$0xff] (!%p3742_p13), %v2848_v53  ;;  %v2854_v3 = vadd.f32 (!%p3742_p13), %v2838_v61, %v5743_v29  ;;  %v2840_v31 = vld [vmem:[#allocation3 + $0x68] sm:$0xff] (!%p3742_p13)  ;;  %v2841_v8 = vld [vmem:[#allocation3 + $0x70] sm:$0xff] (!%p3742_p13)  ;;  %v2855_v60 = vadd.f32 (!%p3742_p13), %v2839_v5, %v5753_v37 }
 0x246   : > { %2865 = vst [vmem:[#allocation3 + $0x30] sm:$0xff] (!%p3742_p13), %v2849_v55  ;;  %2866 = vst [vmem:[#allocation3 + $0x38] sm:$0xff] (!%p3742_p13), %v2850_v56  ;;  %v2856_v49 = vadd.f32 (!%p3742_p13), %v2840_v31, %v2792_v59  ;;  %v2857_v10 = vadd.f32 (!%p3742_p13), %v2841_v8, %v5750_v17  ;;  %v2842_v33 = vld [vmem:[#allocation3 + $0x78] sm:$0xff] (!%p3742_p13) }
 0x247   : > { %2867 = vst [vmem:[#allocation3 + $0x40] sm:$0xff] (!%p3742_p13), %v2851_v57  ;;  %2868 = vst [vmem:[#allocation3 + $0x48] sm:$0xff] (!%p3742_p13), %v2852_v63  ;;  %v2858_v11 = vadd.f32 (!%p3742_p13), %v2842_v33, %v5756_v40 }
 0x248   : > { %2869 = vst [vmem:[#allocation3 + $0x50] sm:$0xff] %v2853_v2  ;;  %2870 = vst [vmem:[#allocation3 + $0x58] sm:$0xff] %v2854_v3 }
 0x249   : > { %2871 = vst [vmem:[#allocation3 + $0x60] sm:$0xff] %v2855_v60  ;;  %2872 = vst [vmem:[#allocation3 + $0x68] sm:$0xff] %v2856_v49 }
 0x24a   : > { %2873 = vst [vmem:[#allocation3 + $0x70] sm:$0xff] %v2857_v10  ;;  %2874 = vst [vmem:[#allocation3 + $0x78] sm:$0xff] %v2858_v11 }
 0x24b PF: > { %s6039_s6 = sld [smem:[#allocation18_spill]] }
 0x251   : > { %p3743_p11 = scmp.ne.s32.totalorder %s6039_s6, 1 }
 0x252   : > { %s6040_s5 = sld [smem:[#allocation31_spill]] (!%p3743_p11)  ;;  %v2879_v6 = vld [vmem:[#allocation3] sm:$0xff] (!%p3743_p11)  ;;  %v2880_v19 = vld [vmem:[#allocation3 + $0x8] sm:$0xff] (!%p3743_p11)  ;;  %v2881_v62 = vld [vmem:[#allocation3 + $0x10] sm:$0xff] (!%p3743_p11)  ;;  %s6041_s15 = sld [smem:[#allocation32_spill]] (!%p3743_p11) }
 0x253   : > { %2878 = sbr.rel (%p3743_p11) target bundleno = 861 (0x35d), region = 64  ;;  %v2887_v21 = vld [vmem:[#allocation3 + $0x40] sm:$0xff] (!%p3743_p11)  ;;  %v2895_v47 = vpack.c.bf16 (!%p3743_p11), %v2880_v19, %v2879_v6  ;;  %v2888_v9 = vld [vmem:[#allocation3 + $0x48] sm:$0xff] (!%p3743_p11)  ;;  %v2882_v23 = vld [vmem:[#allocation3 + $0x18] sm:$0xff] (!%p3743_p11) }
 0x254   : > { %v2899_v24 = vpack.c.bf16 (!%p3743_p11), %v2888_v9, %v2887_v21  ;;  %v2889_v30 = vld [vmem:[#allocation3 + $0x50] sm:$0xff] (!%p3743_p11)  ;;  %v2890_v4 = vld [vmem:[#allocation3 + $0x58] sm:$0xff] (!%p3743_p11)  ;;  %v2883_v32 = vld [vmem:[#allocation3 + $0x20] sm:$0xff] (!%p3743_p11)  ;;  %v2896_v17 = vpack.c.bf16 (!%p3743_p11), %v2882_v23, %v2881_v62 }
 0x255   : > { %4098 = vmatprep.mubr.bf16.mxu0 (!%p3743_p11), %v2895_v47  ;;  %v2884_v34 = vld [vmem:[#allocation3 + $0x28] sm:$0xff] (!%p3743_p11)  ;;  %v2891_v26 = vld [vmem:[#allocation3 + $0x60] sm:$0xff] (!%p3743_p11)  ;;  %v2900_v0 = vpack.c.bf16 (!%p3743_p11), %v2890_v4, %v2889_v30  ;;  %v2885_v37 = vld [vmem:[#allocation3 + $0x30] sm:$0xff] (!%p3743_p11) }
 0x256   : > { %4106 = vmatprep.mubr.bf16.mxu1 (!%p3743_p11), %v2899_v24  ;;  %v2892_v20 = vld [vmem:[#allocation3 + $0x68] sm:$0xff] (!%p3743_p11)  ;;  %v2897_v1 = vpack.c.bf16 (!%p3743_p11), %v2884_v34, %v2883_v32  ;;  %v2886_v38 = vld [vmem:[#allocation3 + $0x38] sm:$0xff] (!%p3743_p11)  ;;  %v2893_v18 = vld [vmem:[#allocation3 + $0x70] sm:$0xff] (!%p3743_p11) }
 0x257   : > { %v2901_v7 = vpack.c.bf16 (!%p3743_p11), %v2892_v20, %v2891_v26  ;;  %v2894_v40 = vld [vmem:[#allocation3 + $0x78] sm:$0xff] (!%p3743_p11)  ;;  %v2898_v22 = vpack.c.bf16 (!%p3743_p11), %v2886_v38, %v2885_v37  ;;  %v3073_v39 = vld [vmem:[%s5048_s2 + $0x10] sm:$0xff] (!%p3743_p11)  ;;  %v3071_v51 = vld [vmem:[%s5048_s2] sm:$0xff] (!%p3743_p11) }
 0x258   : > { %v4382_v12 = vld [vmem:[%s6040_s5] sm:$0xff] (!%p3743_p11)   ;;  %v4383_v13 = vld [vmem:[%s6040_s5 + $0x8] sm:$0xff] (!%p3743_p11)   ;;  %v4384_v50 = vld [vmem:[%s6040_s5 + $0x10] sm:$0xff] (!%p3743_p11)   ;;  %v2902_v59 = vpack.c.bf16 (!%p3743_p11), %v2894_v40, %v2893_v18 }
 0x259   : > { %4082 = vmatprep.subr.bf16.mxu0 (!%p3743_p11), %v4382_v12  ;;  %4130 = vmatprep.subr.bf16.mxu1 (!%p3743_p11), %v4382_v12  ;;  %v4385_v15 = vld [vmem:[%s6040_s5 + $0x18] sm:$0xff] (!%p3743_p11)   ;;  %v4386_v27 = vld [vmem:[%s6040_s5 + $0x20] sm:$0xff] (!%p3743_p11)   ;;  %v4387_v25 = vld [vmem:[%s6040_s5 + $0x28] sm:$0xff] (!%p3743_p11)  }
 0x25a   : > { %4083 = vmatpush3.bf16.msra.mxu0 %v4382_v12  ;;  %4138 = vmatpush3.bf16.msra.mxu1 %v4382_v12  ;;  %v4388_v28 = vld [vmem:[%s6040_s5 + $0x30] sm:$0xff]   ;;  %v4389_v29 = vld [vmem:[%s6040_s5 + $0x38] sm:$0xff]   ;;  %v5805_v42 = vld [vmem:[%s6041_s15] ss:$0 sm:$0xff] }
 0x25b   : > { %4084 = vmatprep.subr.bf16.mxu0 %v4383_v13  ;;  %4131 = vmatprep.subr.bf16.mxu1 %v4383_v13  ;;  %v3081_v43 = vld [vmem:[%s5048_s2 + $0x50] sm:$0xff]  ;;  %v3079_v52 = vld [vmem:[%s5048_s2 + $0x40] sm:$0xff]  ;;  %v3074_v16 = vld [vmem:[%s5048_s2 + $0x18] sm:$0xff] }
 0x25c   : > { %v3082_v56 = vld [vmem:[%s5048_s2 + $0x58] sm:$0xff]  ;;  %v3072_v2 = vld [vmem:[%s5048_s2 + $0x8] sm:$0xff]  ;;  %v3085_v6 = vld [vmem:[%s5048_s2 + $0x70] sm:$0xff] }
 0x25d   : > { %v3080_v5 = vld [vmem:[%s5048_s2 + $0x48] sm:$0xff]  ;;  %v3075_v9 = vld [vmem:[%s5048_s2 + $0x20] sm:$0xff]  ;;  %v3078_v62 = vld [vmem:[%s5048_s2 + $0x38] sm:$0xff] }
 0x25e   : > { %4085 = vmatpush3.bf16.msra.mxu0 %v4383_v13  ;;  %4139 = vmatpush3.bf16.msra.mxu1 %v4383_v13  ;;  %v3086_v30 = vld [vmem:[%s5048_s2 + $0x78] sm:$0xff] }
 0x25f   : > { %4086 = vmatprep.subr.bf16.mxu0 %v4384_v50  ;;  %4132 = vmatprep.subr.bf16.mxu1 %v4384_v50 }
 0x262   : > { %4087 = vmatpush3.bf16.msra.mxu0 %v4384_v50  ;;  %4140 = vmatpush3.bf16.msra.mxu1 %v4384_v50  ;;  %v3077_v50 = vld [vmem:[%s5048_s2 + $0x30] sm:$0xff] }
 0x263   : > { %4088 = vmatprep.subr.bf16.mxu0 %v4385_v15  ;;  %4133 = vmatprep.subr.bf16.mxu1 %v4385_v15 }
 0x266   : > { %4089 = vmatpush3.bf16.msra.mxu0 %v4385_v15  ;;  %4141 = vmatpush3.bf16.msra.mxu1 %v4385_v15 }
 0x267   : > { %4090 = vmatprep.subr.bf16.mxu0 %v4386_v27  ;;  %4134 = vmatprep.subr.bf16.mxu1 %v4386_v27 }
 0x26a   : > { %4091 = vmatpush3.bf16.msra.mxu0 %v4386_v27  ;;  %4142 = vmatpush3.bf16.msra.mxu1 %v4386_v27  ;;  %v3083_v27 = vld [vmem:[%s5048_s2 + $0x60] sm:$0xff] }
 0x26b   : > { %4092 = vmatprep.subr.bf16.mxu0 %v4387_v25  ;;  %4135 = vmatprep.subr.bf16.mxu1 %v4387_v25 }
 0x26e   : > { %4093 = vmatpush3.bf16.msra.mxu0 %v4387_v25  ;;  %4143 = vmatpush3.bf16.msra.mxu1 %v4387_v25 }
 0x26f   : > { %4094 = vmatprep.subr.bf16.mxu0 %v4388_v28  ;;  %4136 = vmatprep.subr.bf16.mxu1 %v4388_v28 }
 0x272   : > { %4095 = vmatpush3.bf16.msra.mxu0 %v4388_v28  ;;  %4144 = vmatpush3.bf16.msra.mxu1 %v4388_v28 }
 0x273   : > { %4096 = vmatprep.subr.bf16.mxu0 %v4389_v29  ;;  %4137 = vmatprep.subr.bf16.mxu1 %v4389_v29 }
 0x276   : > { %4097 = vmatpush3.bf16.msra.mxu0 %v4389_v29  ;;  %4145 = vmatpush3.bf16.msra.mxu1 %v4389_v29 }
 0x279   : > { %4099 = vmatmul.mubr.bf16.vlgmr.msra.gmra.mrb[0].mxu0 %v2896_v17  ;;  %4107 = vmatmul.mubr.bf16.vlgmr.msra.gmra.mrb[0].mxu1 %v2900_v0  ;;  %v3076_v17 = vld [vmem:[%s5048_s2 + $0x28] sm:$0xff] }
 0x27a   : > { %4102 = vmatprep.mubr.bf16.mxu0 %v2897_v1  ;;  %4110 = vmatprep.mubr.bf16.mxu1 %v2901_v7  ;;  %v3084_v1 = vld [vmem:[%s5048_s2 + $0x68] sm:$0xff] }
 0x281   : > { %4103 = vmatmul.mubr.bf16.gmra.mrb[4].mxu0 %v2898_v22  ;;  %4111 = vmatmul.mubr.bf16.gmra.mrb[4].mxu1 %v2902_v59 }
 0x34c   : > { %v4100_v44 = vpop.f32.mrb[0].mxu0  ;;  %v4108_v41 = vpop.f32.mrb[0].mxu1 }
 0x34d   : > { %v3017_v45 = vadd.f32 %v4100_v44, %v5805_v42  ;;  %v3049_v46 = vadd.f32 %v4108_v41, %v5805_v42  ;;  %v3008_v48 = vpop.f32.mrb[1].mxu0  ;;  %v3040_v14 = vpop.f32.mrb[1].mxu1 }
 0x34e   : > { %v3009_v53 = vadd.f32 %v5805_v42, %v3008_v48  ;;  %v3041_v35 = vadd.f32 %v5805_v42, %v3040_v14  ;;  %v4101_v54 = vpop.f32.mrb[2].mxu0  ;;  %v4109_v55 = vpop.f32.mrb[2].mxu1 }
 0x34f   : > { %v3089_v57 = vadd.f32 %v3073_v39, %v3017_v45  ;;  %v3097_v36 = vadd.f32 %v3081_v43, %v3049_v46  ;;  %v3020_v58 = vadd.f32 %v4101_v54, %v5805_v42  ;;  %v3052_v61 = vadd.f32 %v4109_v55, %v5805_v42  ;;  %v3011_v63 = vpop.f32.mrb[3].mxu0  ;;  %v3043_v3 = vpop.f32.mrb[3].mxu1 }
 0x350   : > { %v3087_v31 = vadd.f32 %v3071_v51, %v3009_v53  ;;  %v3095_v8 = vadd.f32 %v3079_v52, %v3041_v35  ;;  %v3012_v60 = vadd.f32 %v5805_v42, %v3011_v63  ;;  %v3044_v49 = vadd.f32 %v5805_v42, %v3043_v3 }
 0x351   : > { %3105 = vst [vmem:[%s5759_s12 + $0x10] sm:$0xff] %v3089_v57  ;;  %3113 = vst [vmem:[%s5759_s12 + $0x50] sm:$0xff] %v3097_v36  ;;  %v3090_v10 = vadd.f32 %v3074_v16, %v3020_v58  ;;  %v3098_v33 = vadd.f32 %v3082_v56, %v3052_v61 }
 0x352   : > { %3103 = vst [vmem:[%s5759_s12] sm:$0xff] %v3087_v31  ;;  %3111 = vst [vmem:[%s5759_s12 + $0x40] sm:$0xff] %v3095_v8  ;;  %v3088_v11 = vadd.f32 %v3072_v2, %v3012_v60  ;;  %v3096_v12 = vadd.f32 %v3080_v5, %v3044_v49 }
 0x353   : > { %3106 = vst [vmem:[%s5759_s12 + $0x18] sm:$0xff] %v3090_v10  ;;  %3114 = vst [vmem:[%s5759_s12 + $0x58] sm:$0xff] %v3098_v33 }
 0x354   : > { %3104 = vst [vmem:[%s5759_s12 + $0x8] sm:$0xff] %v3088_v11  ;;  %3112 = vst [vmem:[%s5759_s12 + $0x48] sm:$0xff] %v3096_v12  ;;  %v4104_v13 = vpop.f32.mrb[4].mxu0  ;;  %v4112_v15 = vpop.f32.mrb[4].mxu1 }
 0x355   : > { %v3033_v19 = vadd.f32 %v4104_v13, %v5805_v42  ;;  %v3065_v21 = vadd.f32 %v4112_v15, %v5805_v42  ;;  %v3024_v47 = vpop.f32.mrb[5].mxu0  ;;  %v3056_v24 = vpop.f32.mrb[5].mxu1 }
 0x356   : > { %v3025_v25 = vadd.f32 %v5805_v42, %v3024_v47  ;;  %v3057_v28 = vadd.f32 %v5805_v42, %v3056_v24  ;;  %v4105_v29 = vpop.f32.mrb[6].mxu0  ;;  %v4113_v23 = vpop.f32.mrb[6].mxu1 }
 0x357   : > { %v3093_v4 = vadd.f32 %v3077_v50, %v3033_v19  ;;  %v3101_v32 = vadd.f32 %v3085_v6, %v3065_v21  ;;  %v3036_v34 = vadd.f32 %v4105_v29, %v5805_v42  ;;  %v3068_v26 = vadd.f32 %v4113_v23, %v5805_v42  ;;  %v3027_v20 = vpop.f32.mrb[7].mxu0  ;;  %v3059_v0 = vpop.f32.mrb[7].mxu1 }
 0x358   : > { %v3091_v7 = vadd.f32 %v3075_v9, %v3025_v25  ;;  %v3099_v37 = vadd.f32 %v3083_v27, %v3057_v28  ;;  %v3028_v38 = vadd.f32 %v5805_v42, %v3027_v20  ;;  %v3060_v18 = vadd.f32 %v5805_v42, %v3059_v0 }
 0x359   : > { %3109 = vst [vmem:[%s5759_s12 + $0x30] sm:$0xff] %v3093_v4  ;;  %3117 = vst [vmem:[%s5759_s12 + $0x70] sm:$0xff] %v3101_v32  ;;  %v3094_v40 = vadd.f32 %v3078_v62, %v3036_v34  ;;  %v3102_v22 = vadd.f32 %v3086_v30, %v3068_v26 }
 0x35a   : > { %3107 = vst [vmem:[%s5759_s12 + $0x20] sm:$0xff] %v3091_v7  ;;  %3115 = vst [vmem:[%s5759_s12 + $0x60] sm:$0xff] %v3099_v37  ;;  %v3092_v59 = vadd.f32 %v3076_v17, %v3028_v38  ;;  %v3100_v44 = vadd.f32 %v3084_v1, %v3060_v18 }
 0x35b   : > { %3110 = vst [vmem:[%s5759_s12 + $0x38] sm:$0xff] %v3094_v40  ;;  %3118 = vst [vmem:[%s5759_s12 + $0x78] sm:$0xff] %v3102_v22 }
 0x35c   : > { %3108 = vst [vmem:[%s5759_s12 + $0x28] sm:$0xff] %v3092_v59  ;;  %3116 = vst [vmem:[%s5759_s12 + $0x68] sm:$0xff] %v3100_v44 }
 0x35d PF: > { %s6042_s2 = sld [smem:[#allocation19_spill]]  ;;  %s6043_s16 = sld [smem:[#allocation20_spill]] }
 0x35e   : > { %s6045_s1 = sld [smem:[#allocation28_spill]]  ;;  %s3136_s29 = sshll.u32 %s5759_s12, 4  ;;  %s5858_s29 = int_to_ptr.vmem [resolvable:$true] %s3136_s29 }
 0x35f   : > { %s6046_s13 = sld [smem:[#allocation33_spill]]  ;;  %s5867_s6 = scalar_lea.sflag [#allocation6], %s310_s14 }
 0x360   : > { %s4480_s19 = scalar_lea.vmem %s5858_s29, 2048  ;;  %s4659_s12 = smov [#allocation10]  }
 0x361   : > { %p4481_p12 = scmp.ne.s32.totalorder %s5858_s29, %s4480_s19  ;;  %s4484_s27 = sshll.u32 %s4659_s12, 4  ;;  %s4485_s27 = int_to_ptr.vmem [resolvable:$false] %s4484_s27 }
 0x362   : > { %s4486_s15 = scalar_lea.vmem %s4485_s27, 4096  ;;  %p4487_p6 = scmp.lt.s32.totalorder %s5858_s29, %s4485_s27 }
 0x363   : > { %s3761_s24 = sshll.u32 %s6042_s2, 4  ;;  %s3756_s23 = sshll.u32 %s6043_s16, 5 }
 0x364   : > { %s3133_s21 = sadd.s32 %s3761_s24, %s3756_s23  ;;  %p6047_p3 = scmp.ne.s32.totalorder %s6045_s1, 0 }
 0x365   : > { %s3757_s9 = sshll.u32 %s3133_s21, 7  ;;  %p4488_p4 = scmp.lt.s32.totalorder %s4486_s15, %s4480_s19 }
 0x366   : > { %s5863_s0 = scalar_lea.hbm %s6046_s13, %s3757_s9  ;;  %p4482_p7 = pnand %p4481_p12, %p6047_p3 }
 0x367   : > { %p4489_p5 = por %p4488_p4, %p4487_p6 }
 0x368   : > { %p4483_p8 = pneg %p4482_p7 }
 0x36a   : > { %p4490_p1 = pnand %p4489_p5, %p4483_p8 }
 0x36c   : > { %4493 = shalt.err (!%p4490_p1)
}
 0x36d   : > { %s4494_s14 = scalar_lea.hbm %s5863_s0, 2048  ;;  %s4498_s3 = scalar_lea.hbm %s6046_s13, 8192 }
 0x36e   : > { %p4495_p2 = scmp.ne.s32.totalorder %s5863_s0, %s4494_s14  ;;  %p4499_p9 = scmp.lt.u32.totalorder %s5863_s0, %s6046_s13 }
 0x36f   : > { %p4500_p13 = scmp.lt.u32.totalorder %s4498_s3, %s4494_s14  ;;  %p4502_p12 = scmp.lt.u32.totalorder %s4494_s14, %s5863_s0 }
 0x370   : > { %p4496_p0 = pnand %p4495_p2, %p6047_p3 }
 0x371   : > { %p4501_p11 = por %p4500_p13, %p4499_p9 }
 0x372   : > { %p4497_p10 = pneg %p4496_p0 }
 0x373   : > { %p4503_p7 = por %p4502_p12, %p4501_p11 }
 0x375   : > { %p4504_p8 = pnand %p4503_p7, %p4497_p10 }
 0x377   : > { %4507 = shalt.err (!%p4504_p8)
}
 0x378   : > { %s4660_s21 = smov 128   ;;  %s4661_s9 = smov 8  }
 0x379   : > { %4158 = dma.vmem_to_hbm [thread:$0]  (%p6047_p3), %s5858_s29, 2048, %s5863_s0, %s5867_s6, %s4660_s21, %s4660_s21, %s4661_s9  }
 0x37a PF: > { %s6048_s10 = sld [smem:[#allocation15_spill]]  ;;  %p4175_p6 = scmp.ge.s32.totalorder %s4650_s8, 2 }
 0x37b   : > { %p6049_p4 = scmp.ne.s32.totalorder %s6019_s30, 0 }
 0x37d   : > { %p4171_p5 = pnand %p4175_p6, %p6049_p4 }
 0x380   : > { %s3151_s17 = sand.u32 1, %s6048_s10  }
 0x381   : > { %s3152_s19 = scalar_lea.sflag [#allocation6], %s3151_s17 }
 0x382   : > { %4585 = dma.done.wait (!%p4171_p5), %s3152_s19, 2048  }
 0x383   : > { %4587 = vsyncadd (!%p4171_p5), %s3152_s19, 4294965248  ;;  %s24_s8 = sadd.s32 1, %s4650_s8   ;;  %s6051_s27 = sld [smem:[#allocation16_spill]] }
 0x384   : > { %p5896_p1 = scmp.ge.s32.totalorder %s24_s8, 10   ;;  %s6052_s1 = smov %s4979_s18 }
 0x385   : > { %s6053_s29 = sld [smem:[#allocation17_spill]]  ;;  %s6054_s23 = sld [smem:[#allocation25_spill]] }
 0x386   : > { %s6055_s30 = sld [smem:[#allocation21_spill]]  ;;  %s6056_s0 = sld [smem:[#allocation22_spill]] }
 0x387   : > { %s6057_s6 = sld [smem:[#allocation23_spill]]  ;;  %s6058_s15 = sld [smem:[#allocation27_spill]] }
 0x388   : > { %s6060_s19 = smov %s4598_s20  ;;  %s6061_s20 = smov %s6052_s1 }
 0x389   : > { %s6059_s18 = smov %s6051_s27  ;;  %s6062_s21 = smov %s4606_s22 }
 0x38a   : > { %s6064_s24 = smov %s4618_s25  ;;  %s6065_s25 = smov %s4622_s26 }
 0x38b   : > { %s6063_s22 = smov %s6053_s29  ;;  %s6066_s26 = smov %s4976_s28 }
 0x38c   : > { %s6067_s27 = smov %s6055_s30  ;;  %s6068_s28 = smov %s6056_s0 }
 0x38d   : > { %s6069_s29 = smov %s4646_s7  ;;  %s6070_s30 = smov %s6057_s6 }
 0x38e   : > { %s6071_s6 = smov %s6058_s15  ;;  %s6072_s7 = smov %s6082_s11 }
 0x38f   :  { %23 = sbr.rel (!%p5896_p1) target bundleno = 19 (0x13), region = 124 }
 0x396   :  { %3157 = vsyncpa [#allocation5], 1 }
 0x397   :  { %3159 = vsyncpa [#allocation5 + $0x1], 1 }
 0x398   :  { %3160 = vsyncpa [#allocation8], 1 }
 0x399   :  { %3162 = vsyncpa [#allocation8 + $0x1], 1 }
 0x39a   :  { %3163 = vsyncpa [#allocation6], 1 }
 0x39b   :  { %3165 = vsyncpa [#allocation6 + $0x1], 1 }

</bundles_post_ra>
